<compile_context>
chip_gen: v7x
topology: tpu7x:2x2x1
jax: 0.10.0
libtpu: 0.0.40
codegen_flags: <defaults>
</compile_context>

<pallas_src>
import jax
import jax.numpy as jnp
from jax import lax
from jax.experimental import pallas as pl
from jax.experimental.pallas import tpu as pltpu

# ---- small demo config (original: T=60, F=6, stocks=4121; hidden/factors unset) ----
B = 2             # batch_size
T = 8             # time steps          (production: 60)
S = 128           # num_stocks          (production: 4121)
F = 6             # num_features / input_size
H = 32            # hidden_size -> 4H = 128 = one full lane width
K = 8             # num_factors
TN = 128          # batch tile on the lane axis; production: 256-512
RECURRENCE_UNROLL = 4   # partial unroll of the serial T-loop (review item 6)
BN_EPS = 1e-5


def lstm_tile_kernel(x_ref,       # (T, F, TN)   bf16   time-major, N on lanes
                     wih1_ref,    # (4H, F)      bf16
                     whh1_ref,    # (4H, H)      bf16
                     b1_ref,      # (4H, 1)      f32    (b_ih + b_hh folded)
                     w2_ref,      # (4H, 2H)     bf16   fused [W_ih2 | W_hh2]
                     b2_ref,      # (4H, 1)      f32
                     wfc_ref,     # (K, H)       bf16
                     bfc_ref,     # (K, 1)       f32
                     fc_ref,      # (K, TN)      f32 out
                     xproj_ref,   # (T, 4H, TN)  bf16 scratch
                     hcat_ref):   # (2H, TN)     bf16 scratch, holds [h1; h2]
    t_steps, _, tn = x_ref.shape
    four_h, h = whh1_ref.shape

    wih1 = wih1_ref[...]
    whh1 = whh1_ref[...]
    w2 = w2_ref[...]
    wfc = wfc_ref[...]
    # Hoisted broadcasts (JAX does not CSE broadcast_in_dim inside loops).
    b1b = jnp.broadcast_to(b1_ref[...], (four_h, tn))
    b2b = jnp.broadcast_to(b2_ref[...], (four_h, tn))
    bfcb = jnp.broadcast_to(bfc_ref[...], (fc_ref.shape[0], tn))

    # ---- hoisted layer-1 input projection (off the serial recurrence path) ----
    # One (4H, F) @ (F, TN) MXU call per time step; bias folded in f32, stored bf16.
    @pl.loop(0, t_steps)
    def _(t):
        xp = jnp.dot(wih1, x_ref[t], preferred_element_type=jnp.float32) + b1b
        xproj_ref[t] = xp.astype(jnp.bfloat16)

    def gates(g, c_prev):
        # PyTorch gate order i, f, g, o.  Sublane-aligned slices (H % 8 == 0),
        # lanes fully dense; all gate/elementwise math in f32 (v5e-safe).
        i_g = jax.nn.sigmoid(g[0 * h:1 * h, :])
        f_g = jax.nn.sigmoid(g[1 * h:2 * h, :])
        g_g = jnp.tanh(g[2 * h:3 * h, :])
        o_g = jax.nn.sigmoid(g[3 * h:4 * h, :])
        c_new = f_g * c_prev + i_g * g_g
        return o_g * jnp.tanh(c_new), c_new

    def step(t, carry):
        h1, c1, h2, c2 = carry
        # Layer 1: only the recurrent matmul is on the serial critical path.
        g1 = xproj_ref[t].astype(jnp.float32) + jnp.dot(
            whh1, h1.astype(jnp.bfloat16), preferred_element_type=jnp.float32)
        h1, c1 = gates(g1, c1)
        # Layer 2: write into the persistent [h1; h2] buffer (sublane-aligned,
        # unmasked stores; no per-step concatenate), then one fused matmul with
        # contraction depth 2H instead of two depth-H matmuls.
        hcat_ref[0 * h:1 * h, :] = h1.astype(jnp.bfloat16)
        hcat_ref[1 * h:2 * h, :] = h2.astype(jnp.bfloat16)
        g2 = jnp.dot(w2, hcat_ref[...], preferred_element_type=jnp.float32) + b2b
        h2, c2 = gates(g2, c2)
        return h1, c1, h2, c2

    zeros = jnp.zeros((h, tn), jnp.float32)
    carry0 = (zeros, zeros, zeros, zeros)
    # Partial unroll (review item 6): a rolled loop over UNROLL-step chunks keeps
    # LLO scheduling visibility without spilling the four (H, TN) f32 carries at
    # production T=60.
    u_steps = RECURRENCE_UNROLL if t_steps % RECURRENCE_UNROLL == 0 else 1

    def chunk(ci, carry):
        for j in range(u_steps):
            carry = step(ci * u_steps + j, carry)
        return carry

    _, _, h2, _ = lax.fori_loop(0, t_steps // u_steps, chunk, carry0)

    # Final-step hidden of layer 2 == lstm_out[:, -1, :]; FC output stays (K, TN)
    # so stores are lane-dense.  BatchNorm over the full N happens outside.
    fc_ref[...] = jnp.dot(wfc, h2.astype(jnp.bfloat16),
                          preferred_element_type=jnp.float32) + bfcb


def init_params(key):
    ks = jax.random.split(key, 8)
    bound = 1.0 / (H ** 0.5)

    def u(k, shape):
        return jax.random.uniform(k, shape, jnp.float32, -bound, bound)

    return dict(
        wih1_t=u(ks[0], (4 * H, F)),     # torch weight_ih_l0 layout (4H, in)
        whh1_t=u(ks[1], (4 * H, H)),
        b1=u(ks[2], (4 * H, 1)),         # b_ih_l0 + b_hh_l0 folded
        wih2_t=u(ks[3], (4 * H, H)),
        whh2_t=u(ks[4], (4 * H, H)),
        b2=u(ks[5], (4 * H, 1)),         # b_ih_l1 + b_hh_l1 folded
        wfc_t=u(ks[6], (K, H)),          # torch fc.weight layout (out, in)
        bfc=u(ks[7], (K, 1)),
        gamma=jnp.ones((K, 1), jnp.float32),
        beta=jnp.zeros((K, 1), jnp.float32),
    )


@jax.jit
def my_model_forward(x, params):
    b, t, s, f = x.shape
    n = b * s
    # Exact torch semantics: x.view(-1, T, F) is a raw row-major reinterpretation.
    x2 = jnp.reshape(x, (n, t, f))
    # Time-major, features on sublanes, batch on lanes: (T, F, N).  bf16 halves DMA.
    xt = jnp.transpose(x2, (1, 2, 0)).astype(jnp.bfloat16)

    tn = min(TN, n)
    n_tiles = pl.cdiv(n, tn)
    n_pad = n_tiles * tn
    if n_pad != n:                       # ragged N (e.g. 2*4121): pad, slice after
        xt = jnp.pad(xt, ((0, 0), (0, 0), (0, n_pad - n)))

    # bf16 MXU operands, f32 accumulation; layer-2 weights fused once.
    wih1 = params["wih1_t"].astype(jnp.bfloat16)                       # (4H, F)
    whh1 = params["whh1_t"].astype(jnp.bfloat16)                       # (4H, H)
    w2 = jnp.concatenate([params["wih2_t"], params["whh2_t"]],
                         axis=1).astype(jnp.bfloat16)                  # (4H, 2H)
    wfc = params["wfc_t"].astype(jnp.bfloat16)                         # (K, H)

    fc = pl.pallas_call(
        lstm_tile_kernel,
        out_shape=jax.ShapeDtypeStruct((K, n_pad), jnp.float32),
        grid_spec=pltpu.PrefetchScalarGridSpec(
            num_scalar_prefetch=0,
            grid=(n_tiles,),
            in_specs=[
                pl.BlockSpec((t, f, tn), lambda i: (0, 0, i)),       # x tile
                pl.BlockSpec((4 * H, F), lambda i: (0, 0)),          # wih1 (resident)
                pl.BlockSpec((4 * H, H), lambda i: (0, 0)),          # whh1
                pl.BlockSpec((4 * H, 1), lambda i: (0, 0)),          # b1
                pl.BlockSpec((4 * H, 2 * H), lambda i: (0, 0)),      # fused w2
                pl.BlockSpec((4 * H, 1), lambda i: (0, 0)),          # b2
                pl.BlockSpec((K, H), lambda i: (0, 0)),              # wfc
                pl.BlockSpec((K, 1), lambda i: (0, 0)),              # bfc
            ],
            out_specs=pl.BlockSpec((K, tn), lambda i: (0, i)),
            scratch_shapes=[
                pltpu.VMEM((t, 4 * H, tn), jnp.bfloat16),   # xproj (bf16, item 2)
                pltpu.VMEM((2 * H, tn), jnp.bfloat16),      # persistent [h1; h2]
            ]),
        compiler_params=pltpu.CompilerParams(
            dimension_semantics=("parallel",),       # megacore-shardable on v7x
            vmem_limit_bytes=32 * 1024 * 1024,       # fits v7x's 64 MiB physical
        ),
    )(xt, wih1, whh1, params["b1"], w2, params["b2"], wfc, params["bfc"])

    fc = fc[:, :n]                                   # drop pad columns

    # BatchNorm1d (training-mode batch statistics over ALL N rows) in plain XLA:
    # a Pallas BN on (N, K=8) would run at 8/128 lane occupancy (review item 8).
    # TODO(synk): running_mean/running_var buffer updates (torch side effect) are
    # not materialized; eval()-mode BN would use them instead of batch stats.
    mean = jnp.mean(fc, axis=1, keepdims=True)
    var = jnp.mean(jnp.square(fc - mean), axis=1, keepdims=True)
    fc_bn = (fc - mean) * lax.rsqrt(var + BN_EPS) * params["gamma"] + params["beta"]

    factor_output = jnp.transpose(fc_bn).reshape(b, s, K)
    # torch also computes c = factor_output.mean(dim=2) but discards it.
    return factor_output


if __name__ == "__main__":
    key = jax.random.PRNGKey(0)
    kx, kp = jax.random.split(key)
    x = jax.random.normal(kx, (B, T, S, F), dtype=jnp.float32)
    params = init_params(kp)

    out = my_model_forward(x, params)
    out = jax.block_until_ready(out)
    assert out.shape == (B, S, K), out.shape
    assert bool(jnp.all(jnp.isfinite(out)))
    print("KERNEL_OK")
</pallas_src>

<mosaic_0001>
module attributes {stable_mosaic.version = 11 : i64} {
  func.func @lstm_tile_kernel(%arg0: i32, %arg1: memref<8x6x128xbf16, #tpu.memory_space<vmem>>, %arg2: memref<128x6xbf16, #tpu.memory_space<vmem>>, %arg3: memref<128x32xbf16, #tpu.memory_space<vmem>>, %arg4: memref<128x1xf32, #tpu.memory_space<vmem>>, %arg5: memref<128x64xbf16, #tpu.memory_space<vmem>>, %arg6: memref<128x1xf32, #tpu.memory_space<vmem>>, %arg7: memref<8x32xbf16, #tpu.memory_space<vmem>>, %arg8: memref<8x1xf32, #tpu.memory_space<vmem>>, %arg9: memref<8x128xf32, #tpu.memory_space<vmem>>, %arg10: memref<8x128x128xbf16, #tpu.memory_space<vmem>>, %arg11: memref<64x128xbf16, #tpu.memory_space<vmem>>) attributes {dimension_semantics = [#tpu.dimension_semantics<parallel>], iteration_bounds = array<i64: 2>, scalar_prefetch = 0 : i64, scratch_operands = 2 : i64, tpu.core_type = #tpu.core_type<tc>, window_params = [{transform_indices = @transform_0, window_bounds = array<i64: 8, 6, 128>}, {pipeline_mode = #tpu.pipeline_mode<synchronous>, transform_indices = @transform_1, window_bounds = array<i64: 128, 6>}, {pipeline_mode = #tpu.pipeline_mode<synchronous>, transform_indices = @transform_2, window_bounds = array<i64: 128, 32>}, {pipeline_mode = #tpu.pipeline_mode<synchronous>, transform_indices = @transform_3, window_bounds = array<i64: 128, 1>}, {pipeline_mode = #tpu.pipeline_mode<synchronous>, transform_indices = @transform_4, window_bounds = array<i64: 128, 64>}, {pipeline_mode = #tpu.pipeline_mode<synchronous>, transform_indices = @transform_5, window_bounds = array<i64: 128, 1>}, {pipeline_mode = #tpu.pipeline_mode<synchronous>, transform_indices = @transform_6, window_bounds = array<i64: 8, 32>}, {pipeline_mode = #tpu.pipeline_mode<synchronous>, transform_indices = @transform_7, window_bounds = array<i64: 8, 1>}, {transform_indices = @transform_8, window_bounds = array<i64: 8, 128>}]} {
    %c0 = arith.constant 0 : index
    %c0_0 = arith.constant 0 : index
    %0 = vector.load %arg2[%c0, %c0_0] : memref<128x6xbf16, #tpu.memory_space<vmem>>, vector<128x6xbf16>
    %c0_1 = arith.constant 0 : index
    %c0_2 = arith.constant 0 : index
    %1 = vector.load %arg3[%c0_1, %c0_2] : memref<128x32xbf16, #tpu.memory_space<vmem>>, vector<128x32xbf16>
    %c0_3 = arith.constant 0 : index
    %c0_4 = arith.constant 0 : index
    %2 = vector.load %arg5[%c0_3, %c0_4] : memref<128x64xbf16, #tpu.memory_space<vmem>>, vector<128x64xbf16>
    %c0_5 = arith.constant 0 : index
    %c0_6 = arith.constant 0 : index
    %3 = vector.load %arg7[%c0_5, %c0_6] : memref<8x32xbf16, #tpu.memory_space<vmem>>, vector<8x32xbf16>
    %c0_7 = arith.constant 0 : index
    %c0_8 = arith.constant 0 : index
    %4 = vector.load %arg4[%c0_7, %c0_8] : memref<128x1xf32, #tpu.memory_space<vmem>>, vector<128x1xf32>
    %5 = vector.shape_cast %4 : vector<128x1xf32> to vector<128x1xf32>
    %6 = vector.broadcast %5 : vector<128x1xf32> to vector<128x128xf32>
    %c0_9 = arith.constant 0 : index
    %c0_10 = arith.constant 0 : index
    %7 = vector.load %arg6[%c0_9, %c0_10] : memref<128x1xf32, #tpu.memory_space<vmem>>, vector<128x1xf32>
    %8 = vector.shape_cast %7 : vector<128x1xf32> to vector<128x1xf32>
    %9 = vector.broadcast %8 : vector<128x1xf32> to vector<128x128xf32>
    %c0_11 = arith.constant 0 : index
    %c0_12 = arith.constant 0 : index
    %10 = vector.load %arg8[%c0_11, %c0_12] : memref<8x1xf32, #tpu.memory_space<vmem>>, vector<8x1xf32>
    %11 = vector.shape_cast %10 : vector<8x1xf32> to vector<8x1xf32>
    %12 = vector.broadcast %11 : vector<8x1xf32> to vector<8x128xf32>
    %c0_i32 = arith.constant 0 : i32
    %c8_i32 = arith.constant 8 : i32
    %13 = arith.addi %c0_i32, %c8_i32 : i32
    %c1_i32 = arith.constant 1 : i32
    scf.for %arg12 = %c0_i32 to %13 step %c1_i32  : i32 {
      %c1_i32_20 = arith.constant 1 : i32
      %21 = arith.muli %arg12, %c1_i32_20 : i32
      %c0_i32_21 = arith.constant 0 : i32
      %22 = arith.addi %c0_i32_21, %21 : i32
      %23 = arith.index_cast %22 : i32 to index
      %c0_22 = arith.constant 0 : index
      %c0_23 = arith.constant 0 : index
      %24 = vector.load %arg1[%23, %c0_22, %c0_23] : memref<8x6x128xbf16, #tpu.memory_space<vmem>>, vector<1x6x128xbf16>
      %25 = vector.shape_cast %24 : vector<1x6x128xbf16> to vector<6x128xbf16>
      %cst_24 = arith.constant dense<0.000000e+00> : vector<128x128xf32>
      %26 = tpu.matmul %0, %25, %cst_24 {dimension_numbers = #tpu.dot_dimension_numbers<[1], [0], [0], [1], [0, 0, 1, 1], [], []>} : vector<128x6xbf16>, vector<6x128xbf16>, vector<128x128xf32> -> vector<128x128xf32>
      %27 = arith.addf %26, %6 : vector<128x128xf32>
      %28 = arith.truncf %27 : vector<128x128xf32> to vector<128x128xbf16>
      %29 = arith.index_cast %22 : i32 to index
      %c0_25 = arith.constant 0 : index
      %c0_26 = arith.constant 0 : index
      %30 = vector.load %arg10[%29, %c0_25, %c0_26] : memref<8x128x128xbf16, #tpu.memory_space<vmem>>, vector<1x128x128xbf16>
      %31 = vector.shape_cast %30 : vector<1x128x128xbf16> to vector<128x128xbf16>
      %32 = vector.shape_cast %28 : vector<128x128xbf16> to vector<1x128x128xbf16>
      tpu.vector_store %arg10[%29, %c0_25, %c0_26], %32 {strides = array<i32>} : memref<8x128x128xbf16, #tpu.memory_space<vmem>>, vector<1x128x128xbf16>,
    }
    %c8_i32_13 = arith.constant 8 : i32
    %cst = arith.constant 0.000000e+00 : f32
    %14 = vector.broadcast %cst : f32 to vector<32x128xf32>
    %c0_i32_14 = arith.constant 0 : i32
    %c2_i32 = arith.constant 2 : i32
    %15 = arith.addi %c0_i32_14, %c2_i32 : i32
    %c1_i32_15 = arith.constant 1 : i32
    %16:4 = scf.for %arg12 = %c0_i32_14 to %15 step %c1_i32_15 iter_args(%arg13 = %14, %arg14 = %14, %arg15 = %14, %arg16 = %14) -> (vector<32x128xf32>, vector<32x128xf32>, vector<32x128xf32>, vector<32x128xf32>)  : i32 {
      %c4_i32 = arith.constant 4 : i32
      %21 = arith.muli %arg12, %c4_i32 : i32
      %c0_i32_20 = arith.constant 0 : i32
      %22 = arith.addi %21, %c0_i32_20 : i32
      %23 = arith.index_cast %22 : i32 to index
      %c0_21 = arith.constant 0 : index
      %c0_22 = arith.constant 0 : index
      %24 = vector.load %arg10[%23, %c0_21, %c0_22] : memref<8x128x128xbf16, #tpu.memory_space<vmem>>, vector<1x128x128xbf16>
      %25 = vector.shape_cast %24 : vector<1x128x128xbf16> to vector<128x128xbf16>
      %26 = arith.extf %25 : vector<128x128xbf16> to vector<128x128xf32>
      %27 = arith.truncf %arg13 : vector<32x128xf32> to vector<32x128xbf16>
      %cst_23 = arith.constant dense<0.000000e+00> : vector<128x128xf32>
      %28 = tpu.matmul %1, %27, %cst_23 {dimension_numbers = #tpu.dot_dimension_numbers<[1], [0], [0], [1], [0, 0, 1, 1], [], []>} : vector<128x32xbf16>, vector<32x128xbf16>, vector<128x128xf32> -> vector<128x128xf32>
      %29 = arith.addf %26, %28 : vector<128x128xf32>
      %30 = vector.extract_strided_slice %29 {offsets = [0, 0], sizes = [32, 128], strides = [1, 1]} : vector<128x128xf32> to vector<32x128xf32>
      %31 = arith.negf %30 : vector<32x128xf32>
      %32 = math.exp %31 : vector<32x128xf32>
      %cst_24 = arith.constant 1.000000e+00 : f32
      %33 = vector.broadcast %cst_24 : f32 to vector<32x128xf32>
      %34 = arith.addf %33, %32 : vector<32x128xf32>
      %35 = arith.divf %33, %34 : vector<32x128xf32>
      %36 = vector.extract_strided_slice %29 {offsets = [32, 0], sizes = [32, 128], strides = [1, 1]} : vector<128x128xf32> to vector<32x128xf32>
      %37 = arith.negf %36 : vector<32x128xf32>
      %38 = math.exp %37 : vector<32x128xf32>
      %cst_25 = arith.constant 1.000000e+00 : f32
      %39 = vector.broadcast %cst_25 : f32 to vector<32x128xf32>
      %40 = arith.addf %39, %38 : vector<32x128xf32>
      %41 = arith.divf %39, %40 : vector<32x128xf32>
      %42 = vector.extract_strided_slice %29 {offsets = [64, 0], sizes = [32, 128], strides = [1, 1]} : vector<128x128xf32> to vector<32x128xf32>
      %43 = math.tanh %42 : vector<32x128xf32>
      %44 = vector.extract_strided_slice %29 {offsets = [96, 0], sizes = [32, 128], strides = [1, 1]} : vector<128x128xf32> to vector<32x128xf32>
      %45 = arith.negf %44 : vector<32x128xf32>
      %46 = math.exp %45 : vector<32x128xf32>
      %cst_26 = arith.constant 1.000000e+00 : f32
      %47 = vector.broadcast %cst_26 : f32 to vector<32x128xf32>
      %48 = arith.addf %47, %46 : vector<32x128xf32>
      %49 = arith.divf %47, %48 : vector<32x128xf32>
      %50 = arith.mulf %41, %arg14 : vector<32x128xf32>
      %51 = arith.mulf %35, %43 : vector<32x128xf32>
      %52 = arith.addf %50, %51 : vector<32x128xf32>
      %53 = math.tanh %52 : vector<32x128xf32>
      %54 = arith.mulf %49, %53 : vector<32x128xf32>
      %55 = arith.truncf %54 : vector<32x128xf32> to vector<32x128xbf16>
      %c0_27 = arith.constant 0 : index
      %c0_28 = arith.constant 0 : index
      %56 = vector.load %arg11[%c0_27, %c0_28] : memref<64x128xbf16, #tpu.memory_space<vmem>>, vector<32x128xbf16>
      tpu.vector_store %arg11[%c0_27, %c0_28], %55 {strides = array<i32>} : memref<64x128xbf16, #tpu.memory_space<vmem>>, vector<32x128xbf16>,
      %57 = arith.truncf %arg15 : vector<32x128xf32> to vector<32x128xbf16>
      %c32 = arith.constant 32 : index
      %c0_29 = arith.constant 0 : index
      %58 = vector.load %arg11[%c32, %c0_29] : memref<64x128xbf16, #tpu.memory_space<vmem>>, vector<32x128xbf16>
      tpu.vector_store %arg11[%c32, %c0_29], %57 {strides = array<i32>} : memref<64x128xbf16, #tpu.memory_space<vmem>>, vector<32x128xbf16>,
      %c0_30 = arith.constant 0 : index
      %c0_31 = arith.constant 0 : index
      %59 = vector.load %arg11[%c0_30, %c0_31] : memref<64x128xbf16, #tpu.memory_space<vmem>>, vector<64x128xbf16>
      %cst_32 = arith.constant dense<0.000000e+00> : vector<128x128xf32>
      %60 = tpu.matmul %2, %59, %cst_32 {dimension_numbers = #tpu.dot_dimension_numbers<[1], [0], [0], [1], [0, 0, 1, 1], [], []>} : vector<128x64xbf16>, vector<64x128xbf16>, vector<128x128xf32> -> vector<128x128xf32>
      %61 = arith.addf %60, %9 : vector<128x128xf32>
      %62 = vector.extract_strided_slice %61 {offsets = [0, 0], sizes = [32, 128], strides = [1, 1]} : vector<128x128xf32> to vector<32x128xf32>
      %63 = arith.negf %62 : vector<32x128xf32>
      %64 = math.exp %63 : vector<32x128xf32>
      %cst_33 = arith.constant 1.000000e+00 : f32
      %65 = vector.broadcast %cst_33 : f32 to vector<32x128xf32>
      %66 = arith.addf %65, %64 : vector<32x128xf32>
      %67 = arith.divf %65, %66 : vector<32x128xf32>
      %68 = vector.extract_strided_slice %61 {offsets = [32, 0], sizes = [32, 128], strides = [1, 1]} : vector<128x128xf32> to vector<32x128xf32>
      %69 = arith.negf %68 : vector<32x128xf32>
      %70 = math.exp %69 : vector<32x128xf32>
      %cst_34 = arith.constant 1.000000e+00 : f32
      %71 = vector.broadcast %cst_34 : f32 to vector<32x128xf32>
      %72 = arith.addf %71, %70 : vector<32x128xf32>
      %73 = arith.divf %71, %72 : vector<32x128xf32>
      %74 = vector.extract_strided_slice %61 {offsets = [64, 0], sizes = [32, 128], strides = [1, 1]} : vector<128x128xf32> to vector<32x128xf32>
      %75 = math.tanh %74 : vector<32x128xf32>
      %76 = vector.extract_strided_slice %61 {offsets = [96, 0], sizes = [32, 128], strides = [1, 1]} : vector<128x128xf32> to vector<32x128xf32>
      %77 = arith.negf %76 : vector<32x128xf32>
      %78 = math.exp %77 : vector<32x128xf32>
      %cst_35 = arith.constant 1.000000e+00 : f32
      %79 = vector.broadcast %cst_35 : f32 to vector<32x128xf32>
      %80 = arith.addf %79, %78 : vector<32x128xf32>
      %81 = arith.divf %79, %80 : vector<32x128xf32>
      %82 = arith.mulf %73, %arg16 : vector<32x128xf32>
      %83 = arith.mulf %67, %75 : vector<32x128xf32>
      %84 = arith.addf %82, %83 : vector<32x128xf32>
      %85 = math.tanh %84 : vector<32x128xf32>
      %86 = arith.mulf %81, %85 : vector<32x128xf32>
      %c4_i32_36 = arith.constant 4 : i32
      %87 = arith.muli %arg12, %c4_i32_36 : i32
      %c1_i32_37 = arith.constant 1 : i32
      %88 = arith.addi %87, %c1_i32_37 : i32
      %89 = arith.index_cast %88 : i32 to index
      %c0_38 = arith.constant 0 : index
      %c0_39 = arith.constant 0 : index
      %90 = vector.load %arg10[%89, %c0_38, %c0_39] : memref<8x128x128xbf16, #tpu.memory_space<vmem>>, vector<1x128x128xbf16>
      %91 = vector.shape_cast %90 : vector<1x128x128xbf16> to vector<128x128xbf16>
      %92 = arith.extf %91 : vector<128x128xbf16> to vector<128x128xf32>
      %93 = arith.truncf %54 : vector<32x128xf32> to vector<32x128xbf16>
      %cst_40 = arith.constant dense<0.000000e+00> : vector<128x128xf32>
      %94 = tpu.matmul %1, %93, %cst_40 {dimension_numbers = #tpu.dot_dimension_numbers<[1], [0], [0], [1], [0, 0, 1, 1], [], []>} : vector<128x32xbf16>, vector<32x128xbf16>, vector<128x128xf32> -> vector<128x128xf32>
      %95 = arith.addf %92, %94 : vector<128x128xf32>
      %96 = vector.extract_strided_slice %95 {offsets = [0, 0], sizes = [32, 128], strides = [1, 1]} : vector<128x128xf32> to vector<32x128xf32>
      %97 = arith.negf %96 : vector<32x128xf32>
      %98 = math.exp %97 : vector<32x128xf32>
      %cst_41 = arith.constant 1.000000e+00 : f32
      %99 = vector.broadcast %cst_41 : f32 to vector<32x128xf32>
      %100 = arith.addf %99, %98 : vector<32x128xf32>
      %101 = arith.divf %99, %100 : vector<32x128xf32>
      %102 = vector.extract_strided_slice %95 {offsets = [32, 0], sizes = [32, 128], strides = [1, 1]} : vector<128x128xf32> to vector<32x128xf32>
      %103 = arith.negf %102 : vector<32x128xf32>
      %104 = math.exp %103 : vector<32x128xf32>
      %cst_42 = arith.constant 1.000000e+00 : f32
      %105 = vector.broadcast %cst_42 : f32 to vector<32x128xf32>
      %106 = arith.addf %105, %104 : vector<32x128xf32>
      %107 = arith.divf %105, %106 : vector<32x128xf32>
      %108 = vector.extract_strided_slice %95 {offsets = [64, 0], sizes = [32, 128], strides = [1, 1]} : vector<128x128xf32> to vector<32x128xf32>
      %109 = math.tanh %108 : vector<32x128xf32>
      %110 = vector.extract_strided_slice %95 {offsets = [96, 0], sizes = [32, 128], strides = [1, 1]} : vector<128x128xf32> to vector<32x128xf32>
      %111 = arith.negf %110 : vector<32x128xf32>
      %112 = math.exp %111 : vector<32x128xf32>
      %cst_43 = arith.constant 1.000000e+00 : f32
      %113 = vector.broadcast %cst_43 : f32 to vector<32x128xf32>
      %114 = arith.addf %113, %112 : vector<32x128xf32>
      %115 = arith.divf %113, %114 : vector<32x128xf32>
      %116 = arith.mulf %107, %52 : vector<32x128xf32>
      %117 = arith.mulf %101, %109 : vector<32x128xf32>
      %118 = arith.addf %116, %117 : vector<32x128xf32>
      %119 = math.tanh %118 : vector<32x128xf32>
      %120 = arith.mulf %115, %119 : vector<32x128xf32>
      %121 = arith.truncf %120 : vector<32x128xf32> to vector<32x128xbf16>
      %c0_44 = arith.constant 0 : index
      %c0_45 = arith.constant 0 : index
      %122 = vector.load %arg11[%c0_44, %c0_45] : memref<64x128xbf16, #tpu.memory_space<vmem>>, vector<32x128xbf16>
      tpu.vector_store %arg11[%c0_44, %c0_45], %121 {strides = array<i32>} : memref<64x128xbf16, #tpu.memory_space<vmem>>, vector<32x128xbf16>,
      %123 = arith.truncf %86 : vector<32x128xf32> to vector<32x128xbf16>
      %c32_46 = arith.constant 32 : index
      %c0_47 = arith.constant 0 : index
      %124 = vector.load %arg11[%c32_46, %c0_47] : memref<64x128xbf16, #tpu.memory_space<vmem>>, vector<32x128xbf16>
      tpu.vector_store %arg11[%c32_46, %c0_47], %123 {strides = array<i32>} : memref<64x128xbf16, #tpu.memory_space<vmem>>, vector<32x128xbf16>,
      %c0_48 = arith.constant 0 : index
      %c0_49 = arith.constant 0 : index
      %125 = vector.load %arg11[%c0_48, %c0_49] : memref<64x128xbf16, #tpu.memory_space<vmem>>, vector<64x128xbf16>
      %cst_50 = arith.constant dense<0.000000e+00> : vector<128x128xf32>
      %126 = tpu.matmul %2, %125, %cst_50 {dimension_numbers = #tpu.dot_dimension_numbers<[1], [0], [0], [1], [0, 0, 1, 1], [], []>} : vector<128x64xbf16>, vector<64x128xbf16>, vector<128x128xf32> -> vector<128x128xf32>
      %127 = arith.addf %126, %9 : vector<128x128xf32>
      %128 = vector.extract_strided_slice %127 {offsets = [0, 0], sizes = [32, 128], strides = [1, 1]} : vector<128x128xf32> to vector<32x128xf32>
      %129 = arith.negf %128 : vector<32x128xf32>
      %130 = math.exp %129 : vector<32x128xf32>
      %cst_51 = arith.constant 1.000000e+00 : f32
      %131 = vector.broadcast %cst_51 : f32 to vector<32x128xf32>
      %132 = arith.addf %131, %130 : vector<32x128xf32>
      %133 = arith.divf %131, %132 : vector<32x128xf32>
      %134 = vector.extract_strided_slice %127 {offsets = [32, 0], sizes = [32, 128], strides = [1, 1]} : vector<128x128xf32> to vector<32x128xf32>
      %135 = arith.negf %134 : vector<32x128xf32>
      %136 = math.exp %135 : vector<32x128xf32>
      %cst_52 = arith.constant 1.000000e+00 : f32
      %137 = vector.broadcast %cst_52 : f32 to vector<32x128xf32>
      %138 = arith.addf %137, %136 : vector<32x128xf32>
      %139 = arith.divf %137, %138 : vector<32x128xf32>
      %140 = vector.extract_strided_slice %127 {offsets = [64, 0], sizes = [32, 128], strides = [1, 1]} : vector<128x128xf32> to vector<32x128xf32>
      %141 = math.tanh %140 : vector<32x128xf32>
      %142 = vector.extract_strided_slice %127 {offsets = [96, 0], sizes = [32, 128], strides = [1, 1]} : vector<128x128xf32> to vector<32x128xf32>
      %143 = arith.negf %142 : vector<32x128xf32>
      %144 = math.exp %143 : vector<32x128xf32>
      %cst_53 = arith.constant 1.000000e+00 : f32
      %145 = vector.broadcast %cst_53 : f32 to vector<32x128xf32>
      %146 = arith.addf %145, %144 : vector<32x128xf32>
      %147 = arith.divf %145, %146 : vector<32x128xf32>
      %148 = arith.mulf %139, %84 : vector<32x128xf32>
      %149 = arith.mulf %133, %141 : vector<32x128xf32>
      %150 = arith.addf %148, %149 : vector<32x128xf32>
      %151 = math.tanh %150 : vector<32x128xf32>
      %152 = arith.mulf %147, %151 : vector<32x128xf32>
      %c4_i32_54 = arith.constant 4 : i32
      %153 = arith.muli %arg12, %c4_i32_54 : i32
      %c2_i32_55 = arith.constant 2 : i32
      %154 = arith.addi %153, %c2_i32_55 : i32
      %155 = arith.index_cast %154 : i32 to index
      %c0_56 = arith.constant 0 : index
      %c0_57 = arith.constant 0 : index
      %156 = vector.load %arg10[%155, %c0_56, %c0_57] : memref<8x128x128xbf16, #tpu.memory_space<vmem>>, vector<1x128x128xbf16>
      %157 = vector.shape_cast %156 : vector<1x128x128xbf16> to vector<128x128xbf16>
      %158 = arith.extf %157 : vector<128x128xbf16> to vector<128x128xf32>
      %159 = arith.truncf %120 : vector<32x128xf32> to vector<32x128xbf16>
      %cst_58 = arith.constant dense<0.000000e+00> : vector<128x128xf32>
      %160 = tpu.matmul %1, %159, %cst_58 {dimension_numbers = #tpu.dot_dimension_numbers<[1], [0], [0], [1], [0, 0, 1, 1], [], []>} : vector<128x32xbf16>, vector<32x128xbf16>, vector<128x128xf32> -> vector<128x128xf32>
      %161 = arith.addf %158, %160 : vector<128x128xf32>
      %162 = vector.extract_strided_slice %161 {offsets = [0, 0], sizes = [32, 128], strides = [1, 1]} : vector<128x128xf32> to vector<32x128xf32>
      %163 = arith.negf %162 : vector<32x128xf32>
      %164 = math.exp %163 : vector<32x128xf32>
      %cst_59 = arith.constant 1.000000e+00 : f32
      %165 = vector.broadcast %cst_59 : f32 to vector<32x128xf32>
      %166 = arith.addf %165, %164 : vector<32x128xf32>
      %167 = arith.divf %165, %166 : vector<32x128xf32>
      %168 = vector.extract_strided_slice %161 {offsets = [32, 0], sizes = [32, 128], strides = [1, 1]} : vector<128x128xf32> to vector<32x128xf32>
      %169 = arith.negf %168 : vector<32x128xf32>
      %170 = math.exp %169 : vector<32x128xf32>
      %cst_60 = arith.constant 1.000000e+00 : f32
      %171 = vector.broadcast %cst_60 : f32 to vector<32x128xf32>
      %172 = arith.addf %171, %170 : vector<32x128xf32>
      %173 = arith.divf %171, %172 : vector<32x128xf32>
      %174 = vector.extract_strided_slice %161 {offsets = [64, 0], sizes = [32, 128], strides = [1, 1]} : vector<128x128xf32> to vector<32x128xf32>
      %175 = math.tanh %174 : vector<32x128xf32>
      %176 = vector.extract_strided_slice %161 {offsets = [96, 0], sizes = [32, 128], strides = [1, 1]} : vector<128x128xf32> to vector<32x128xf32>
      %177 = arith.negf %176 : vector<32x128xf32>
      %178 = math.exp %177 : vector<32x128xf32>
      %cst_61 = arith.constant 1.000000e+00 : f32
      %179 = vector.broadcast %cst_61 : f32 to vector<32x128xf32>
      %180 = arith.addf %179, %178 : vector<32x128xf32>
      %181 = arith.divf %179, %180 : vector<32x128xf32>
      %182 = arith.mulf %173, %118 : vector<32x128xf32>
      %183 = arith.mulf %167, %175 : vector<32x128xf32>
      %184 = arith.addf %182, %183 : vector<32x128xf32>
      %185 = math.tanh %184 : vector<32x128xf32>
      %186 = arith.mulf %181, %185 : vector<32x128xf32>
      %187 = arith.truncf %186 : vector<32x128xf32> to vector<32x128xbf16>
      %c0_62 = arith.constant 0 : index
      %c0_63 = arith.constant 0 : index
      %188 = vector.load %arg11[%c0_62, %c0_63] : memref<64x128xbf16, #tpu.memory_space<vmem>>, vector<32x128xbf16>
      tpu.vector_store %arg11[%c0_62, %c0_63], %187 {strides = array<i32>} : memref<64x128xbf16, #tpu.memory_space<vmem>>, vector<32x128xbf16>,
      %189 = arith.truncf %152 : vector<32x128xf32> to vector<32x128xbf16>
      %c32_64 = arith.constant 32 : index
      %c0_65 = arith.constant 0 : index
      %190 = vector.load %arg11[%c32_64, %c0_65] : memref<64x128xbf16, #tpu.memory_space<vmem>>, vector<32x128xbf16>
      tpu.vector_store %arg11[%c32_64, %c0_65], %189 {strides = array<i32>} : memref<64x128xbf16, #tpu.memory_space<vmem>>, vector<32x128xbf16>,
      %c0_66 = arith.constant 0 : index
      %c0_67 = arith.constant 0 : index
      %191 = vector.load %arg11[%c0_66, %c0_67] : memref<64x128xbf16, #tpu.memory_space<vmem>>, vector<64x128xbf16>
      %cst_68 = arith.constant dense<0.000000e+00> : vector<128x128xf32>
      %192 = tpu.matmul %2, %191, %cst_68 {dimension_numbers = #tpu.dot_dimension_numbers<[1], [0], [0], [1], [0, 0, 1, 1], [], []>} : vector<128x64xbf16>, vector<64x128xbf16>, vector<128x128xf32> -> vector<128x128xf32>
      %193 = arith.addf %192, %9 : vector<128x128xf32>
      %194 = vector.extract_strided_slice %193 {offsets = [0, 0], sizes = [32, 128], strides = [1, 1]} : vector<128x128xf32> to vector<32x128xf32>
      %195 = arith.negf %194 : vector<32x128xf32>
      %196 = math.exp %195 : vector<32x128xf32>
      %cst_69 = arith.constant 1.000000e+00 : f32
      %197 = vector.broadcast %cst_69 : f32 to vector<32x128xf32>
      %198 = arith.addf %197, %196 : vector<32x128xf32>
      %199 = arith.divf %197, %198 : vector<32x128xf32>
      %200 = vector.extract_strided_slice %193 {offsets = [32, 0], sizes = [32, 128], strides = [1, 1]} : vector<128x128xf32> to vector<32x128xf32>
      %201 = arith.negf %200 : vector<32x128xf32>
      %202 = math.exp %201 : vector<32x128xf32>
      %cst_70 = arith.constant 1.000000e+00 : f32
      %203 = vector.broadcast %cst_70 : f32 to vector<32x128xf32>
      %204 = arith.addf %203, %202 : vector<32x128xf32>
      %205 = arith.divf %203, %204 : vector<32x128xf32>
      %206 = vector.extract_strided_slice %193 {offsets = [64, 0], sizes = [32, 128], strides = [1, 1]} : vector<128x128xf32> to vector<32x128xf32>
      %207 = math.tanh %206 : vector<32x128xf32>
      %208 = vector.extract_strided_slice %193 {offsets = [96, 0], sizes = [32, 128], strides = [1, 1]} : vector<128x128xf32> to vector<32x128xf32>
      %209 = arith.negf %208 : vector<32x128xf32>
      %210 = math.exp %209 : vector<32x128xf32>
      %cst_71 = arith.constant 1.000000e+00 : f32
      %211 = vector.broadcast %cst_71 : f32 to vector<32x128xf32>
      %212 = arith.addf %211, %210 : vector<32x128xf32>
      %213 = arith.divf %211, %212 : vector<32x128xf32>
      %214 = arith.mulf %205, %150 : vector<32x128xf32>
      %215 = arith.mulf %199, %207 : vector<32x128xf32>
      %216 = arith.addf %214, %215 : vector<32x128xf32>
      %217 = math.tanh %216 : vector<32x128xf32>
      %218 = arith.mulf %213, %217 : vector<32x128xf32>
      %c4_i32_72 = arith.constant 4 : i32
      %219 = arith.muli %arg12, %c4_i32_72 : i32
      %c3_i32 = arith.constant 3 : i32
      %220 = arith.addi %219, %c3_i32 : i32
      %221 = arith.index_cast %220 : i32 to index
      %c0_73 = arith.constant 0 : index
      %c0_74 = arith.constant 0 : index
      %222 = vector.load %arg10[%221, %c0_73, %c0_74] : memref<8x128x128xbf16, #tpu.memory_space<vmem>>, vector<1x128x128xbf16>
      %223 = vector.shape_cast %222 : vector<1x128x128xbf16> to vector<128x128xbf16>
      %224 = arith.extf %223 : vector<128x128xbf16> to vector<128x128xf32>
      %225 = arith.truncf %186 : vector<32x128xf32> to vector<32x128xbf16>
      %cst_75 = arith.constant dense<0.000000e+00> : vector<128x128xf32>
      %226 = tpu.matmul %1, %225, %cst_75 {dimension_numbers = #tpu.dot_dimension_numbers<[1], [0], [0], [1], [0, 0, 1, 1], [], []>} : vector<128x32xbf16>, vector<32x128xbf16>, vector<128x128xf32> -> vector<128x128xf32>
      %227 = arith.addf %224, %226 : vector<128x128xf32>
      %228 = vector.extract_strided_slice %227 {offsets = [0, 0], sizes = [32, 128], strides = [1, 1]} : vector<128x128xf32> to vector<32x128xf32>
      %229 = arith.negf %228 : vector<32x128xf32>
      %230 = math.exp %229 : vector<32x128xf32>
      %cst_76 = arith.constant 1.000000e+00 : f32
      %231 = vector.broadcast %cst_76 : f32 to vector<32x128xf32>
      %232 = arith.addf %231, %230 : vector<32x128xf32>
      %233 = arith.divf %231, %232 : vector<32x128xf32>
      %234 = vector.extract_strided_slice %227 {offsets = [32, 0], sizes = [32, 128], strides = [1, 1]} : vector<128x128xf32> to vector<32x128xf32>
      %235 = arith.negf %234 : vector<32x128xf32>
      %236 = math.exp %235 : vector<32x128xf32>
      %cst_77 = arith.constant 1.000000e+00 : f32
      %237 = vector.broadcast %cst_77 : f32 to vector<32x128xf32>
      %238 = arith.addf %237, %236 : vector<32x128xf32>
      %239 = arith.divf %237, %238 : vector<32x128xf32>
      %240 = vector.extract_strided_slice %227 {offsets = [64, 0], sizes = [32, 128], strides = [1, 1]} : vector<128x128xf32> to vector<32x128xf32>
      %241 = math.tanh %240 : vector<32x128xf32>
      %242 = vector.extract_strided_slice %227 {offsets = [96, 0], sizes = [32, 128], strides = [1, 1]} : vector<128x128xf32> to vector<32x128xf32>
      %243 = arith.negf %242 : vector<32x128xf32>
      %244 = math.exp %243 : vector<32x128xf32>
      %cst_78 = arith.constant 1.000000e+00 : f32
      %245 = vector.broadcast %cst_78 : f32 to vector<32x128xf32>
      %246 = arith.addf %245, %244 : vector<32x128xf32>
      %247 = arith.divf %245, %246 : vector<32x128xf32>
      %248 = arith.mulf %239, %184 : vector<32x128xf32>
      %249 = arith.mulf %233, %241 : vector<32x128xf32>
      %250 = arith.addf %248, %249 : vector<32x128xf32>
      %251 = math.tanh %250 : vector<32x128xf32>
      %252 = arith.mulf %247, %251 : vector<32x128xf32>
      %253 = arith.truncf %252 : vector<32x128xf32> to vector<32x128xbf16>
      %c0_79 = arith.constant 0 : index
      %c0_80 = arith.constant 0 : index
      %254 = vector.load %arg11[%c0_79, %c0_80] : memref<64x128xbf16, #tpu.memory_space<vmem>>, vector<32x128xbf16>
      tpu.vector_store %arg11[%c0_79, %c0_80], %253 {strides = array<i32>} : memref<64x128xbf16, #tpu.memory_space<vmem>>, vector<32x128xbf16>,
      %255 = arith.truncf %218 : vector<32x128xf32> to vector<32x128xbf16>
      %c32_81 = arith.constant 32 : index
      %c0_82 = arith.constant 0 : index
      %256 = vector.load %arg11[%c32_81, %c0_82] : memref<64x128xbf16, #tpu.memory_space<vmem>>, vector<32x128xbf16>
      tpu.vector_store %arg11[%c32_81, %c0_82], %255 {strides = array<i32>} : memref<64x128xbf16, #tpu.memory_space<vmem>>, vector<32x128xbf16>,
      %c0_83 = arith.constant 0 : index
      %c0_84 = arith.constant 0 : index
      %257 = vector.load %arg11[%c0_83, %c0_84] : memref<64x128xbf16, #tpu.memory_space<vmem>>, vector<64x128xbf16>
      %cst_85 = arith.constant dense<0.000000e+00> : vector<128x128xf32>
      %258 = tpu.matmul %2, %257, %cst_85 {dimension_numbers = #tpu.dot_dimension_numbers<[1], [0], [0], [1], [0, 0, 1, 1], [], []>} : vector<128x64xbf16>, vector<64x128xbf16>, vector<128x128xf32> -> vector<128x128xf32>
      %259 = arith.addf %258, %9 : vector<128x128xf32>
      %260 = vector.extract_strided_slice %259 {offsets = [0, 0], sizes = [32, 128], strides = [1, 1]} : vector<128x128xf32> to vector<32x128xf32>
      %261 = arith.negf %260 : vector<32x128xf32>
      %262 = math.exp %261 : vector<32x128xf32>
      %cst_86 = arith.constant 1.000000e+00 : f32
      %263 = vector.broadcast %cst_86 : f32 to vector<32x128xf32>
      %264 = arith.addf %263, %262 : vector<32x128xf32>
      %265 = arith.divf %263, %264 : vector<32x128xf32>
      %266 = vector.extract_strided_slice %259 {offsets = [32, 0], sizes = [32, 128], strides = [1, 1]} : vector<128x128xf32> to vector<32x128xf32>
      %267 = arith.negf %266 : vector<32x128xf32>
      %268 = math.exp %267 : vector<32x128xf32>
      %cst_87 = arith.constant 1.000000e+00 : f32
      %269 = vector.broadcast %cst_87 : f32 to vector<32x128xf32>
      %270 = arith.addf %269, %268 : vector<32x128xf32>
      %271 = arith.divf %269, %270 : vector<32x128xf32>
      %272 = vector.extract_strided_slice %259 {offsets = [64, 0], sizes = [32, 128], strides = [1, 1]} : vector<128x128xf32> to vector<32x128xf32>
      %273 = math.tanh %272 : vector<32x128xf32>
      %274 = vector.extract_strided_slice %259 {offsets = [96, 0], sizes = [32, 128], strides = [1, 1]} : vector<128x128xf32> to vector<32x128xf32>
      %275 = arith.negf %274 : vector<32x128xf32>
      %276 = math.exp %275 : vector<32x128xf32>
      %cst_88 = arith.constant 1.000000e+00 : f32
      %277 = vector.broadcast %cst_88 : f32 to vector<32x128xf32>
      %278 = arith.addf %277, %276 : vector<32x128xf32>
      %279 = arith.divf %277, %278 : vector<32x128xf32>
      %280 = arith.mulf %271, %216 : vector<32x128xf32>
      %281 = arith.mulf %265, %273 : vector<32x128xf32>
      %282 = arith.addf %280, %281 : vector<32x128xf32>
      %283 = math.tanh %282 : vector<32x128xf32>
      %284 = arith.mulf %279, %283 : vector<32x128xf32>
      scf.yield %252, %250, %284, %282 : vector<32x128xf32>, vector<32x128xf32>, vector<32x128xf32>, vector<32x128xf32>
    }
    %c2_i32_16 = arith.constant 2 : i32
    %17 = arith.truncf %16#2 : vector<32x128xf32> to vector<32x128xbf16>
    %cst_17 = arith.constant dense<0.000000e+00> : vector<8x128xf32>
    %18 = tpu.matmul %3, %17, %cst_17 {dimension_numbers = #tpu.dot_dimension_numbers<[1], [0], [0], [1], [0, 0, 1, 1], [], []>} : vector<8x32xbf16>, vector<32x128xbf16>, vector<8x128xf32> -> vector<8x128xf32>
    %19 = arith.addf %18, %12 : vector<8x128xf32>
    %c0_18 = arith.constant 0 : index
    %c0_19 = arith.constant 0 : index
    %20 = vector.load %arg9[%c0_18, %c0_19] : memref<8x128xf32, #tpu.memory_space<vmem>>, vector<8x128xf32>
    tpu.vector_store %arg9[%c0_18, %c0_19], %19 {strides = array<i32>} : memref<8x128xf32, #tpu.memory_space<vmem>>, vector<8x128xf32>,
    return
  }
  func.func @transform_0(%arg0: i32) -> (i32, i32, i32) {
    %c0_i32 = arith.constant 0 : i32
    %c0_i32_0 = arith.constant 0 : i32
    %c0_i32_1 = arith.constant 0 : i32
    return %c0_i32, %c0_i32_0, %arg0 : i32, i32, i32
  }
  func.func @transform_1(%arg0: i32) -> (i32, i32) {
    %c0_i32 = arith.constant 0 : i32
    %c0_i32_0 = arith.constant 0 : i32
    %c0_i32_1 = arith.constant 0 : i32
    return %c0_i32, %c0_i32_0 : i32, i32
  }
  func.func @transform_2(%arg0: i32) -> (i32, i32) {
    %c0_i32 = arith.constant 0 : i32
    %c0_i32_0 = arith.constant 0 : i32
    %c0_i32_1 = arith.constant 0 : i32
    return %c0_i32, %c0_i32_0 : i32, i32
  }
  func.func @transform_3(%arg0: i32) -> (i32, i32) {
    %c0_i32 = arith.constant 0 : i32
    %c0_i32_0 = arith.constant 0 : i32
    %c0_i32_1 = arith.constant 0 : i32
    return %c0_i32, %c0_i32_0 : i32, i32
  }
  func.func @transform_4(%arg0: i32) -> (i32, i32) {
    %c0_i32 = arith.constant 0 : i32
    %c0_i32_0 = arith.constant 0 : i32
    %c0_i32_1 = arith.constant 0 : i32
    return %c0_i32, %c0_i32_0 : i32, i32
  }
  func.func @transform_5(%arg0: i32) -> (i32, i32) {
    %c0_i32 = arith.constant 0 : i32
    %c0_i32_0 = arith.constant 0 : i32
    %c0_i32_1 = arith.constant 0 : i32
    return %c0_i32, %c0_i32_0 : i32, i32
  }
  func.func @transform_6(%arg0: i32) -> (i32, i32) {
    %c0_i32 = arith.constant 0 : i32
    %c0_i32_0 = arith.constant 0 : i32
    %c0_i32_1 = arith.constant 0 : i32
    return %c0_i32, %c0_i32_0 : i32, i32
  }
  func.func @transform_7(%arg0: i32) -> (i32, i32) {
    %c0_i32 = arith.constant 0 : i32
    %c0_i32_0 = arith.constant 0 : i32
    %c0_i32_1 = arith.constant 0 : i32
    return %c0_i32, %c0_i32_0 : i32, i32
  }
  func.func @transform_8(%arg0: i32) -> (i32, i32) {
    %c0_i32 = arith.constant 0 : i32
    %c0_i32_0 = arith.constant 0 : i32
    return %c0_i32, %arg0 : i32, i32
  }
}

</mosaic_0001>

<bundles_post_ra>
// kernel: my_model_forward.1
= control target key start
LH: loop header
LB: loop body
LE: loop exit
PB: predicated region body
PF: predicated region fallthrough
CT: control target
= control target key end

     0   :  { %s4372_s27 = smov 0   ;;  %s4374_s28 = smov 0   ;;  %s5607_s0 = inlined_call_operand.vmem [shape: bf16[8,6,256], index: 0, kind: input, shape index: {}]   ;;  %s5608_s1 = inlined_call_operand.vmem [shape: bf16[128,6], index: 1, kind: input, shape index: {}]   ;;  %s5609_s2 = inlined_call_operand.vmem [shape: bf16[128,32], index: 2, kind: input, shape index: {}]   ;;  %s5610_s3 = inlined_call_operand.vmem [shape: f32[128,1], index: 3, kind: input, shape index: {}]   ;;  %s5611_s4 = inlined_call_operand.vmem [shape: bf16[128,64], index: 4, kind: input, shape index: {}]   ;;  %s5612_s5 = inlined_call_operand.vmem [shape: f32[128,1], index: 5, kind: input, shape index: {}]   ;;  %s5613_s6 = inlined_call_operand.vmem [shape: bf16[8,32], index: 6, kind: input, shape index: {}]   ;;  %s5614_s7 = inlined_call_operand.vmem [shape: f32[8,1], index: 7, kind: input, shape index: {}]   ;;  %s5615_s8 = inlined_call_operand.vmem [shape: f32[8,256], index: 8, kind: output, shape index: {}]  }
   0x1   :  { %s4376_s29 = smov 0  }
   0x2 LB: > { %s2919_s30 = sadd.s32 4294967295, %s4250_s29   ;;  %s4389_s9 = sadd.s32 1, %s4250_s29   ;;  %s4250_s29 = sphi %s4376_s29, %s5807_s29   ;;  %s4246_s28 = sphi %s4374_s28, %s5806_s28   ;;  %s4242_s27 = sphi %s4372_s27, %s5805_s27  }
   0x3   : > { %s22_s10 = ssub.s32 %s4250_s29, %s4389_s9  ;;  %s25_s11 = sadd.s32 1, %s4246_s28 }
   0x4   : > { %p23_p0 = scmp.eq.s32.totalorder %s22_s10, 0  ;;  %p32_p1 = scmp.ne.s32.totalorder %s4246_s28, %s4242_s27 }
   0x5   : > { %p33_p2 = scmp.eq.s32.totalorder %s4250_s29, 0  ;;  %p2922_p4 = scmp.ge.s32.totalorder %s4250_s29, 2 }
   0x6   : > { %s4398_s12 = scalar_select %p23_p0, %s4246_s28, %s25_s11  }
   0x7   : > { %p34_p3 = por %p33_p2, %p32_p1  ;;  %252 = sbr.rel (%p2922_p4) target bundleno = 23 (0x17), region = 44 }
   0xe   : > { %255 = sbr.rel (!%p34_p3) target bundleno = 23 (0x17), region = 48  ;;  %s257_s13 = sand.u32 (%p34_p3), 1, %s4246_s28  }
   0xf   : > { %s2924_s14 = sshll.u32 (%p34_p3), %s4250_s29, 2  ;;  %s2923_s15 = sshll.u32 (%p34_p3), %s257_s13, 5 }
  0x10   : > { %s261_s18 = scalar_lea.vmem (%p34_p3), %s5607_s0, %s2924_s14  ;;  %s259_s19 = scalar_lea.vmem (%p34_p3), [#allocation4], %s2923_s15 }
  0x11   : > { %v277_v0 = vld [vmem:[%s261_s18] sm:$0xf] (%p34_p3)  ;;  %v279_v1 = vld [vmem:[%s261_s18 + $0x8] sm:$0xf] (%p34_p3)  ;;  %v281_v2 = vld [vmem:[%s261_s18 + $0x10] sm:$0xf] (%p34_p3) }
  0x12   : > { %278 = vst [vmem:[%s259_s19] sm:$0xf] (%p34_p3), %v277_v0  ;;  %280 = vst [vmem:[%s259_s19 + $0x4] sm:$0xf] (%p34_p3), %v279_v1  ;;  %v283_v3 = vld [vmem:[%s261_s18 + $0x18] sm:$0xf] (%p34_p3) }
  0x13   : > { %v285_v4 = vld [vmem:[%s261_s18 + $0x20] sm:$0xf] (%p34_p3)  ;;  %282 = vst [vmem:[%s259_s19 + $0x8] sm:$0xf] (%p34_p3), %v281_v2  ;;  %284 = vst [vmem:[%s259_s19 + $0xc] sm:$0xf] (%p34_p3), %v283_v3 }
  0x14   : > { %286 = vst [vmem:[%s259_s19 + $0x10] sm:$0xf] (%p34_p3), %v285_v4  ;;  %v287_v5 = vld [vmem:[%s261_s18 + $0x28] sm:$0xf] (%p34_p3)  ;;  %v289_v6 = vld [vmem:[%s261_s18 + $0x30] sm:$0xf] (%p34_p3) }
  0x15   : > { %v291_v7 = vld [vmem:[%s261_s18 + $0x38] sm:$0xf]  ;;  %288 = vst [vmem:[%s259_s19 + $0x14] sm:$0xf] %v287_v5  ;;  %290 = vst [vmem:[%s259_s19 + $0x18] sm:$0xf] %v289_v6 }
  0x16   : > { %292 = vst [vmem:[%s259_s19 + $0x1c] sm:$0xf] %v291_v7 }
  0x17 PF: > { %p2925_p5 = scmp.ge.s32.totalorder %s4250_s29, 1  ;;  %p330_p6 = scmp.lt.s32.totalorder %s4250_s29, 3 }
  0x19   : > { %p331_p7 = pnand %p2925_p5, %p330_p6 }
  0x1b   : > { %334 = sbr.rel (%p331_p7) target bundleno = 2161 (0x871), region = 89 }
  0x22   : > { %v425_v8 = vld [vmem:[%s5610_s3 + $0x10] sm:$0xff]  ;;  %v423_v9 = vld [vmem:[%s5610_s3] sm:$0xff]  ;;  %v4324_v10 = vmov 0   ;;  %v426_v11 = vld [vmem:[%s5610_s3 + $0x18] sm:$0xff]  ;;  %p369_p8 = scmp.lt.s32.totalorder %s2919_s30, 1  ;;  %s337_s22 = sand.u32 1, %s4242_s27  }
  0x23   : > { %3643 = vset.pattern.permute.xlu1 %v4324_v10  ;;  %3642 = vset.pattern.permute.xlu0 %v4324_v10  ;;  %v424_v12 = vld [vmem:[%s5610_s3 + $0x8] sm:$0xff]  ;;  %v427_v14 = vld [vmem:[%s5610_s3 + $0x20] sm:$0xff]  ;;  %v430_v15 = vld [vmem:[%s5610_s3 + $0x38] sm:$0xff]  ;;  %s4512_s23 = sshll.u32 %s337_s22, 5 }
  0x24   : > { %451 = vperm.xlu1 %3643, %v425_v8   ;;  %441 = vperm.xlu0 %3642, %v423_v9   ;;  %v428_v13 = vld [vmem:[%s5610_s3 + $0x28] sm:$0xff]  ;;  %v429_v16 = vld [vmem:[%s5610_s3 + $0x30] sm:$0xff]  ;;  %v431_v18 = vld [vmem:[%s5610_s3 + $0x40] sm:$0xff]  ;;  %s5809_s30 = smov (!%p369_p8, %s2919_s30), 1  ;;  %s339_s22 = scalar_lea.vmem [#allocation4], %s4512_s23 }
  0x25   : > { %v432_v17 = vld [vmem:[%s5610_s3 + $0x48] sm:$0xff]  ;;  %v434_v19 = vld [vmem:[%s5610_s3 + $0x58] sm:$0xff]  ;;  %v433_v20 = vld [vmem:[%s5610_s3 + $0x50] sm:$0xff]  ;;  %s2927_s24 = sshll.u32 %s5809_s30, 3 }
  0x26   : > { %v436_v21 = vld [vmem:[%s5610_s3 + $0x68] sm:$0xff]  ;;  %v435_v22 = vld [vmem:[%s5610_s3 + $0x60] sm:$0xff]  ;;  %v438_v23 = vld [vmem:[%s5610_s3 + $0x78] sm:$0xff]  ;;  %s4517_s10 = scalar_lea.vmem %s5615_s8, %s2927_s24  ;;  %s4831_s24 = smov 0  }
  0x27   : > { %v437_v24 = vld [vmem:[%s5610_s3 + $0x70] sm:$0xff]  ;;  %v520_v25 = vld [vmem:[%s5612_s5 + $0x8] sm:$0xff]  ;;  %v519_v26 = vld [vmem:[%s5612_s5] sm:$0xff] }
  0x28   : > { %456 = vperm.xlu1 %3643, %v426_v11   ;;  %446 = vperm.xlu0 %3642, %v424_v12   ;;  %v522_v27 = vld [vmem:[%s5612_s5 + $0x18] sm:$0xff]  ;;  %v521_v28 = vld [vmem:[%s5612_s5 + $0x10] sm:$0xff]  ;;  %v524_v29 = vld [vmem:[%s5612_s5 + $0x28] sm:$0xff] }
  0x29   : > { %v523_v30 = vld [vmem:[%s5612_s5 + $0x20] sm:$0xff]  ;;  %v526_v31 = vld [vmem:[%s5612_s5 + $0x38] sm:$0xff]  ;;  %v525_v32 = vld [vmem:[%s5612_s5 + $0x30] sm:$0xff] }
  0x2a   : > { %v528_v33 = vld [vmem:[%s5612_s5 + $0x48] sm:$0xff]  ;;  %v527_v34 = vld [vmem:[%s5612_s5 + $0x40] sm:$0xff]  ;;  %v530_v35 = vld [vmem:[%s5612_s5 + $0x58] sm:$0xff] }
  0x2b   : > { %v529_v36 = vld [vmem:[%s5612_s5 + $0x50] sm:$0xff]  ;;  %v532_v37 = vld [vmem:[%s5612_s5 + $0x68] sm:$0xff]  ;;  %v531_v38 = vld [vmem:[%s5612_s5 + $0x60] sm:$0xff] }
  0x2c   : > { %466 = vperm.xlu1 %3643, %v428_v13   ;;  %461 = vperm.xlu0 %3642, %v427_v14   ;;  %v534_v39 = vld [vmem:[%s5612_s5 + $0x78] sm:$0xff]  ;;  %v533_v40 = vld [vmem:[%s5612_s5 + $0x70] sm:$0xff]  ;;  %v615_v41 = vld [vmem:[%s5614_s7] sm:$0xff] }
  0x2d   : > { %v4522_v42 = vld [vmem:[%s5608_s1] sm:$0xf]  ;;  %v4527_v43 = vld [vmem:[%s5608_s1 + $0x4] sm:$0xf]  ;;  %v4532_v44 = vld [vmem:[%s5608_s1 + $0x8] sm:$0xf] }
  0x2e   : > { %5636 = vst [vmem:[#allocation5_spill] sm:$0xff] %v4522_v42  ;;  %5637 = vst [vmem:[#allocation6_spill] sm:$0xff] %v4527_v43  ;;  %v4537_v45 = vld [vmem:[%s5608_s1 + $0xc] sm:$0xf]  ;;  %v4542_v46 = vld [vmem:[%s5608_s1 + $0x10] sm:$0xf] }
  0x2f   : > { %5638 = vst [vmem:[#allocation7_spill] sm:$0xff] %v4532_v44  ;;  %5639 = vst [vmem:[#allocation8_spill] sm:$0xff] %v4537_v45  ;;  %v4547_v47 = vld [vmem:[%s5608_s1 + $0x14] sm:$0xf]  ;;  %v4552_v48 = vld [vmem:[%s5608_s1 + $0x18] sm:$0xf] }
  0x30   : > { %476 = vperm.xlu1 %3643, %v430_v15   ;;  %471 = vperm.xlu0 %3642, %v429_v16   ;;  %5640 = vst [vmem:[#allocation9_spill] sm:$0xff] %v4542_v46  ;;  %5641 = vst [vmem:[#allocation10_spill] sm:$0xff] %v4547_v47  ;;  %v4557_v49 = vld [vmem:[%s5608_s1 + $0x1c] sm:$0xf]  ;;  %v4562_v50 = vld [vmem:[%s5608_s1 + $0x20] sm:$0xf] }
  0x31   : > { %5642 = vst [vmem:[#allocation11_spill] sm:$0xff] %v4552_v48  ;;  %5643 = vst [vmem:[#allocation12_spill] sm:$0xff] %v4557_v49  ;;  %v4567_v51 = vld [vmem:[%s5608_s1 + $0x24] sm:$0xf]  ;;  %v4572_v52 = vld [vmem:[%s5608_s1 + $0x28] sm:$0xf] }
  0x32   : > { %5644 = vst [vmem:[#allocation13_spill] sm:$0xff] %v4562_v50  ;;  %5645 = vst [vmem:[#allocation14_spill] sm:$0xff] %v4567_v51  ;;  %v4577_v53 = vld [vmem:[%s5608_s1 + $0x2c] sm:$0xf]  ;;  %v4582_v54 = vld [vmem:[%s5608_s1 + $0x30] sm:$0xf] }
  0x33   : > { %5646 = vst [vmem:[#allocation15_spill] sm:$0xff] %v4572_v52  ;;  %5647 = vst [vmem:[#allocation16_spill] sm:$0xff] %v4577_v53  ;;  %v4587_v55 = vld [vmem:[%s5608_s1 + $0x34] sm:$0xf]  ;;  %v4592_v56 = vld [vmem:[%s5608_s1 + $0x38] sm:$0xf] }
  0x34   : > { %486 = vperm.xlu1 %3643, %v432_v17   ;;  %481 = vperm.xlu0 %3642, %v431_v18   ;;  %5648 = vst [vmem:[#allocation17_spill] sm:$0xff] %v4582_v54  ;;  %5649 = vst [vmem:[#allocation18_spill] sm:$0xff] %v4587_v55  ;;  %v4597_v57 = vld [vmem:[%s5608_s1 + $0x3c] sm:$0xf]  ;;  %v4602_v58 = vld [vmem:[%s5609_s2] sm:$0xf] }
  0x35   : > { %5650 = vst [vmem:[#allocation19_spill] sm:$0xff] %v4602_v58  ;;  %v4607_v59 = vld [vmem:[%s5609_s2 + $0x4] sm:$0xf]  ;;  %v4612_v60 = vld [vmem:[%s5609_s2 + $0x8] sm:$0xf] }
  0x36   : > { %5651 = vst [vmem:[#allocation20_spill] sm:$0xff] %v4607_v59  ;;  %5652 = vst [vmem:[#allocation21_spill] sm:$0xff] %v4612_v60  ;;  %v4617_v61 = vld [vmem:[%s5609_s2 + $0xc] sm:$0xf]  ;;  %v4622_v62 = vld [vmem:[%s5609_s2 + $0x10] sm:$0xf] }
  0x37   : > { %5653 = vst [vmem:[#allocation22_spill] sm:$0xff] %v4617_v61  ;;  %5654 = vst [vmem:[#allocation23_spill] sm:$0xff] %v4622_v62  ;;  %v4627_v63 = vld [vmem:[%s5609_s2 + $0x14] sm:$0xf]  ;;  %v4632_v0 = vld [vmem:[%s5609_s2 + $0x18] sm:$0xf] }
  0x38   : > { %496 = vperm.xlu1 %3643, %v434_v19   ;;  %491 = vperm.xlu0 %3642, %v433_v20   ;;  %5655 = vst [vmem:[#allocation24_spill] sm:$0xff] %v4627_v63  ;;  %5656 = vst [vmem:[#allocation25_spill] sm:$0xff] %v4632_v0  ;;  %v4637_v1 = vld [vmem:[%s5609_s2 + $0x1c] sm:$0xf]  ;;  %v4642_v2 = vld [vmem:[%s5609_s2 + $0x20] sm:$0xf] }
  0x39   : > { %5657 = vst [vmem:[#allocation26_spill] sm:$0xff] %v4637_v1  ;;  %5658 = vst [vmem:[#allocation27_spill] sm:$0xff] %v4642_v2  ;;  %v4647_v3 = vld [vmem:[%s5609_s2 + $0x24] sm:$0xf]  ;;  %v4652_v4 = vld [vmem:[%s5609_s2 + $0x28] sm:$0xf] }
  0x3a   : > { %5659 = vst [vmem:[#allocation28_spill] sm:$0xff] %v4647_v3  ;;  %5660 = vst [vmem:[#allocation29_spill] sm:$0xff] %v4652_v4  ;;  %v4657_v5 = vld [vmem:[%s5609_s2 + $0x2c] sm:$0xf]  ;;  %v4662_v6 = vld [vmem:[%s5609_s2 + $0x30] sm:$0xf] }
  0x3b   : > { %5661 = vst [vmem:[#allocation30_spill] sm:$0xff] %v4657_v5  ;;  %5662 = vst [vmem:[#allocation31_spill] sm:$0xff] %v4662_v6  ;;  %v4667_v7 = vld [vmem:[%s5609_s2 + $0x34] sm:$0xf]  ;;  %v4672_v8 = vld [vmem:[%s5609_s2 + $0x38] sm:$0xf] }
  0x3c   : > { %506 = vperm.xlu1 %3643, %v436_v21   ;;  %501 = vperm.xlu0 %3642, %v435_v22   ;;  %5663 = vst [vmem:[#allocation32_spill] sm:$0xff] %v4667_v7  ;;  %5664 = vst [vmem:[#allocation33_spill] sm:$0xff] %v4672_v8  ;;  %v4677_v9 = vld [vmem:[%s5609_s2 + $0x3c] sm:$0xf]  ;;  %v4682_v10 = vld [vmem:[%s5611_s4] sm:$0xf] }
  0x3d   : > { %5665 = vst [vmem:[#allocation34_spill] sm:$0xff] %v4677_v9  ;;  %5666 = vst [vmem:[#allocation35_spill] sm:$0xff] %v4682_v10  ;;  %v4687_v11 = vld [vmem:[%s5611_s4 + $0x4] sm:$0xf]  ;;  %v4692_v12 = vld [vmem:[%s5611_s4 + $0x8] sm:$0xf] }
  0x3e   : > { %5667 = vst [vmem:[#allocation36_spill] sm:$0xff] %v4687_v11  ;;  %5668 = vst [vmem:[#allocation37_spill] sm:$0xff] %v4692_v12  ;;  %v4697_v13 = vld [vmem:[%s5611_s4 + $0xc] sm:$0xf]  ;;  %v4702_v14 = vld [vmem:[%s5611_s4 + $0x10] sm:$0xf] }
  0x3f   : > { %5669 = vst [vmem:[#allocation38_spill] sm:$0xff] %v4697_v13  ;;  %5670 = vst [vmem:[#allocation39_spill] sm:$0xff] %v4702_v14  ;;  %v4707_v15 = vld [vmem:[%s5611_s4 + $0x14] sm:$0xf]  ;;  %v4712_v16 = vld [vmem:[%s5611_s4 + $0x18] sm:$0xf] }
  0x40   : > { %516 = vperm.xlu1 %3643, %v438_v23   ;;  %511 = vperm.xlu0 %3642, %v437_v24   ;;  %5671 = vst [vmem:[#allocation40_spill] sm:$0xff] %v4707_v15  ;;  %5672 = vst [vmem:[#allocation41_spill] sm:$0xff] %v4712_v16  ;;  %v4717_v17 = vld [vmem:[%s5611_s4 + $0x1c] sm:$0xf]  ;;  %v4722_v18 = vld [vmem:[%s5611_s4 + $0x20] sm:$0xf] }
  0x41   : > { %5673 = vst [vmem:[#allocation42_spill] sm:$0xff] %v4717_v17  ;;  %5674 = vst [vmem:[#allocation43_spill] sm:$0xff] %v4722_v18  ;;  %v4727_v19 = vld [vmem:[%s5611_s4 + $0x24] sm:$0xf]  ;;  %v4732_v20 = vld [vmem:[%s5611_s4 + $0x28] sm:$0xf] }
  0x42   : > { %5675 = vst [vmem:[#allocation44_spill] sm:$0xff] %v4727_v19  ;;  %5676 = vst [vmem:[#allocation45_spill] sm:$0xff] %v4732_v20  ;;  %v4737_v21 = vld [vmem:[%s5611_s4 + $0x2c] sm:$0xf]  ;;  %v4742_v22 = vld [vmem:[%s5611_s4 + $0x30] sm:$0xf] }
  0x43   : > { %5677 = vst [vmem:[#allocation46_spill] sm:$0xff] %v4737_v21  ;;  %5678 = vst [vmem:[#allocation47_spill] sm:$0xff] %v4742_v22  ;;  %v4747_v23 = vld [vmem:[%s5611_s4 + $0x34] sm:$0xf]  ;;  %v4752_v24 = vld [vmem:[%s5611_s4 + $0x38] sm:$0xf] }
  0x44   : > { %542 = vperm.xlu1 %3643, %v520_v25   ;;  %537 = vperm.xlu0 %3642, %v519_v26   ;;  %5679 = vst [vmem:[#allocation48_spill] sm:$0xff] %v4747_v23  ;;  %5680 = vst [vmem:[#allocation49_spill] sm:$0xff] %v4752_v24  ;;  %v4757_v25 = vld [vmem:[%s5611_s4 + $0x3c] sm:$0xf]  ;;  %v4762_v26 = vld [vmem:[%s5613_s6] sm:$0xf] }
  0x45   : > { %5681 = vst [vmem:[#allocation50_spill] sm:$0xff] %v4757_v25  ;;  %5682 = vst [vmem:[#allocation51_spill] sm:$0xff] %v4762_v26 }
  0x48   : > { %552 = vperm.xlu1 %3643, %v522_v27   ;;  %547 = vperm.xlu0 %3642, %v521_v28  }
  0x4c   : > { %562 = vperm.xlu1 %3643, %v524_v29   ;;  %557 = vperm.xlu0 %3642, %v523_v30  }
  0x50   : > { %572 = vperm.xlu1 %3643, %v526_v31   ;;  %567 = vperm.xlu0 %3642, %v525_v32  }
  0x54   : > { %582 = vperm.xlu1 %3643, %v528_v33   ;;  %577 = vperm.xlu0 %3642, %v527_v34  }
  0x58   : > { %592 = vperm.xlu1 %3643, %v530_v35   ;;  %587 = vperm.xlu0 %3642, %v529_v36  }
  0x5c   : > { %602 = vperm.xlu1 %3643, %v532_v37   ;;  %597 = vperm.xlu0 %3642, %v531_v38  }
  0x60   : > { %612 = vperm.xlu1 %3643, %v534_v39   ;;  %607 = vperm.xlu0 %3642, %v533_v40  }
  0x64   : > { %618 = vperm.xlu0 %3642, %v615_v41  }
  0xa3   : > { %v4764_v27 = vpop.permute.xlu1 %451  ;;  %v4766_v28 = vpop.permute.xlu0 %441 }
  0xa4   : > { %5683 = vst [vmem:[#allocation52_spill] sm:$0xff] %v4764_v27  ;;  %5684 = vst [vmem:[#allocation53_spill] sm:$0xff] %v4766_v28 }
  0xa7   : > { %v4768_v29 = vpop.permute.xlu1 %456  ;;  %v4770_v30 = vpop.permute.xlu0 %446 }
  0xab   : > { %v4772_v31 = vpop.permute.xlu1 %466  ;;  %v4774_v32 = vpop.permute.xlu0 %461 }
  0xaf   : > { %v4776_v33 = vpop.permute.xlu1 %476  ;;  %v4778_v34 = vpop.permute.xlu0 %471 }
  0xb3   : > { %v4780_v35 = vpop.permute.xlu1 %486  ;;  %v4782_v36 = vpop.permute.xlu0 %481 }
  0xb7   : > { %v4784_v37 = vpop.permute.xlu1 %496  ;;  %v4786_v38 = vpop.permute.xlu0 %491 }
  0xbb   : > { %v4788_v39 = vpop.permute.xlu1 %506  ;;  %v4790_v40 = vpop.permute.xlu0 %501 }
  0xbf   : > { %v4792_v41 = vpop.permute.xlu1 %516  ;;  %v4794_v26 = vpop.permute.xlu0 %511 }
  0xc3   : > { %v4796_v24 = vpop.permute.xlu1 %542  ;;  %v4798_v25 = vpop.permute.xlu0 %537 }
  0xc4   : > { %5685 = vst [vmem:[#allocation54_spill] sm:$0xff] %v4796_v24  ;;  %5686 = vst [vmem:[#allocation55_spill] sm:$0xff] %v4798_v25 }
  0xc7   : > { %v4800_v22 = vpop.permute.xlu1 %552  ;;  %v4802_v23 = vpop.permute.xlu0 %547 }
  0xc8   : > { %5687 = vst [vmem:[#allocation56_spill] sm:$0xff] %v4800_v22  ;;  %5688 = vst [vmem:[#allocation57_spill] sm:$0xff] %v4802_v23 }
  0xcb   : > { %v4804_v20 = vpop.permute.xlu1 %562  ;;  %v4806_v21 = vpop.permute.xlu0 %557 }
  0xcc   : > { %5689 = vst [vmem:[#allocation58_spill] sm:$0xff] %v4804_v20  ;;  %5690 = vst [vmem:[#allocation59_spill] sm:$0xff] %v4806_v21 }
  0xcf   : > { %v4808_v18 = vpop.permute.xlu1 %572  ;;  %v4810_v19 = vpop.permute.xlu0 %567 }
  0xd0   : > { %5691 = vst [vmem:[#allocation60_spill] sm:$0xff] %v4808_v18  ;;  %5692 = vst [vmem:[#allocation61_spill] sm:$0xff] %v4810_v19 }
  0xd3   : > { %v4812_v16 = vpop.permute.xlu1 %582  ;;  %v4814_v17 = vpop.permute.xlu0 %577 }
  0xd4   : > { %5693 = vst [vmem:[#allocation62_spill] sm:$0xff] %v4812_v16 }
  0xd7   : > { %v4816_v24 = vpop.permute.xlu1 %592  ;;  %v4818_v25 = vpop.permute.xlu0 %587 }
  0xdb   : > { %v4820_v14 = vpop.permute.xlu1 %602  ;;  %v4822_v22 = vpop.permute.xlu0 %597 }
  0xdc   : > { %5694 = vst [vmem:[#allocation63_spill] sm:$0xff] %v4820_v14  ;;  %5695 = vst [vmem:[#allocation64_spill] sm:$0xff] %v4822_v22 }
  0xdf   : > { %v4824_v23 = vpop.permute.xlu1 %612  ;;  %v4826_v20 = vpop.permute.xlu0 %607 }
  0xe0   : > { %5696 = vst [vmem:[#allocation65_spill] sm:$0xff] %v4824_v23 }
  0xe3   : > { %v4828_v21 = vpop.permute.xlu0 %618 }
  0xe4   : > { %5697 = vst [vmem:[#allocation66_spill] sm:$0xff] %v4828_v21 }
  0xe5 LB: >> { %v5698_v43 = vld [vmem:[#allocation6_spill] sm:$0xff]  ;;  %v5699_v42 = vld [vmem:[#allocation5_spill] sm:$0xff]  ;;  %vm670_vm0 = vcmask 48128   ;;  %s2928_s25 = sshll.u32 %s4254_s24, 2  ;;  %vm695_vm1 = vcmask 1042432   ;;  %v5702_v45 = vld [vmem:[#allocation8_spill] sm:$0xff]  ;;  %s4254_s24 = sphi %s4831_s24, %s626_s24  }
  0xe6   : >> { %v2929_v14 = vcombine.low %v5699_v42, %v5698_v43  ;;  %v5700_v51 = vld [vmem:[#allocation14_spill] sm:$0xff]  ;;  %v5701_v50 = vld [vmem:[#allocation13_spill] sm:$0xff]  ;;  %s628_s26 = scalar_lea.vmem %s339_s22, %s2928_s25 [#allocation4]  ;;  %v5703_v44 = vld [vmem:[#allocation7_spill] sm:$0xff]  ;;  %s3159_s11 = sshll.u32 %s4254_s24, 6 }
  0xe7   : >> { %v2933_v23 = vcombine.low %v5701_v50, %v5700_v51  ;;  %v629_v21 = vld [vmem:[%s628_s26] sm:$0x7]  ;;  %v2930_v22 = vcombine.low %v5703_v44, %v5702_v45  ;;  %v5704_v53 = vld [vmem:[#allocation16_spill] sm:$0xff]  ;;  %v5705_v52 = vld [vmem:[#allocation15_spill] sm:$0xff]  ;;  %s806_s13 = scalar_lea.vmem [#allocation2], %s3159_s11  ;;  %s626_s24 = sadd.s32 1, %s4254_s24  }
  0xe8   : >> { %3267 = vmatprep.mubr.msk.bf16.mxu0 %vm670_vm0, %v2929_v14  ;;  %3469 = vmatprep.subr.msk.bf16.mxu0 %vm695_vm1, %v629_v21  ;;  %v697_v16 = vsel %vm695_vm1, %v629_v21, 0  ;;  %v2934_v42 = vcombine.low %v5705_v52, %v5704_v53  ;;  %v5706_v47 = vld [vmem:[#allocation10_spill] sm:$0xff]  ;;  %v5707_v46 = vld [vmem:[#allocation9_spill] sm:$0xff]  ;;  %v5710_v49 = vld [vmem:[#allocation12_spill] sm:$0xff]  ;;  %p623_p9 = scmp.ge.s32.totalorder %s626_s24, 8  }
  0xe9   : >> { %3275 = vmatprep.mubr.msk.bf16.mxu1 %vm670_vm0, %v2933_v23  ;;  %3470 = vmatprep.subr.msk.bf16.mxu1 %vm695_vm1, %v629_v21  ;;  %v2931_v14 = vcombine.low %v5707_v46, %v5706_v47  ;;  %v5708_v55 = vld [vmem:[#allocation18_spill] sm:$0xff]  ;;  %v5709_v54 = vld [vmem:[#allocation17_spill] sm:$0xff]  ;;  %v5711_v48 = vld [vmem:[#allocation11_spill] sm:$0xff]  ;;  %s4915_s23 = smov (%p623_p9), 0  }
  0xea   : >> { %3266 = vmatpush3.bf16.msra.mxu0 %v697_v16  ;;  %3468 = vmatpush3.bf16.msra.mxu1 %v697_v16  ;;  %v2935_v23 = vcombine.low %v5709_v54, %v5708_v55  ;;  %v2932_v21 = vcombine.low %v5711_v48, %v5710_v49  ;;  %v2936_v16 = vcombine.low %v4592_v56, %v4597_v57  ;;  %v5712_v27 = vld [vmem:[#allocation52_spill] sm:$0xff]  ;;  %v5713_v28 = vld [vmem:[#allocation53_spill] sm:$0xff]  ;;  %v4903_v56 = vmov (%p623_p9), 0.0  }
  0xeb   : > { %v4905_v57 = vmov (%p623_p9), 0.0  }
  0xed   : >> { %3268 = vmatmul.mubr.msk.bf16.vlgmr.msra.gmra.mrb[0].mxu0 %vm670_vm0, %v2930_v22  ;;  %3276 = vmatmul.mubr.msk.bf16.vlgmr.msra.gmra.mrb[0].mxu1 %vm670_vm0, %v2934_v42 }
  0xee   : >> { %3271 = vmatprep.mubr.msk.bf16.mxu0 %vm670_vm0, %v2931_v14  ;;  %3279 = vmatprep.mubr.msk.bf16.mxu1 %vm670_vm0, %v2935_v23 }
  0xf5   : >> { %3272 = vmatmul.mubr.msk.bf16.gmra.mrb[4].mxu0 %vm670_vm0, %v2932_v21  ;;  %3280 = vmatmul.mubr.msk.bf16.gmra.mrb[4].mxu1 %vm670_vm0, %v2936_v16 }
 0x1c0   : >> { %v3269_v43 = vpop.f32.mrb[0].mxu0  ;;  %v3277_v44 = vpop.f32.mrb[0].mxu1 }
 0x1c1   : >> { %v733_v22 = vpop.f32.mrb[1].mxu0  ;;  %v765_v45 = vpop.f32.mrb[1].mxu1  ;;  %v742_v14 = vadd.f32 %v3269_v43, %v5712_v27  ;;  %v774_v23 = vadd.f32 %v3277_v44, %v4786_v38 }
 0x1c2   : >> { %v3270_v42 = vpop.f32.mrb[2].mxu0  ;;  %v3278_v46 = vpop.f32.mrb[2].mxu1  ;;  %v734_v21 = vadd.f32 %v733_v22, %v5713_v28  ;;  %v766_v16 = vadd.f32 %v765_v45, %v4782_v36 }
 0x1c3   : >> { %v745_v47 = vadd.f32 %v3270_v42, %v4768_v29  ;;  %v777_v48 = vadd.f32 %v3278_v46, %v4784_v37  ;;  %v736_v49 = vpop.f32.mrb[3].mxu0  ;;  %v768_v50 = vpop.f32.mrb[3].mxu1  ;;  %v4909_v29 = vmov (%p623_p9), 0.0  }
 0x1c4   : >> { %v737_v51 = vadd.f32 %v736_v49, %v4770_v30  ;;  %v769_v52 = vadd.f32 %v768_v50, %v4780_v35  ;;  %v4911_v30 = vmov (%p623_p9), 0.0  }
 0x1c5   : >> { %v797_v53 = vpack.c.bf16 %v745_v47, %v742_v14  ;;  %v801_v54 = vpack.c.bf16 %v777_v48, %v774_v23 }
 0x1c6   : >> { %v796_v55 = vpack.c.bf16 %v737_v51, %v734_v21  ;;  %v800_v43 = vpack.c.bf16 %v769_v52, %v766_v16 }
 0x1c7   : >> { %808 = vst [vmem:[%s806_s13 + $0x8] sm:$0xff] %v797_v53  ;;  %812 = vst [vmem:[%s806_s13 + $0x28] sm:$0xff] %v801_v54 }
 0x1c8   : >> { %807 = vst [vmem:[%s806_s13] sm:$0xff] %v796_v55  ;;  %811 = vst [vmem:[%s806_s13 + $0x20] sm:$0xff] %v800_v43  ;;  %v3273_v44 = vpop.f32.mrb[4].mxu0  ;;  %v3281_v46 = vpop.f32.mrb[4].mxu1  ;;  %v4887_v43 = vmov (%p623_p9), 0.0  }
 0x1c9   : >> { %v749_v42 = vpop.f32.mrb[5].mxu0  ;;  %v781_v27 = vpop.f32.mrb[5].mxu1  ;;  %v758_v45 = vadd.f32 %v3273_v44, %v4778_v34  ;;  %v790_v49 = vadd.f32 %v3281_v46, %v4794_v26  ;;  %v4889_v44 = vmov (%p623_p9), 0.0   ;;  %v4891_v46 = vmov (%p623_p9), 0.0  }
 0x1ca   : >> { %v3274_v22 = vpop.f32.mrb[6].mxu0  ;;  %v3282_v28 = vpop.f32.mrb[6].mxu1  ;;  %v750_v52 = vadd.f32 %v749_v42, %v4774_v32  ;;  %v782_v53 = vadd.f32 %v781_v27, %v4790_v40  ;;  %625 = sbr.rel (!%p623_p9) target bundleno = 229 (0xe5), region = 148  ;;  %v4885_v27 = vmov (%p623_p9), 0.0   ;;  %v4893_v42 = vmov (%p623_p9), 0.0  }
 0x1cb   : >> { %v761_v47 = vadd.f32 %v3274_v22, %v4776_v33  ;;  %v793_v48 = vadd.f32 %v3282_v28, %v4792_v41  ;;  %v752_v50 = vpop.f32.mrb[7].mxu0  ;;  %v784_v51 = vpop.f32.mrb[7].mxu1  ;;  %v4883_v28 = vmov (%p623_p9), 0.0   ;;  %v4895_v22 = vmov (%p623_p9), 0.0  }
 0x1cc   : >> { %v753_v54 = vadd.f32 %v752_v50, %v4772_v31  ;;  %v785_v55 = vadd.f32 %v784_v51, %v4788_v39  ;;  %v4907_v26 = vmov (%p623_p9), 0.0   ;;  %v4913_v31 = vmov (%p623_p9), 0.0  }
 0x1cd   : >> { %v799_v14 = vpack.c.bf16 %v761_v47, %v758_v45  ;;  %v803_v23 = vpack.c.bf16 %v793_v48, %v790_v49  ;;  %v4897_v45 = vmov (%p623_p9), 0.0   ;;  %v4899_v49 = vmov (%p623_p9), 0.0  }
 0x1ce   : >> { %v798_v21 = vpack.c.bf16 %v753_v54, %v750_v52  ;;  %v802_v16 = vpack.c.bf16 %v785_v55, %v782_v53  ;;  %v4901_v47 = vmov (%p623_p9), 0.0  }
 0x1cf   : >> { %810 = vst [vmem:[%s806_s13 + $0x18] sm:$0xff] %v799_v14  ;;  %814 = vst [vmem:[%s806_s13 + $0x38] sm:$0xff] %v803_v23 }
 0x1d0   : >> { %809 = vst [vmem:[%s806_s13 + $0x10] sm:$0xff] %v798_v21  ;;  %813 = vst [vmem:[%s806_s13 + $0x30] sm:$0xff] %v802_v16 }
 0x1d1 LB: >> { %v865_v32 = vpack.c.bf16 %v4314_v30, %v4318_v31  ;;  %v866_v33 = vpack.c.bf16 %v4306_v26, %v4310_v29  ;;  %v5714_v59 = vld [vmem:[#allocation20_spill] sm:$0xff]  ;;  %v5715_v58 = vld [vmem:[#allocation19_spill] sm:$0xff]  ;;  %vm907_vm2 = vcmask 261120   ;;  %v5716_v61 = vld [vmem:[#allocation22_spill] sm:$0xff]  ;;  %vm1193_vm3 = vcmask 523264   ;;  %s3161_s29 = sshll.u32 %s4322_s23, 8  ;;  %s4322_s23 = sphi %s4915_s23, %s820_s23   ;;  %v4318_v31 = vphi %v4913_v31, %v5497_v31   ;;  %v4314_v30 = vphi %v4911_v30, %v5802_v30   ;;  %v4310_v29 = vphi %v4909_v29, %v5491_v29   ;;  %v4306_v26 = vphi %v4907_v26, %v5801_v26   ;;  %v4302_v57 = vphi %v4905_v57, %v5800_v57   ;;  %v4298_v56 = vphi %v4903_v56, %v5799_v56   ;;  %v4294_v47 = vphi %v4901_v47, %v5798_v47   ;;  %v4290_v49 = vphi %v4899_v49, %v5466_v49   ;;  %v4286_v45 = vphi %v4897_v45, %v5797_v45   ;;  %v4282_v22 = vphi %v4895_v22, %v5796_v22   ;;  %v4278_v42 = vphi %v4893_v42, %v5795_v42   ;;  %v4274_v46 = vphi %v4891_v46, %v5794_v46   ;;  %v4270_v44 = vphi %v4889_v44, %v2725_v44   ;;  %v4266_v43 = vphi %v4887_v43, %v2726_v43   ;;  %v4262_v27 = vphi %v4885_v27, %v2727_v27   ;;  %v4258_v28 = vphi %v4883_v28, %v2728_v28  }
 0x1d2   : >> { %v4962_v34 = vcombine.low %v5715_v58, %v5714_v59  ;;  %v5717_v60 = vld [vmem:[#allocation21_spill] sm:$0xff]  ;;  %v5718_v63 = vld [vmem:[#allocation24_spill] sm:$0xff]  ;;  %v5719_v62 = vld [vmem:[#allocation23_spill] sm:$0xff]  ;;  %s5017_s14 = scalar_lea.vmem [#allocation2], %s3161_s29  ;;  %s820_s23 = sadd.s32 1, %s4322_s23  }
 0x1d3   : >> { %3283 = vmatprep.subr.bf16.mxu0 %v865_v32  ;;  %v4968_v35 = vcombine.low %v5717_v60, %v5716_v61  ;;  %v4972_v36 = vcombine.low %v5719_v62, %v5718_v63  ;;  %v5720_v1 = vld [vmem:[#allocation26_spill] sm:$0xff]  ;;  %v5721_v0 = vld [vmem:[#allocation25_spill] sm:$0xff]  ;;  %v5722_v3 = vld [vmem:[#allocation28_spill] sm:$0xff]  ;;  %p5545_p10 = scmp.ge.s32.totalorder %s820_s23, 2  }
 0x1d4   : >> { %3287 = vmatprep.mubr.msk.bf16.mxu0 %vm907_vm2, %v4962_v34  ;;  %3284 = vmatpush3.bf16.msra.mxu0 %v865_v32  ;;  %v4980_v37 = vcombine.low %v5721_v0, %v5720_v1  ;;  %v5723_v2 = vld [vmem:[#allocation27_spill] sm:$0xff]  ;;  %v5724_v5 = vld [vmem:[#allocation30_spill] sm:$0xff]  ;;  %v5725_v4 = vld [vmem:[#allocation29_spill] sm:$0xff]  ;;  %vm4326_vm4 = vmmov (%p5545_p10), 0  }
 0x1d5   : >> { %3285 = vmatprep.subr.bf16.mxu0 %v866_v33  ;;  %v4984_v38 = vcombine.low %v5723_v2, %v5722_v3  ;;  %v4992_v39 = vcombine.low %v5725_v4, %v5724_v5  ;;  %v5726_v7 = vld [vmem:[#allocation32_spill] sm:$0xff]  ;;  %v5727_v6 = vld [vmem:[#allocation31_spill] sm:$0xff]  ;;  %v5728_v9 = vld [vmem:[#allocation34_spill] sm:$0xff] }
 0x1d6   : >> { %v4996_v40 = vcombine.low %v5727_v6, %v5726_v7  ;;  %v5729_v8 = vld [vmem:[#allocation33_spill] sm:$0xff]  ;;  %v5730_v11 = vld [vmem:[#allocation36_spill] sm:$0xff]  ;;  %v5731_v10 = vld [vmem:[#allocation35_spill] sm:$0xff] }
 0x1d7   : >> { %v5004_v41 = vcombine.low %v5729_v8, %v5728_v9  ;;  %v5012_v48 = vcombine.low %v5731_v10, %v5730_v11  ;;  %v842_v50 = vld [vmem:[%s5017_s14 + $0x8] sm:$0xff]  ;;  %v841_v51 = vld [vmem:[%s5017_s14] sm:$0xff]  ;;  %v844_v29 = vld [vmem:[%s5017_s14 + $0x18] sm:$0xff] }
 0x1d8   : >> { %3286 = vmatpush3.bf16.msra.mxu0 %v866_v33  ;;  %v851_v52 = vunpack.c.l.bf16 %v842_v50  ;;  %v849_v53 = vunpack.c.l.bf16 %v841_v51  ;;  %v852_v54 = vunpack.c.h.bf16 %v842_v50  ;;  %v850_v14 = vunpack.c.h.bf16 %v841_v51  ;;  %v843_v33 = vld [vmem:[%s5017_s14 + $0x10] sm:$0xff]  ;;  %v845_v5 = vld [vmem:[%s5017_s14 + $0x20] sm:$0xff]  ;;  %v5733_v13 = vld [vmem:[#allocation38_spill] sm:$0xff] }
 0x1d9   : >> { %5732 = vst [vmem:[#allocation67_spill] sm:$0xff] %v5012_v48  ;;  %3311 = vmatprep.mubr.msk.bf16.mxu1 %vm1193_vm3, %v5012_v48  ;;  %v855_v3 = vunpack.c.l.bf16 %v844_v29  ;;  %v853_v50 = vunpack.c.l.bf16 %v843_v33  ;;  %v856_v51 = vunpack.c.h.bf16 %v844_v29  ;;  %v847_v6 = vld [vmem:[%s5017_s14 + $0x30] sm:$0xff]  ;;  %v5734_v12 = vld [vmem:[#allocation37_spill] sm:$0xff]  ;;  %v5735_v15 = vld [vmem:[#allocation40_spill] sm:$0xff] }
 0x1da   : >> { %v5114_v11 = vld [vmem:[%s5017_s14 + $0x68] sm:$0xff]  ;;  %v5754_v19 = vld [vmem:[#allocation61_spill] sm:$0xff]  ;;  %v5756_v18 = vld [vmem:[#allocation60_spill] sm:$0xff] }
 0x1db   : >> { %3288 = vmatmul.mubr.msk.bf16.vlgmr.msra.gmra.mrb[0].mxu0 %vm907_vm2, %v4968_v35 }
 0x1dc   : >> { %3291 = vmatprep.mubr.msk.bf16.mxu0 %vm907_vm2, %v4972_v36 }
 0x1e3   : >> { %3292 = vmatmul.mubr.msk.bf16.gmra.mrb[4].mxu0 %vm907_vm2, %v4980_v37 }
 0x1e4   : >> { %3295 = vmatprep.mubr.msk.bf16.mxu0 %vm907_vm2, %v4984_v38 }
 0x1eb   : >> { %3296 = vmatmul.mubr.msk.bf16.gmra.mrb[8].mxu0 %vm907_vm2, %v4992_v39 }
 0x1ec   : >> { %3299 = vmatprep.mubr.msk.bf16.mxu0 %vm907_vm2, %v4996_v40 }
 0x1f3   : >> { %3300 = vmatmul.mubr.msk.bf16.gmra.mrb[12].mxu0 %vm907_vm2, %v5004_v41 }
 0x1f4   : >> { %3331 = vmatprep.mubr.msk.bf16.mxu0 %vm907_vm2, %v4962_v34 }
 0x2ae   : >> { %v3289_v55 = vpop.f32.mrb[0].mxu0 }
 0x2af   : >> { %v1031_v23 = vadd.f32 %v3289_v55, %v851_v52  ;;  %v966_v21 = vpop.f32.mrb[1].mxu0 }
 0x2b0   : >> { %v1029_v16 = vadd.f32 %v966_v21, %v849_v53  ;;  %v3290_v26 = vpop.f32.mrb[2].mxu0  ;;  %v854_v53 = vunpack.c.h.bf16 %v843_v33 }
 0x2b1   : >> { %v2968_v30 = vmul.f32 -1.442695, %v1031_v23  ;;  %v1032_v31 = vadd.f32 %v3290_v26, %v852_v54  ;;  %v969_v32 = vpop.f32.mrb[3].mxu0 }
 0x2b2   : >> { %v2966_v0 = vmul.f32 -1.442695, %v1029_v16  ;;  %v1030_v1 = vadd.f32 %v969_v32, %v850_v14 }
 0x2b3   : >> { %3644 = vpow2.f32 %v2968_v30  ;;  %v2969_v2 = vmul.f32 -1.442695, %v1032_v31  ;;  %v846_v30 = vld [vmem:[%s5017_s14 + $0x28] sm:$0xff] }
 0x2b4   : >> { %3646 = vpow2.f32 %v2966_v0  ;;  %v2967_v4 = vmul.f32 -1.442695, %v1030_v1 }
 0x2b5   : >> { %3648 = vpow2.f32 %v2969_v2  ;;  %v859_v2 = vunpack.c.l.bf16 %v846_v30 }
 0x2b6   : >> { %3650 = vpow2.f32 %v2967_v4  ;;  %v3293_v52 = vpop.f32.mrb[4].mxu0  ;;  %v857_v4 = vunpack.c.l.bf16 %v845_v5 }
 0x2b7   : >> { %v1035_v55 = vadd.f32 %v3293_v52, %v855_v3  ;;  %v982_v23 = vpop.f32.mrb[5].mxu0 }
 0x2b8   : >> { %v1033_v54 = vadd.f32 %v982_v23, %v853_v50  ;;  %v3294_v21 = vpop.f32.mrb[6].mxu0 }
 0x2b9   : >> { %v2972_v26 = vmul.f32 -1.442695, %v1035_v55  ;;  %v1036_v16 = vadd.f32 %v3294_v21, %v856_v51  ;;  %v985_v14 = vpop.f32.mrb[7].mxu0  ;;  %v860_v51 = vunpack.c.h.bf16 %v846_v30 }
 0x2ba   : >> { %v2970_v31 = vmul.f32 -1.442695, %v1033_v54  ;;  %v1034_v32 = vadd.f32 %v985_v14, %v854_v53  ;;  %v858_v53 = vunpack.c.h.bf16 %v845_v5  ;;  %v848_v14 = vld [vmem:[%s5017_s14 + $0x38] sm:$0xff] }
 0x2bb   : >> { %3652 = vpow2.f32 %v2972_v26  ;;  %v2973_v0 = vmul.f32 -1.442695, %v1036_v16  ;;  %v863_v30 = vunpack.c.l.bf16 %v848_v14  ;;  %v864_v5 = vunpack.c.h.bf16 %v848_v14 }
 0x2bc   : >> { %3654 = vpow2.f32 %v2970_v31  ;;  %v2971_v1 = vmul.f32 -1.442695, %v1034_v32 }
 0x2bd   : >> { %v3645_v29 = vpop.eup %3644  ;;  %3656 = vpow2.f32 %v2973_v0 }
 0x2be   : >> { %v3647_v3 = vpop.eup %3646  ;;  %v1059_v33 = vadd.f32 1.0, %v3645_v29  ;;  %3658 = vpow2.f32 %v2971_v1  ;;  %v3297_v50 = vpop.f32.mrb[8].mxu0 }
 0x2bf   : >> { %v3649_v52 = vpop.eup %3648  ;;  %v1057_v55 = vadd.f32 1.0, %v3647_v3  ;;  %v998_v23 = vpop.f32.mrb[9].mxu0  ;;  %v1039_v26 = vadd.f32 %v3297_v50, %v859_v2  ;;  %v861_v3 = vunpack.c.l.bf16 %v847_v6  ;;  %v862_v50 = vunpack.c.h.bf16 %v847_v6 }
 0x2c0   : >> { %v3651_v54 = vpop.eup %3650  ;;  %3660 = vrcp.f32 %v1059_v33  ;;  %v1060_v21 = vadd.f32 1.0, %v3649_v52  ;;  %v3298_v16 = vpop.f32.mrb[10].mxu0  ;;  %v1037_v32 = vadd.f32 %v998_v23, %v857_v4 }
 0x2c1   : >> { %3662 = vrcp.f32 %v1057_v55  ;;  %v1058_v31 = vadd.f32 1.0, %v3651_v54  ;;  %v1001_v0 = vpop.f32.mrb[11].mxu0  ;;  %v1040_v1 = vadd.f32 %v3298_v16, %v860_v51 }
 0x2c2   : >> { %3664 = vrcp.f32 %v1060_v21  ;;  %v1038_v29 = vadd.f32 %v1001_v0, %v858_v53 }
 0x2c3   : >> { %3666 = vrcp.f32 %v1058_v31 }
 0x2c4   : >> { %3668 = vtanh.f32 %v1039_v26 }
 0x2c5   : >> { %v3653_v7 = vpop.eup %3652  ;;  %3670 = vtanh.f32 %v1037_v32 }
 0x2c6   : >> { %v3655_v33 = vpop.eup %3654  ;;  %v1083_v52 = vadd.f32 1.0, %v3653_v7  ;;  %3672 = vtanh.f32 %v1040_v1  ;;  %v3301_v2 = vpop.f32.mrb[12].mxu0 }
 0x2c7   : >> { %v3657_v55 = vpop.eup %3656  ;;  %v1081_v54 = vadd.f32 1.0, %v3655_v33  ;;  %3674 = vtanh.f32 %v1038_v29  ;;  %v1043_v4 = vadd.f32 %v3301_v2, %v863_v30  ;;  %v1014_v23 = vpop.f32.mrb[13].mxu0 }
 0x2c8   : >> { %v3659_v21 = vpop.eup %3658  ;;  %3676 = vrcp.f32 %v1083_v52  ;;  %v1084_v51 = vadd.f32 1.0, %v3657_v55  ;;  %v1041_v53 = vadd.f32 %v1014_v23, %v861_v3  ;;  %v3302_v16 = vpop.f32.mrb[14].mxu0 }
 0x2c9   : >> { %3678 = vrcp.f32 %v1081_v54  ;;  %v1082_v26 = vadd.f32 1.0, %v3659_v21  ;;  %v2976_v31 = vmul.f32 -1.442695, %v1043_v4  ;;  %v1044_v32 = vadd.f32 %v3302_v16, %v864_v5  ;;  %v1017_v14 = vpop.f32.mrb[15].mxu0 }
 0x2ca   : >> { %v3661_v0 = vpop.eup %3660  ;;  %3680 = vrcp.f32 %v1084_v51  ;;  %v2974_v7 = vmul.f32 -1.442695, %v1041_v53  ;;  %v1042_v1 = vadd.f32 %v1017_v14, %v862_v50 }
 0x2cb   : >> { %v3663_v6 = vpop.eup %3662  ;;  %3682 = vrcp.f32 %v1082_v26  ;;  %v2977_v33 = vmul.f32 -1.442695, %v1044_v32 }
 0x2cc   : >> { %v3665_v29 = vpop.eup %3664  ;;  %3684 = vpow2.f32 %v2976_v31  ;;  %v2975_v30 = vmul.f32 -1.442695, %v1042_v1 }
 0x2cd   : >> { %v3667_v2 = vpop.eup %3666  ;;  %3686 = vpow2.f32 %v2974_v7 }
 0x2ce   : >> { %v3669_v52 = vpop.eup %3668  ;;  %3688 = vpow2.f32 %v2977_v33 }
 0x2cf   : >> { %v3671_v3 = vpop.eup %3670  ;;  %v1127_v55 = vmul.f32 %v3669_v52, %v3661_v0  ;;  %3690 = vpow2.f32 %v2975_v30 }
 0x2d0   : >> { %v3673_v54 = vpop.eup %3672  ;;  %v1125_v5 = vmul.f32 %v3671_v3, %v3663_v6 }
 0x2d1   : >> { %v3675_v4 = vpop.eup %3674  ;;  %v1128_v23 = vmul.f32 %v3673_v54, %v3665_v29 }
 0x2d2   : >> { %v3677_v21 = vpop.eup %3676  ;;  %v1126_v51 = vmul.f32 %v3675_v4, %v3667_v2 }
 0x2d3   : >> { %v3679_v50 = vpop.eup %3678  ;;  %v1123_v53 = vmul.f32 %v4294_v47, %v3677_v21 }
 0x2d4   : >> { %v3681_v16 = vpop.eup %3680  ;;  %v1121_v26 = vmul.f32 %v4302_v57, %v3679_v50 }
 0x2d5   : >> { %v3683_v31 = vpop.eup %3682  ;;  %v1124_v32 = vmul.f32 %v4290_v49, %v3681_v16  ;;  %v5030_v14 = vadd.f32 %v1127_v55, %v1123_v53 }
 0x2d6   : >> { %v3685_v7 = vpop.eup %3684  ;;  %v1122_v0 = vmul.f32 %v4298_v56, %v3683_v31  ;;  %v5033_v1 = vadd.f32 %v1125_v5, %v1121_v26 }
 0x2d7   : >> { %v3687_v6 = vpop.eup %3686  ;;  %3692 = vtanh.f32 %v5030_v14  ;;  %v5036_v33 = vadd.f32 %v1128_v23, %v1124_v32  ;;  %v1111_v29 = vadd.f32 1.0, %v3685_v7  ;;  %v1145_v32 = vpack.c.bf16 %v4282_v22, %v4286_v45  ;;  %v5736_v22 = vld [vmem:[#allocation39_spill] sm:$0xff] }
 0x2d8   : >> { %v3689_v47 = vpop.eup %3688  ;;  %3694 = vtanh.f32 %v5033_v1  ;;  %v5039_v57 = vadd.f32 %v1126_v51, %v1122_v0  ;;  %v1109_v30 = vadd.f32 1.0, %v3687_v6  ;;  %v1146_v7 = vpack.c.bf16 %v4274_v46, %v4278_v42  ;;  %v5737_v46 = vld [vmem:[#allocation42_spill] sm:$0xff]  ;;  %v5738_v42 = vld [vmem:[#allocation41_spill] sm:$0xff] }
 0x2d9   : >> { %v3691_v49 = vpop.eup %3690  ;;  %3696 = vtanh.f32 %v5036_v33  ;;  %v1112_v2 = vadd.f32 1.0, %v3689_v47  ;;  %v5053_v0 = vcombine.low %v5734_v12, %v5733_v13  ;;  %v5057_v45 = vcombine.low %v5736_v22, %v5735_v15  ;;  %v5740_v47 = vld [vmem:[#allocation43_spill] sm:$0xff]  ;;  %v5122_v15 = vld [vmem:[%s5017_s14 + $0x60] sm:$0xff] }
 0x2da   : >> { %3698 = vtanh.f32 %v5039_v57  ;;  %v1110_v56 = vadd.f32 1.0, %v3691_v49  ;;  %v5069_v6 = vcombine.low %v5738_v42, %v5737_v46  ;;  %v5741_v49 = vld [vmem:[#allocation46_spill] sm:$0xff]  ;;  %v3011_v46 = vld [vmem:[%s5017_s14 + $0x58] sm:$0xff] }
 0x2db   : >> { %3700 = vrcp.f32 %v1111_v29  ;;  %v5739_v29 = vld [vmem:[#allocation44_spill] sm:$0xff] }
 0x2dc   : >> { %3702 = vrcp.f32 %v1109_v30  ;;  %v5073_v30 = vcombine.low %v5740_v47, %v5739_v29 }
 0x2dd   : >> { %3704 = vrcp.f32 %v1112_v2  ;;  %v5742_v2 = vld [vmem:[#allocation45_spill] sm:$0xff] }
 0x2de   : >> { %3706 = vrcp.f32 %v1110_v56  ;;  %v5085_v56 = vcombine.low %v5742_v2, %v5741_v49  ;;  %v3010_v49 = vld [vmem:[%s5017_s14 + $0x50] sm:$0xff] }
 0x2df   : >> { %v1427_v8 = vunpack.c.l.bf16 %v3010_v49 }
 0x2e0   : >> { %5743 = vst [vmem:[#allocation68_spill] sm:$0xff] %v5085_v56 }
 0x2e1   : >> { %v3693_v52 = vpop.eup %3692 }
 0x2e2   : >> { %v3695_v3 = vpop.eup %3694 }
 0x2e3   : >> { %v3697_v55 = vpop.eup %3696 }
 0x2e4   : >> { %v3699_v54 = vpop.eup %3698 }
 0x2e5   : >> { %v3701_v5 = vpop.eup %3700 }
 0x2e6   : >> { %v3703_v4 = vpop.eup %3702  ;;  %v1139_v51 = vmul.f32 %v3701_v5, %v3693_v52  ;;  %v5744_v52 = vld [vmem:[#allocation48_spill] sm:$0xff]  ;;  %v5748_v5 = vld [vmem:[#allocation49_spill] sm:$0xff] }
 0x2e7   : >> { %v3705_v23 = vpop.eup %3704  ;;  %v1137_v53 = vmul.f32 %v3703_v4, %v3695_v3  ;;  %v5745_v3 = vld [vmem:[#allocation47_spill] sm:$0xff] }
 0x2e8   : >> { %v3707_v21 = vpop.eup %3706  ;;  %v1140_v50 = vmul.f32 %v3705_v23, %v3697_v55  ;;  %v5089_v55 = vcombine.low %v5745_v3, %v5744_v52  ;;  %v3009_v23 = vld [vmem:[%s5017_s14 + $0x48] sm:$0xff] }
 0x2e9   : >> { %v1138_v16 = vmul.f32 %v3707_v21, %v3699_v54  ;;  %v5747_v54 = vld [vmem:[#allocation50_spill] sm:$0xff]  ;;  %v3008_v21 = vld [vmem:[%s5017_s14 + $0x40] sm:$0xff] }
 0x2ea   : >> { %v1142_v26 = vpack.c.bf16 %v1140_v50, %v1139_v51  ;;  %5746 = vst [vmem:[#allocation69_spill] sm:$0xff] %v5089_v55  ;;  %v5101_v4 = vcombine.low %v5748_v5, %v5747_v54  ;;  %v1425_v51 = vunpack.c.l.bf16 %v3009_v23  ;;  %v1423_v50 = vunpack.c.l.bf16 %v3008_v21 }
 0x2eb   : >> { %v1141_v31 = vpack.c.bf16 %v1138_v16, %v1137_v53  ;;  %v1426_v53 = vunpack.c.h.bf16 %v3009_v23  ;;  %v1429_v54 = vunpack.c.l.bf16 %v3011_v46  ;;  %v1430_v23 = vunpack.c.h.bf16 %v3011_v46 }
 0x2ec   : >> { %5749 = vst [vmem:[#allocation70_spill] sm:$0xff] %v5101_v4 }
 0x2ed   : >> { %3303 = vmatprep.subr.bf16.mxu1 %v1141_v31  ;;  %3327 = vmatprep.subr.bf16.mxu0 %v1141_v31 }
 0x2ee   : >> { %3304 = vmatpush3.bf16.msra.mxu1 %v1141_v31  ;;  %3328 = vmatpush3.bf16.msra.mxu0 %v1141_v31 }
 0x2ef   : >> { %3305 = vmatprep.subr.bf16.mxu1 %v1142_v26  ;;  %3329 = vmatprep.subr.bf16.mxu0 %v1142_v26 }
 0x2f2   : >> { %3306 = vmatpush3.bf16.msra.mxu1 %v1142_v26  ;;  %3330 = vmatpush3.bf16.msra.mxu0 %v1142_v26  ;;  %v1424_v26 = vunpack.c.h.bf16 %v3008_v21 }
 0x2f3   : >> { %3307 = vmatprep.subr.bf16.mxu1 %v1145_v32 }
 0x2f5   : >> { %3332 = vmatmul.mubr.msk.bf16.vlgmr.msra.gmra.mrb[16].mxu0 %vm907_vm2, %v4968_v35 }
 0x2f6   : >> { %3308 = vmatpush3.bf16.msra.mxu1 %v1145_v32  ;;  %3335 = vmatprep.mubr.msk.bf16.mxu0 %vm907_vm2, %v4972_v36 }
 0x2f7   : >> { %3309 = vmatprep.subr.bf16.mxu1 %v1146_v7 }
 0x2fa   : >> { %3310 = vmatpush3.bf16.msra.mxu1 %v1146_v7 }
 0x2fd   : >> { %3312 = vmatmul.mubr.msk.bf16.vlgmr.msra.gmra.mrb[0].mxu1 %vm1193_vm3, %v5053_v0  ;;  %3336 = vmatmul.mubr.msk.bf16.gmra.mrb[20].mxu0 %vm907_vm2, %v4980_v37 }
 0x2fe   : >> { %3315 = vmatprep.mubr.msk.bf16.mxu1 %vm1193_vm3, %v5057_v45  ;;  %3339 = vmatprep.mubr.msk.bf16.mxu0 %vm907_vm2, %v4984_v38 }
 0x305   : >> { %3316 = vmatmul.mubr.msk.bf16.gmra.mrb[4].mxu1 %vm1193_vm3, %v5069_v6  ;;  %3340 = vmatmul.mubr.msk.bf16.gmra.mrb[24].mxu0 %vm907_vm2, %v4992_v39 }
 0x306   : >> { %3319 = vmatprep.mubr.msk.bf16.mxu1 %vm1193_vm3, %v5073_v30  ;;  %3343 = vmatprep.mubr.msk.bf16.mxu0 %vm907_vm2, %v4996_v40 }
 0x30d   : >> { %3320 = vmatmul.mubr.msk.bf16.gmra.mrb[8].mxu1 %vm1193_vm3, %v5085_v56  ;;  %3344 = vmatmul.mubr.msk.bf16.gmra.mrb[28].mxu0 %vm907_vm2, %v5004_v41 }
 0x30e   : >> { %3323 = vmatprep.mubr.msk.bf16.mxu1 %vm1193_vm3, %v5089_v55  ;;  %3375 = vmatprep.mubr.msk.bf16.mxu0 %vm907_vm2, %v4962_v34 }
 0x315   : >> { %3324 = vmatmul.mubr.msk.bf16.gmra.mrb[12].mxu1 %vm1193_vm3, %v5101_v4 }
 0x316   : >> { %3355 = vmatprep.mubr.msk.bf16.mxu1 %vm1193_vm3, %v5012_v48 }
 0x3c8   : >> { %v3333_v16 = vpop.f32.mrb[16].mxu0 }
 0x3c9   : >> { %v1538_v31 = vadd.f32 %v3333_v16, %v1425_v51  ;;  %v1473_v32 = vpop.f32.mrb[17].mxu0  ;;  %v1428_v51 = vunpack.c.h.bf16 %v3010_v49 }
 0x3ca   : >> { %v1536_v7 = vadd.f32 %v1473_v32, %v1423_v50  ;;  %v3334_v22 = vpop.f32.mrb[18].mxu0 }
 0x3cb   : >> { %v3026_v42 = vmul.f32 -1.442695, %v1538_v31  ;;  %v1539_v29 = vadd.f32 %v3334_v22, %v1426_v53  ;;  %v1476_v47 = vpop.f32.mrb[19].mxu0  ;;  %v5750_v31 = vld [vmem:[#allocation57_spill] sm:$0xff] }
 0x3cc   : >> { %v3024_v2 = vmul.f32 -1.442695, %v1536_v7  ;;  %v1537_v52 = vadd.f32 %v1476_v47, %v1424_v26 }
 0x3cd   : >> { %3708 = vpow2.f32 %v3026_v42  ;;  %v3027_v3 = vmul.f32 -1.442695, %v1539_v29 }
 0x3ce   : >> { %3710 = vpow2.f32 %v3024_v2  ;;  %v3025_v5 = vmul.f32 -1.442695, %v1537_v52 }
 0x3cf   : >> { %3712 = vpow2.f32 %v3027_v3 }
 0x3d0   : >> { %3714 = vpow2.f32 %v3025_v5  ;;  %v3337_v21 = vpop.f32.mrb[20].mxu0  ;;  %v3313_v50 = vpop.f32.mrb[0].mxu1 }
 0x3d1   : >> { %v1542_v16 = vadd.f32 %v3337_v21, %v1429_v54  ;;  %v1489_v32 = vpop.f32.mrb[21].mxu0  ;;  %v1261_v53 = vadd.f32 %v3313_v50, %v5750_v31  ;;  %v1252_v22 = vpop.f32.mrb[1].mxu1  ;;  %v5751_v54 = vld [vmem:[#allocation55_spill] sm:$0xff] }
 0x3d2   : >> { %v1540_v7 = vadd.f32 %v1489_v32, %v1427_v8  ;;  %v3338_v26 = vpop.f32.mrb[22].mxu0  ;;  %v3314_v42 = vpop.f32.mrb[2].mxu1  ;;  %v1253_v21 = vadd.f32 %v1252_v22, %v5751_v54  ;;  %v5752_v8 = vld [vmem:[#allocation56_spill] sm:$0xff]  ;;  %v1432_v54 = vunpack.c.h.bf16 %v5122_v15 }
 0x3d3   : >> { %v3030_v29 = vmul.f32 -1.442695, %v1542_v16  ;;  %v1543_v47 = vadd.f32 %v3338_v26, %v1430_v23  ;;  %v1492_v2 = vpop.f32.mrb[23].mxu0  ;;  %v1255_v52 = vpop.f32.mrb[3].mxu1  ;;  %v2996_v5 = vmul.f32 -1.442695, %v1261_v53  ;;  %v1264_v32 = vadd.f32 %v3314_v42, %v5752_v8 }
 0x3d4   : >> { %v3028_v10 = vmul.f32 -1.442695, %v1540_v7  ;;  %v1541_v3 = vadd.f32 %v1492_v2, %v1428_v51  ;;  %v5753_v23 = vld [vmem:[#allocation54_spill] sm:$0xff] }
 0x3d5   : >> { %3716 = vpow2.f32 %v3030_v29  ;;  %v3031_v46 = vmul.f32 -1.442695, %v1543_v47  ;;  %v1256_v26 = vadd.f32 %v1255_v52, %v5753_v23 }
 0x3d6   : >> { %3718 = vpow2.f32 %v3028_v10  ;;  %v3029_v49 = vmul.f32 -1.442695, %v1541_v3  ;;  %v1433_v10 = vunpack.c.l.bf16 %v5114_v11 }
 0x3d7   : >> { %v3709_v50 = vpop.eup %3708  ;;  %3720 = vpow2.f32 %v3031_v46  ;;  %v2994_v46 = vmul.f32 -1.442695, %v1253_v21 }
 0x3d8   : >> { %v3711_v31 = vpop.eup %3710  ;;  %v1566_v16 = vadd.f32 1.0, %v3709_v50  ;;  %3722 = vpow2.f32 %v3029_v49  ;;  %v3341_v7 = vpop.f32.mrb[24].mxu0  ;;  %v2997_v50 = vmul.f32 -1.442695, %v1264_v32 }
 0x3d9   : >> { %v3317_v51 = vpop.f32.mrb[4].mxu1  ;;  %v3713_v29 = vpop.eup %3712  ;;  %v1564_v47 = vadd.f32 1.0, %v3711_v31  ;;  %3724 = vpow2.f32 %v2996_v5  ;;  %v2995_v31 = vmul.f32 -1.442695, %v1256_v26  ;;  %v1546_v5 = vadd.f32 %v3341_v7, %v1433_v10  ;;  %v5755_v7 = vld [vmem:[#allocation59_spill] sm:$0xff] }
 0x3da   : >> { %v1505_v53 = vpop.f32.mrb[25].mxu0  ;;  %v1268_v22 = vpop.f32.mrb[5].mxu1  ;;  %3726 = vrcp.f32 %v1566_v16  ;;  %v1567_v3 = vadd.f32 1.0, %v3713_v29  ;;  %v1277_v16 = vadd.f32 %v3317_v51, %v5754_v19 }
 0x3db   : >> { %v3715_v2 = vpop.eup %3714  ;;  %v3342_v42 = vpop.f32.mrb[26].mxu0  ;;  %3728 = vrcp.f32 %v1564_v47  ;;  %v1431_v47 = vunpack.c.l.bf16 %v5122_v15  ;;  %v1269_v10 = vadd.f32 %v1268_v22, %v5755_v7 }
 0x3dc   : >> { %v3318_v12 = vpop.f32.mrb[6].mxu1  ;;  %v1565_v49 = vadd.f32 1.0, %v3715_v2  ;;  %v5119_v52 = vpop.f32.mrb[27].mxu0  ;;  %3730 = vrcp.f32 %v1567_v3  ;;  %v3000_v62 = vmul.f32 -1.442695, %v1277_v16 }
 0x3dd   : >> { %v1271_v13 = vpop.f32.mrb[7].mxu1  ;;  %v1544_v19 = vadd.f32 %v1505_v53, %v1431_v47 }
 0x3de   : >> { %3732 = vrcp.f32 %v1565_v49 }
 0x3df   : >> { %3734 = vpow2.f32 %v2994_v46  ;;  %v3717_v58 = vpop.eup %3716 }
 0x3e0   : >> { %3736 = vpow2.f32 %v2997_v50  ;;  %v3719_v21 = vpop.eup %3718  ;;  %v1590_v29 = vadd.f32 1.0, %v3717_v58  ;;  %v3345_v32 = vpop.f32.mrb[28].mxu0  ;;  %v1434_v58 = vunpack.c.h.bf16 %v5114_v11 }
 0x3e1   : >> { %3738 = vpow2.f32 %v2995_v31  ;;  %v5126_v2 = vpop.f32.mrb[8].mxu1  ;;  %v3721_v59 = vpop.eup %3720  ;;  %v1588_v26 = vadd.f32 1.0, %v3719_v21  ;;  %v3015_v21 = vld [vmem:[%s5017_s14 + $0x78] sm:$0xff] }
 0x3e2   : >> { %3740 = vtanh.f32 %v1546_v5  ;;  %v1521_v3 = vpop.f32.mrb[29].mxu0  ;;  %v5129_v46 = vpop.f32.mrb[9].mxu1  ;;  %v1591_v51 = vadd.f32 1.0, %v3721_v59  ;;  %v2998_v59 = vmul.f32 -1.442695, %v1269_v10  ;;  %v1547_v8 = vadd.f32 %v3342_v42, %v1434_v58 }
 0x3e3   : >> { %v3723_v49 = vpop.eup %3722  ;;  %3742 = vrcp.f32 %v1590_v29  ;;  %v3346_v50 = vpop.f32.mrb[30].mxu0  ;;  %v3014_v29 = vld [vmem:[%s5017_s14 + $0x70] sm:$0xff] }
 0x3e4   : >> { %v5132_v31 = vpop.f32.mrb[10].mxu1  ;;  %v3725_v60 = vpop.eup %3724  ;;  %3744 = vrcp.f32 %v1588_v26  ;;  %v1589_v61 = vadd.f32 1.0, %v3723_v49  ;;  %v1280_v26 = vadd.f32 %v3318_v12, %v5756_v18  ;;  %v1437_v49 = vunpack.c.l.bf16 %v3015_v21 }
 0x3e5   : >> { %v1524_v5 = vpop.f32.mrb[31].mxu0  ;;  %v5135_v63 = vpop.f32.mrb[11].mxu1  ;;  %3746 = vrcp.f32 %v1591_v51  ;;  %v1329_v7 = vadd.f32 1.0, %v3725_v60  ;;  %v1435_v9 = vunpack.c.l.bf16 %v3014_v29  ;;  %v5757_v60 = vld [vmem:[#allocation58_spill] sm:$0xff]  ;;  %v1436_v55 = vunpack.c.h.bf16 %v3014_v29 }
 0x3e6   : >> { %v3727_v22 = vpop.eup %3726  ;;  %3748 = vrcp.f32 %v1589_v61  ;;  %v1272_v53 = vadd.f32 %v1271_v13, %v5757_v60  ;;  %v3001_v18 = vmul.f32 -1.442695, %v1280_v26  ;;  %v1545_v13 = vadd.f32 %v5119_v52, %v1432_v54 }
 0x3e7   : >> { %v3729_v23 = vpop.eup %3728  ;;  %3750 = vrcp.f32 %v1329_v7  ;;  %v1438_v7 = vunpack.c.h.bf16 %v3015_v21  ;;  %v1548_v60 = vadd.f32 %v1521_v3, %v1435_v9  ;;  %v1549_v52 = vadd.f32 %v1524_v5, %v1436_v55 }
 0x3e8   : >> { %v5138_v11 = vpop.eup %3730  ;;  %3752 = vpow2.f32 %v3000_v62  ;;  %v5145_v47 = vpop.f32.mrb[12].mxu1  ;;  %v1550_v62 = vadd.f32 %v3345_v32, %v1437_v49  ;;  %v1293_v5 = vadd.f32 %v5126_v2, %v4818_v25 }
 0x3e9   : >> { %v5141_v16 = vpop.eup %3732  ;;  %3754 = vtanh.f32 %v1544_v19  ;;  %v5147_v42 = vpop.f32.mrb[13].mxu1  ;;  %v1551_v32 = vadd.f32 %v3346_v50, %v1438_v7  ;;  %v3032_v9 = vmul.f32 -1.442695, %v1548_v60 }
 0x3ea   : >> { %v3735_v51 = vpop.eup %3734  ;;  %3756 = vpow2.f32 %v2998_v59  ;;  %v5149_v48 = vpop.f32.mrb[14].mxu1  ;;  %v2999_v59 = vmul.f32 -1.442695, %v1272_v53  ;;  %v3034_v49 = vmul.f32 -1.442695, %v1550_v62 }
 0x3eb   : >> { %v3737_v61 = vpop.eup %3736  ;;  %v1327_v10 = vadd.f32 1.0, %v3735_v51  ;;  %3758 = vtanh.f32 %v1547_v8  ;;  %v5152_v4 = vpop.f32.mrb[15].mxu1 }
 0x3ec   : >> { %v3739_v12 = vpop.eup %3738  ;;  %v1330_v58 = vadd.f32 1.0, %v3737_v61 }
 0x3ed   : >> { %v3741_v15 = vpop.eup %3740  ;;  %3760 = vrcp.f32 %v1327_v10  ;;  %v1328_v19 = vadd.f32 1.0, %v3739_v12 }
 0x3ee   : >> { %v3743_v51 = vpop.eup %3742  ;;  %3762 = vrcp.f32 %v1330_v58  ;;  %v1634_v21 = vmul.f32 %v3741_v15, %v3727_v22  ;;  %v3033_v58 = vmul.f32 -1.442695, %v1549_v52  ;;  %v5758_v52 = vld [vmem:[#allocation64_spill] sm:$0xff] }
 0x3ef   : >> { %v3745_v56 = vpop.eup %3744  ;;  %v1630_v8 = vmul.f32 %v3743_v51, %v5030_v14  ;;  %3764 = vrcp.f32 %v1328_v19  ;;  %v3035_v14 = vmul.f32 -1.442695, %v1551_v32 }
 0x3f0   : >> { %v3747_v26 = vpop.eup %3746  ;;  %3766 = vpow2.f32 %v3001_v18  ;;  %v1628_v22 = vmul.f32 %v3745_v56, %v5033_v1 }
 0x3f1   : >> { %v3749_v61 = vpop.eup %3748  ;;  %v5155_v10 = vadd.f32 %v1634_v21, %v1630_v8  ;;  %3768 = vtanh.f32 %v1545_v13  ;;  %v1631_v53 = vmul.f32 %v3747_v26, %v5036_v33 }
 0x3f2   : >> { %v5157_v54 = vpop.eup %3750  ;;  %3770 = vpow2.f32 %v2999_v59  ;;  %v1629_v19 = vmul.f32 %v3749_v61, %v5039_v57  ;;  %v1309_v57 = vadd.f32 %v5145_v47, %v4826_v20  ;;  %v1296_v61 = vadd.f32 %v5132_v31, %v4816_v24  ;;  %v5761_v31 = vld [vmem:[#allocation63_spill] sm:$0xff] }
 0x3f3   : >> { %v3753_v3 = vpop.eup %3752  ;;  %3772 = vtanh.f32 %v5155_v10 }
 0x3f4   : >> { %v3755_v29 = vpop.eup %3754  ;;  %v1353_v50 = vadd.f32 1.0, %v3753_v3  ;;  %3774 = vpow2.f32 %v3034_v49  ;;  %v1301_v3 = vadd.f32 %v5147_v42, %v5758_v52 }
 0x3f5   : >> { %v3757_v18 = vpop.eup %3756  ;;  %v1632_v7 = vmul.f32 %v3755_v29, %v3729_v23  ;;  %3776 = vpow2.f32 %v3032_v9 }
 0x3f6   : >> { %v3759_v12 = vpop.eup %3758  ;;  %3778 = vrcp.f32 %v1353_v50  ;;  %v1351_v60 = vadd.f32 1.0, %v3757_v18  ;;  %v5760_v50 = vld [vmem:[#allocation65_spill] sm:$0xff]  ;;  %v3002_v42 = vmul.f32 -1.442695, %v1301_v3 }
 0x3f7   : >> { %v5162_v62 = vpop.eup %3760  ;;  %v5164_v55 = vadd.f32 %v1632_v7, %v1628_v22  ;;  %v1635_v1 = vmul.f32 %v3759_v12, %v5138_v11  ;;  %3780 = vpow2.f32 %v3035_v14  ;;  %v1285_v11 = vadd.f32 %v5129_v46, %v4814_v17  ;;  %v5759_v14 = vld [vmem:[#allocation62_spill] sm:$0xff] }
 0x3f8   : >> { %v5167_v56 = vpop.eup %3762  ;;  %3782 = vrcp.f32 %v1351_v60  ;;  %v1288_v29 = vadd.f32 %v5135_v63, %v5759_v14  ;;  %v1312_v47 = vadd.f32 %v5149_v48, %v5760_v50  ;;  %v3004_v7 = vmul.f32 -1.442695, %v1309_v57 }
 0x3f9   : >> { %v5171_v33 = vpop.eup %3764  ;;  %3784 = vtanh.f32 %v5164_v55  ;;  %v5174_v23 = vadd.f32 %v1635_v1, %v1631_v53  ;;  %v5762_v12 = vmov %v5761_v31  ;;  %v1304_v60 = vadd.f32 %v5152_v4, %v5761_v31 }
 0x3fa   : >> { %v3767_v15 = vpop.eup %3766  ;;  %3786 = vpow2.f32 %v3033_v58  ;;  %v3005_v63 = vmul.f32 -1.442695, %v1312_v47 }
 0x3fb   : >> { %v3769_v13 = vpop.eup %3768  ;;  %3788 = vtanh.f32 %v5174_v23  ;;  %v1354_v51 = vadd.f32 1.0, %v3767_v15  ;;  %v3003_v48 = vmul.f32 -1.442695, %v1304_v60 }
 0x3fc   : >> { %v3771_v21 = vpop.eup %3770  ;;  %v1633_v2 = vmul.f32 %v3769_v13, %v5141_v16  ;;  %3790 = vtanh.f32 %v1293_v5 }
 0x3fd   : >> { %v3773_v59 = vpop.eup %3772  ;;  %3792 = vrcp.f32 %v1354_v51  ;;  %v1352_v8 = vadd.f32 1.0, %v3771_v21 }
 0x3fe   : >> { %v3775_v32 = vpop.eup %3774  ;;  %v5181_v26 = vadd.f32 %v1633_v2, %v1629_v19  ;;  %3794 = vtanh.f32 %v1285_v11 }
 0x3ff   : >> { %v3777_v49 = vpop.eup %3776  ;;  %3796 = vrcp.f32 %v1352_v8  ;;  %v1618_v46 = vadd.f32 1.0, %v3775_v32 }
 0x400   : >> { %v3779_v9 = vpop.eup %3778  ;;  %3798 = vtanh.f32 %v5181_v26  ;;  %v1616_v16 = vadd.f32 1.0, %v3777_v49 }
 0x401   : >> { %v3781_v22 = vpop.eup %3780  ;;  %3800 = vrcp.f32 %v1618_v46  ;;  %v1393_v15 = vmul.f32 %v4262_v27, %v3779_v9 }
 0x402   : >> { %v3783_v18 = vpop.eup %3782  ;;  %3802 = vrcp.f32 %v1616_v16  ;;  %v1619_v53 = vadd.f32 1.0, %v3781_v22 }
 0x403   : >> { %v3785_v58 = vpop.eup %3784  ;;  %3804 = vtanh.f32 %v1296_v61  ;;  %v1391_v51 = vmul.f32 %v4270_v44, %v3783_v18 }
 0x404   : >> { %v3787_v1 = vpop.eup %3786  ;;  %3806 = vrcp.f32 %v1619_v53 }
 0x405   : >> { %v3789_v5 = vpop.eup %3788  ;;  %v1617_v19 = vadd.f32 1.0, %v3787_v1  ;;  %3808 = vtanh.f32 %v1288_v29 }
 0x406   : >> { %v3791_v11 = vpop.eup %3790  ;;  %3810 = vpow2.f32 %v3004_v7 }
 0x407   : >> { %v3793_v13 = vpop.eup %3792  ;;  %3812 = vrcp.f32 %v1617_v19  ;;  %v1397_v4 = vmul.f32 %v3791_v11, %v5157_v54 }
 0x408   : >> { %v3795_v21 = vpop.eup %3794  ;;  %3814 = vpow2.f32 %v3002_v42  ;;  %v1394_v61 = vmul.f32 %v4258_v28, %v3793_v13 }
 0x409   : >> { %v3797_v2 = vpop.eup %3796  ;;  %v5199_v8 = vadd.f32 %v1397_v4, %v1393_v15  ;;  %v1395_v32 = vmul.f32 %v3795_v21, %v5162_v62  ;;  %3816 = vpow2.f32 %v3005_v63 }
 0x40a   : >> { %v3799_v27 = vpop.eup %3798  ;;  %3818 = vpow2.f32 %v3003_v48  ;;  %v1392_v54 = vmul.f32 %v4266_v43, %v3797_v2 }
 0x40b   : >> { %v3801_v57 = vpop.eup %3800  ;;  %v5202_v49 = vadd.f32 %v1395_v32, %v1391_v51  ;;  %3820 = vtanh.f32 %v5199_v8 }
 0x40c   : >> { %v3803_v46 = vpop.eup %3802  ;;  %v1646_v22 = vmul.f32 %v3801_v57, %v3773_v59 }
 0x40d   : >> { %v3805_v44 = vpop.eup %3804  ;;  %3822 = vtanh.f32 %v5202_v49 }
 0x40e   : >> { %v3807_v9 = vpop.eup %3806  ;;  %v1398_v16 = vmul.f32 %v3805_v44, %v5167_v56  ;;  %v1644_v56 = vmul.f32 %v3803_v46, %v3785_v58  ;;  %v5764_v44 = vld [vmem:[#allocation69_spill] sm:$0xff] }
 0x40f   : >> { %v3809_v3 = vpop.eup %3808  ;;  %v1647_v29 = vmul.f32 %v3807_v9, %v3789_v5  ;;  %v5765_v9 = vld [vmem:[#allocation70_spill] sm:$0xff] }
 0x410   : >> { %v3811_v47 = vpop.eup %3810  ;;  %v5208_v62 = vadd.f32 %v1398_v16, %v1394_v61  ;;  %v1396_v18 = vmul.f32 %v3809_v3, %v5171_v33  ;;  %v5763_v61 = vld [vmem:[#allocation68_spill] sm:$0xff]  ;;  %v3059_v16 = vld [vmem:[%s5017_s14 + $0x88] sm:$0xff]  ;;  %v3058_v3 = vld [vmem:[%s5017_s14 + $0x80] sm:$0xff] }
 0x411   : >> { %v3813_v53 = vpop.eup %3812  ;;  %v1381_v28 = vadd.f32 1.0, %v3811_v47  ;;  %v1649_v7 = vpack.c.bf16 %v1647_v29, %v1646_v22  ;;  %v1867_v22 = vunpack.c.l.bf16 %v3059_v16  ;;  %v1865_v29 = vunpack.c.l.bf16 %v3058_v3 }
 0x412   : >> { %v3815_v31 = vpop.eup %3814  ;;  %3824 = vtanh.f32 %v5208_v62  ;;  %v5213_v43 = vadd.f32 %v1396_v18, %v1392_v54  ;;  %v1645_v59 = vmul.f32 %v3813_v53, %v3799_v27  ;;  %v5766_v54 = vld [vmem:[#allocation67_spill] sm:$0xff]  ;;  %v1868_v47 = vunpack.c.h.bf16 %v3059_v16 }
 0x413   : >> { %v3817_v60 = vpop.eup %3816  ;;  %3826 = vrcp.f32 %v1381_v28  ;;  %v1379_v1 = vadd.f32 1.0, %v3815_v31  ;;  %v1866_v18 = vunpack.c.h.bf16 %v3058_v3 }
 0x414   : >> { %v3819_v42 = vpop.eup %3818  ;;  %3828 = vtanh.f32 %v5213_v43  ;;  %v1382_v5 = vadd.f32 1.0, %v3817_v60  ;;  %v1648_v33 = vpack.c.bf16 %v1645_v59, %v1644_v56  ;;  %v3061_v56 = vld [vmem:[%s5017_s14 + $0x98] sm:$0xff] }
 0x415   : >> { %3830 = vrcp.f32 %v1379_v1  ;;  %v1380_v15 = vadd.f32 1.0, %v3819_v42  ;;  %v3821_v58 = vpop.eup %3820  ;;  %v3060_v42 = vld [vmem:[%s5017_s14 + $0x90] sm:$0xff] }
 0x416   : >> { %3832 = vrcp.f32 %v1382_v5  ;;  %3347 = vmatprep.subr.bf16.mxu1 %v1648_v33  ;;  %3371 = vmatprep.subr.bf16.mxu0 %v1648_v33 }
 0x417   : >> { %3834 = vrcp.f32 %v1380_v15  ;;  %3348 = vmatpush3.bf16.msra.mxu1 %v1648_v33  ;;  %3372 = vmatpush3.bf16.msra.mxu0 %v1648_v33  ;;  %v3823_v19 = vpop.eup %3822 }
 0x418   : >> { %3349 = vmatprep.subr.bf16.mxu1 %v1649_v7  ;;  %3373 = vmatprep.subr.bf16.mxu0 %v1649_v7 }
 0x41b   : >> { %3350 = vmatpush3.bf16.msra.mxu1 %v1649_v7  ;;  %3374 = vmatpush3.bf16.msra.mxu0 %v1649_v7 }
 0x41c   : >> { %v3825_v63 = vpop.eup %3824 }
 0x41d   : >> { %v3827_v11 = vpop.eup %3826 }
 0x41e   : >> { %v3829_v48 = vpop.eup %3828  ;;  %3376 = vmatmul.mubr.msk.bf16.vlgmr.msra.gmra.mrb[32].mxu0 %vm907_vm2, %v4968_v35  ;;  %v1409_v21 = vmul.f32 %v3827_v11, %v3821_v58  ;;  %v1871_v58 = vunpack.c.l.bf16 %v3061_v56  ;;  %v1872_v11 = vunpack.c.h.bf16 %v3061_v56 }
 0x41f   : >> { %v3831_v13 = vpop.eup %3830  ;;  %3379 = vmatprep.mubr.msk.bf16.mxu0 %vm907_vm2, %v4972_v36 }
 0x420   : >> { %v3833_v51 = vpop.eup %3832  ;;  %v1407_v32 = vmul.f32 %v3831_v13, %v3823_v19  ;;  %v1870_v13 = vunpack.c.h.bf16 %v3060_v42 }
 0x421   : >> { %v3835_v4 = vpop.eup %3834  ;;  %v1410_v2 = vmul.f32 %v3833_v51, %v3825_v63  ;;  %v1869_v63 = vunpack.c.l.bf16 %v3060_v42 }
 0x422   : >> { %v1408_v27 = vmul.f32 %v3835_v4, %v3829_v48 }
 0x423   : >> { %v1653_v57 = vpack.c.bf16 %v1410_v2, %v1409_v21 }
 0x424   : >> { %v1652_v46 = vpack.c.bf16 %v1408_v27, %v1407_v32 }
 0x426   : >> { %3351 = vmatprep.subr.bf16.mxu1 %v1652_v46  ;;  %3380 = vmatmul.mubr.msk.bf16.gmra.mrb[36].mxu0 %vm907_vm2, %v4980_v37 }
 0x427   : >> { %3352 = vmatpush3.bf16.msra.mxu1 %v1652_v46  ;;  %3383 = vmatprep.mubr.msk.bf16.mxu0 %vm907_vm2, %v4984_v38 }
 0x428   : >> { %3353 = vmatprep.subr.bf16.mxu1 %v1653_v57 }
 0x42b   : >> { %3354 = vmatpush3.bf16.msra.mxu1 %v1653_v57 }
 0x42e   : >> { %3356 = vmatmul.mubr.msk.bf16.vlgmr.msra.gmra.mrb[16].mxu1 %vm1193_vm3, %v5053_v0  ;;  %3384 = vmatmul.mubr.msk.bf16.gmra.mrb[40].mxu0 %vm907_vm2, %v4992_v39 }
 0x42f   : >> { %3359 = vmatprep.mubr.msk.bf16.mxu1 %vm1193_vm3, %v5057_v45  ;;  %3387 = vmatprep.mubr.msk.bf16.mxu0 %vm907_vm2, %v4996_v40 }
 0x436   : >> { %3360 = vmatmul.mubr.msk.bf16.gmra.mrb[20].mxu1 %vm1193_vm3, %v5069_v6  ;;  %3388 = vmatmul.mubr.msk.bf16.gmra.mrb[44].mxu0 %vm907_vm2, %v5004_v41 }
 0x437   : >> { %3363 = vmatprep.mubr.msk.bf16.mxu1 %vm1193_vm3, %v5073_v30  ;;  %3419 = vmatprep.mubr.msk.bf16.mxu0 %vm907_vm2, %v4962_v34 }
 0x43e   : >> { %3364 = vmatmul.mubr.msk.bf16.gmra.mrb[24].mxu1 %vm1193_vm3, %v5763_v61 }
 0x43f   : >> { %3367 = vmatprep.mubr.msk.bf16.mxu1 %vm1193_vm3, %v5764_v44 }
 0x446   : >> { %3368 = vmatmul.mubr.msk.bf16.gmra.mrb[28].mxu1 %vm1193_vm3, %v5765_v9 }
 0x447   : >> { %3399 = vmatprep.mubr.msk.bf16.mxu1 %vm1193_vm3, %v5766_v54 }
 0x4f1   : >> { %v3377_v34 = vpop.f32.mrb[32].mxu0 }
 0x4f2   : >> { %v1980_v53 = vadd.f32 %v3377_v34, %v1867_v22  ;;  %v1915_v28 = vpop.f32.mrb[33].mxu0 }
 0x4f3   : >> { %v1978_v7 = vadd.f32 %v1915_v28, %v1865_v29  ;;  %v3378_v31 = vpop.f32.mrb[34].mxu0 }
 0x4f4   : >> { %v3076_v59 = vmul.f32 -1.442695, %v1980_v53  ;;  %v1981_v60 = vadd.f32 %v3378_v31, %v1868_v47  ;;  %v1918_v1 = vpop.f32.mrb[35].mxu0  ;;  %v5767_v31 = vld [vmem:[#allocation57_spill] sm:$0xff] }
 0x4f5   : >> { %v3074_v5 = vmul.f32 -1.442695, %v1978_v7  ;;  %v1979_v33 = vadd.f32 %v1918_v1, %v1866_v18 }
 0x4f6   : >> { %3836 = vpow2.f32 %v3076_v59  ;;  %v3077_v15 = vmul.f32 -1.442695, %v1981_v60 }
 0x4f7   : >> { %3838 = vpow2.f32 %v3074_v5  ;;  %v3075_v19 = vmul.f32 -1.442695, %v1979_v33  ;;  %v5768_v33 = vld [vmem:[#allocation55_spill] sm:$0xff] }
 0x4f8   : >> { %3840 = vpow2.f32 %v3077_v15 }
 0x4f9   : >> { %3842 = vpow2.f32 %v3075_v19  ;;  %v3381_v48 = vpop.f32.mrb[36].mxu0 }
 0x4fa   : >> { %v1984_v51 = vadd.f32 %v3381_v48, %v1871_v58  ;;  %v1931_v4 = vpop.f32.mrb[37].mxu0  ;;  %v5769_v48 = vld [vmem:[#allocation56_spill] sm:$0xff] }
 0x4fb   : >> { %v1982_v21 = vadd.f32 %v1931_v4, %v1869_v63  ;;  %v3382_v2 = vpop.f32.mrb[38].mxu0  ;;  %v5258_v4 = vld [vmem:[%s5017_s14 + $0xa8] sm:$0xff] }
 0x4fc   : >> { %v3080_v32 = vmul.f32 -1.442695, %v1984_v51  ;;  %v1985_v27 = vadd.f32 %v3382_v2, %v1872_v11  ;;  %v1934_v57 = vpop.f32.mrb[39].mxu0 }
 0x4fd   : >> { %v3078_v46 = vmul.f32 -1.442695, %v1982_v21  ;;  %v1983_v16 = vadd.f32 %v1934_v57, %v1870_v13 }
 0x4fe   : >> { %3844 = vpow2.f32 %v3080_v32  ;;  %v3081_v3 = vmul.f32 -1.442695, %v1985_v27  ;;  %v5770_v32 = vld [vmem:[#allocation54_spill] sm:$0xff] }
 0x4ff   : >> { %3846 = vpow2.f32 %v3078_v46  ;;  %v3079_v22 = vmul.f32 -1.442695, %v1983_v16  ;;  %v1875_v16 = vunpack.c.l.bf16 %v5258_v4 }
 0x500   : >> { %v3837_v29 = vpop.eup %3836  ;;  %3848 = vpow2.f32 %v3081_v3  ;;  %v5265_v3 = vld [vmem:[%s5017_s14 + $0xa0] sm:$0xff] }
 0x501   : >> { %v3839_v47 = vpop.eup %3838  ;;  %v2008_v34 = vadd.f32 1.0, %v3837_v29  ;;  %3850 = vpow2.f32 %v3079_v22  ;;  %v3357_v18 = vpop.f32.mrb[16].mxu1 }
 0x502   : >> { %v3385_v53 = vpop.f32.mrb[40].mxu0  ;;  %v3841_v28 = vpop.eup %3840  ;;  %v2006_v7 = vadd.f32 1.0, %v3839_v47  ;;  %v1703_v56 = vadd.f32 %v3357_v18, %v5767_v31  ;;  %v5771_v31 = vld [vmem:[#allocation61_spill] sm:$0xff] }
 0x503   : >> { %v1694_v60 = vpop.f32.mrb[17].mxu1  ;;  %v1947_v1 = vpop.f32.mrb[41].mxu0  ;;  %3852 = vrcp.f32 %v2008_v34  ;;  %v2009_v5 = vadd.f32 1.0, %v3841_v28 }
 0x504   : >> { %v3843_v42 = vpop.eup %3842  ;;  %v1695_v15 = vadd.f32 %v1694_v60, %v5768_v33  ;;  %v3358_v58 = vpop.f32.mrb[18].mxu1  ;;  %3854 = vrcp.f32 %v2006_v7  ;;  %v3046_v11 = vmul.f32 -1.442695, %v1703_v56 }
 0x505   : >> { %v5254_v19 = vpop.f32.mrb[42].mxu0  ;;  %v2007_v63 = vadd.f32 1.0, %v3843_v42  ;;  %v1706_v13 = vadd.f32 %v3358_v58, %v5769_v48  ;;  %v1697_v51 = vpop.f32.mrb[19].mxu1  ;;  %3856 = vrcp.f32 %v2009_v5  ;;  %v1873_v42 = vunpack.c.l.bf16 %v5265_v3 }
 0x506   : >> { %v5260_v21 = vpop.f32.mrb[43].mxu0  ;;  %v3044_v2 = vmul.f32 -1.442695, %v1695_v15  ;;  %v1698_v27 = vadd.f32 %v1697_v51, %v5770_v32 }
 0x507   : >> { %3858 = vrcp.f32 %v2007_v63  ;;  %v3047_v57 = vmul.f32 -1.442695, %v1706_v13  ;;  %v1988_v63 = vadd.f32 %v3385_v53, %v1875_v16  ;;  %v1986_v53 = vadd.f32 %v1947_v1, %v1873_v42  ;;  %v3064_v16 = vld [vmem:[%s5017_s14 + $0xb0] sm:$0xff] }
 0x508   : >> { %3860 = vpow2.f32 %v3046_v11  ;;  %v3045_v46 = vmul.f32 -1.442695, %v1698_v27  ;;  %v3845_v22 = vpop.eup %3844  ;;  %v5772_v11 = vld [vmem:[#allocation59_spill] sm:$0xff]  ;;  %v1874_v42 = vunpack.c.h.bf16 %v5265_v3  ;;  %v1878_v44 = vunpack.c.h.bf16 %v3064_v16 }
 0x509   : >> { %3862 = vpow2.f32 %v3044_v2  ;;  %v3847_v29 = vpop.eup %3846  ;;  %v2032_v47 = vadd.f32 1.0, %v3845_v22  ;;  %v3361_v34 = vpop.f32.mrb[20].mxu1 }
 0x50a   : >> { %3864 = vpow2.f32 %v3047_v57  ;;  %v3389_v18 = vpop.f32.mrb[44].mxu0  ;;  %v3849_v28 = vpop.eup %3848  ;;  %v2030_v7 = vadd.f32 1.0, %v3847_v29  ;;  %v1719_v56 = vadd.f32 %v3361_v34, %v5771_v31  ;;  %v3065_v34 = vld [vmem:[%s5017_s14 + $0xb8] sm:$0xff] }
 0x50b   : >> { %3866 = vpow2.f32 %v3045_v46  ;;  %v1710_v60 = vpop.f32.mrb[21].mxu1  ;;  %v1963_v5 = vpop.f32.mrb[45].mxu0  ;;  %v2033_v58 = vadd.f32 1.0, %v3849_v28  ;;  %v5773_v46 = vld [vmem:[#allocation60_spill] sm:$0xff] }
 0x50c   : >> { %v3851_v15 = vpop.eup %3850  ;;  %3868 = vrcp.f32 %v2032_v47  ;;  %v1711_v13 = vadd.f32 %v1710_v60, %v5772_v11  ;;  %v3362_v51 = vpop.f32.mrb[22].mxu1  ;;  %v3050_v57 = vmul.f32 -1.442695, %v1719_v56  ;;  %v5774_v11 = vld [vmem:[#allocation58_spill] sm:$0xff] }
 0x50d   : >> { %v5270_v2 = vpop.f32.mrb[46].mxu0  ;;  %3870 = vrcp.f32 %v2030_v7  ;;  %v2031_v27 = vadd.f32 1.0, %v3851_v15  ;;  %v1722_v22 = vadd.f32 %v3362_v51, %v5773_v46  ;;  %v1713_v29 = vpop.f32.mrb[23].mxu1  ;;  %v1879_v15 = vunpack.c.l.bf16 %v3065_v34 }
 0x50e   : >> { %v5274_v31 = vpop.f32.mrb[47].mxu0  ;;  %v3853_v32 = vpop.eup %3852  ;;  %3872 = vrcp.f32 %v2033_v58  ;;  %v3048_v47 = vmul.f32 -1.442695, %v1711_v13  ;;  %v1876_v51 = vunpack.c.h.bf16 %v5258_v4  ;;  %v1714_v58 = vadd.f32 %v1713_v29, %v5774_v11 }
 0x50f   : >> { %v5276_v28 = vpop.eup %3854  ;;  %3874 = vrcp.f32 %v2031_v27  ;;  %v3051_v7 = vmul.f32 -1.442695, %v1722_v22  ;;  %v1877_v13 = vunpack.c.l.bf16 %v3064_v16  ;;  %v1991_v16 = vadd.f32 %v5274_v31, %v1878_v44 }
 0x510   : >> { %v5279_v60 = vpop.eup %3856  ;;  %3876 = vpow2.f32 %v3050_v57  ;;  %v1989_v29 = vadd.f32 %v5254_v19, %v1876_v51 }
 0x511   : >> { %v5281_v56 = vpop.eup %3858  ;;  %3878 = vtanh.f32 %v1988_v63  ;;  %v5285_v48 = vpop.f32.mrb[24].mxu1  ;;  %v1992_v63 = vadd.f32 %v3389_v18, %v1879_v15  ;;  %v1990_v3 = vadd.f32 %v1963_v5, %v1877_v13 }
 0x512   : >> { %v3861_v46 = vpop.eup %3860  ;;  %3880 = vpow2.f32 %v3048_v47  ;;  %v5288_v57 = vpop.f32.mrb[25].mxu1 }
 0x513   : >> { %v3863_v27 = vpop.eup %3862  ;;  %v1771_v1 = vadd.f32 1.0, %v3861_v46  ;;  %3882 = vtanh.f32 %v1986_v53  ;;  %v5290_v59 = vpop.f32.mrb[26].mxu1  ;;  %v3049_v53 = vmul.f32 -1.442695, %v1714_v58  ;;  %v3084_v15 = vmul.f32 -1.442695, %v1992_v63 }
 0x514   : >> { %v3865_v22 = vpop.eup %3864  ;;  %v1769_v33 = vadd.f32 1.0, %v3863_v27  ;;  %3884 = vpow2.f32 %v3051_v7  ;;  %v5293_v11 = vpop.f32.mrb[27].mxu1  ;;  %v1987_v27 = vadd.f32 %v5260_v21, %v1874_v42  ;;  %v1880_v7 = vunpack.c.h.bf16 %v3065_v34 }
 0x515   : >> { %v3867_v4 = vpop.eup %3866  ;;  %3886 = vrcp.f32 %v1771_v1  ;;  %v1772_v47 = vadd.f32 1.0, %v3865_v22  ;;  %v3082_v51 = vmul.f32 -1.442695, %v1990_v3 }
 0x516   : >> { %v3869_v54 = vpop.eup %3868  ;;  %3888 = vrcp.f32 %v1769_v33  ;;  %v1770_v46 = vadd.f32 1.0, %v3867_v4  ;;  %v1993_v5 = vadd.f32 %v5270_v2, %v1880_v7 }
 0x517   : >> { %v3871_v9 = vpop.eup %3870  ;;  %3890 = vrcp.f32 %v1772_v47  ;;  %v2072_v19 = vmul.f32 %v3869_v54, %v5155_v10 }
 0x518   : >> { %v3873_v18 = vpop.eup %3872  ;;  %3892 = vrcp.f32 %v1770_v46  ;;  %v2070_v34 = vmul.f32 %v3871_v9, %v5164_v55  ;;  %v3085_v55 = vmul.f32 -1.442695, %v1993_v5 }
 0x519   : >> { %v3875_v1 = vpop.eup %3874  ;;  %3894 = vtanh.f32 %v1989_v29  ;;  %v3369_v33 = vpop.f32.mrb[28].mxu1  ;;  %v2073_v7 = vmul.f32 %v3873_v18, %v5174_v23 }
 0x51a   : >> { %v3877_v22 = vpop.eup %3876  ;;  %3896 = vpow2.f32 %v3049_v53  ;;  %v1742_v13 = vpop.f32.mrb[29].mxu1  ;;  %v1751_v18 = vadd.f32 %v3369_v33, %v4826_v20 }
 0x51b   : >> { %v3879_v4 = vpop.eup %3878  ;;  %v1795_v58 = vadd.f32 1.0, %v3877_v22  ;;  %3898 = vtanh.f32 %v1987_v27  ;;  %v3370_v63 = vpop.f32.mrb[30].mxu1  ;;  %v1735_v27 = vadd.f32 %v5285_v48, %v4818_v25 }
 0x51c   : >> { %v3881_v21 = vpop.eup %3880  ;;  %v2076_v42 = vmul.f32 %v3879_v4, %v3853_v32  ;;  %3900 = vpow2.f32 %v3084_v15  ;;  %v1745_v54 = vpop.f32.mrb[31].mxu1  ;;  %v3083_v32 = vmul.f32 -1.442695, %v1991_v16  ;;  %v1727_v15 = vadd.f32 %v5288_v57, %v4814_v17 }
 0x51d   : >> { %v3883_v47 = vpop.eup %3882  ;;  %3902 = vrcp.f32 %v1795_v58  ;;  %v1793_v10 = vadd.f32 1.0, %v3881_v21 }
 0x51e   : >> { %v3885_v29 = vpop.eup %3884  ;;  %v5300_v46 = vadd.f32 %v2076_v42, %v2072_v19  ;;  %v2074_v53 = vmul.f32 %v3883_v47, %v5276_v28  ;;  %3904 = vpow2.f32 %v3082_v51  ;;  %v2071_v51 = vmul.f32 %v3875_v1, %v5181_v26 }
 0x51f   : >> { %v5303_v2 = vpop.eup %3886  ;;  %3906 = vrcp.f32 %v1793_v10  ;;  %v1796_v3 = vadd.f32 1.0, %v3885_v29  ;;  %v1743_v42 = vadd.f32 %v1742_v13, %v5758_v52  ;;  %v1738_v1 = vadd.f32 %v5290_v59, %v4816_v24 }
 0x520   : >> { %v5305_v9 = vpop.eup %3888  ;;  %3908 = vtanh.f32 %v5300_v46  ;;  %v5308_v44 = vadd.f32 %v2074_v53, %v2070_v34  ;;  %v3054_v10 = vmul.f32 -1.442695, %v1751_v18  ;;  %v1754_v13 = vadd.f32 %v3370_v63, %v5760_v50 }
 0x521   : >> { %v5310_v31 = vpop.eup %3890  ;;  %3910 = vrcp.f32 %v1796_v3  ;;  %v3052_v53 = vmul.f32 -1.442695, %v1743_v42  ;;  %v1746_v3 = vadd.f32 %v1745_v54, %v5762_v12 }
 0x522   : >> { %v5314_v28 = vpop.eup %3892  ;;  %3912 = vtanh.f32 %v5308_v44 }
 0x523   : >> { %v3895_v22 = vpop.eup %3894  ;;  %3914 = vpow2.f32 %v3085_v55  ;;  %v3053_v63 = vmul.f32 -1.442695, %v1746_v3 }
 0x524   : >> { %v3897_v19 = vpop.eup %3896  ;;  %v2077_v4 = vmul.f32 %v3895_v22, %v5279_v60  ;;  %3916 = vpow2.f32 %v3083_v32 }
 0x525   : >> { %v3899_v58 = vpop.eup %3898  ;;  %v1794_v5 = vadd.f32 1.0, %v3897_v19  ;;  %3918 = vtanh.f32 %v1735_v27 }
 0x526   : >> { %v3901_v48 = vpop.eup %3900  ;;  %v5322_v21 = vadd.f32 %v2077_v4, %v2073_v7  ;;  %v2075_v23 = vmul.f32 %v3899_v58, %v5281_v56  ;;  %3920 = vtanh.f32 %v1727_v15  ;;  %v1730_v56 = vadd.f32 %v5293_v11, %v5759_v14 }
 0x527   : >> { %v3903_v57 = vpop.eup %3902  ;;  %3922 = vrcp.f32 %v1794_v5  ;;  %v2060_v34 = vadd.f32 1.0, %v3901_v48  ;;  %v3055_v11 = vmul.f32 -1.442695, %v1754_v13 }
 0x528   : >> { %v3905_v26 = vpop.eup %3904  ;;  %3924 = vtanh.f32 %v5322_v21  ;;  %v5328_v60 = vadd.f32 %v2075_v23, %v2071_v51  ;;  %v1835_v27 = vmul.f32 %v3903_v57, %v5199_v8 }
 0x529   : >> { %v3907_v16 = vpop.eup %3906  ;;  %3926 = vrcp.f32 %v2060_v34  ;;  %v2058_v47 = vadd.f32 1.0, %v3905_v26 }
 0x52a   : >> { %v3909_v33 = vpop.eup %3908  ;;  %3928 = vtanh.f32 %v5328_v60  ;;  %v1833_v22 = vmul.f32 %v3907_v16, %v5202_v49 }
 0x52b   : >> { %v3911_v29 = vpop.eup %3910  ;;  %3930 = vrcp.f32 %v2058_v47 }
 0x52c   : >> { %v3913_v55 = vpop.eup %3912  ;;  %3932 = vtanh.f32 %v1738_v1  ;;  %v1836_v57 = vmul.f32 %v3911_v29, %v5208_v62 }
 0x52d   : >> { %v3915_v59 = vpop.eup %3914  ;;  %3934 = vtanh.f32 %v1730_v56 }
 0x52e   : >> { %v3917_v32 = vpop.eup %3916  ;;  %v2061_v7 = vadd.f32 1.0, %v3915_v59  ;;  %3936 = vpow2.f32 %v3054_v10 }
 0x52f   : >> { %v3919_v15 = vpop.eup %3918  ;;  %v2059_v19 = vadd.f32 1.0, %v3917_v32  ;;  %3938 = vpow2.f32 %v3052_v53 }
 0x530   : >> { %v3921_v51 = vpop.eup %3920  ;;  %3940 = vrcp.f32 %v2061_v7  ;;  %v1839_v54 = vmul.f32 %v3919_v15, %v5303_v2 }
 0x531   : >> { %v3923_v4 = vpop.eup %3922  ;;  %3942 = vrcp.f32 %v2059_v19  ;;  %v1837_v58 = vmul.f32 %v3921_v51, %v5305_v9 }
 0x532   : >> { %v3925_v5 = vpop.eup %3924  ;;  %v5341_v48 = vadd.f32 %v1839_v54, %v1835_v27  ;;  %3944 = vpow2.f32 %v3055_v11  ;;  %v1834_v42 = vmul.f32 %v3923_v4, %v5213_v43 }
 0x533   : >> { %v3927_v8 = vpop.eup %3926  ;;  %v5343_v23 = vadd.f32 %v1837_v58, %v1833_v22  ;;  %3946 = vpow2.f32 %v3053_v63 }
 0x534   : >> { %v3929_v49 = vpop.eup %3928  ;;  %3948 = vtanh.f32 %v5341_v48  ;;  %v2088_v43 = vmul.f32 %v3927_v8, %v3909_v33 }
 0x535   : >> { %v3931_v18 = vpop.eup %3930  ;;  %3950 = vtanh.f32 %v5343_v23 }
 0x536   : >> { %v3933_v34 = vpop.eup %3932 }
 0x537   : >> { %v3935_v2 = vpop.eup %3934  ;;  %v1840_v26 = vmul.f32 %v3933_v34, %v5310_v31 }
 0x538   : >> { %v3937_v1 = vpop.eup %3936  ;;  %v1838_v9 = vmul.f32 %v3935_v2, %v5314_v28  ;;  %v2086_v28 = vmul.f32 %v3931_v18, %v3913_v55 }
 0x539   : >> { %v3939_v16 = vpop.eup %3938  ;;  %v5350_v47 = vadd.f32 %v1840_v26, %v1836_v57  ;;  %v1823_v56 = vadd.f32 1.0, %v3937_v1 }
 0x53a   : >> { %v3941_v10 = vpop.eup %3940  ;;  %v5353_v13 = vadd.f32 %v1838_v9, %v1834_v42  ;;  %v1821_v62 = vadd.f32 1.0, %v3939_v16  ;;  %v3111_v16 = vld [vmem:[%s5017_s14 + $0xd8] sm:$0xff] }
 0x53b   : >> { %v3943_v29 = vpop.eup %3942  ;;  %3952 = vtanh.f32 %v5350_v47  ;;  %v2089_v31 = vmul.f32 %v3941_v10, %v3925_v5 }
 0x53c   : >> { %v3945_v53 = vpop.eup %3944  ;;  %3954 = vtanh.f32 %v5353_v13  ;;  %v2087_v3 = vmul.f32 %v3943_v29, %v3929_v49  ;;  %v3110_v29 = vld [vmem:[%s5017_s14 + $0xd0] sm:$0xff] }
 0x53d   : >> { %v3947_v59 = vpop.eup %3946  ;;  %3956 = vrcp.f32 %v1823_v56  ;;  %v1824_v32 = vadd.f32 1.0, %v3945_v53  ;;  %v2091_v27 = vpack.c.bf16 %v2089_v31, %v2088_v43 }
 0x53e   : >> { %3958 = vrcp.f32 %v1821_v62  ;;  %v1822_v7 = vadd.f32 1.0, %v3947_v59  ;;  %v2090_v11 = vpack.c.bf16 %v2087_v3, %v2086_v28  ;;  %v3949_v33 = vpop.eup %3948  ;;  %v2313_v28 = vunpack.c.l.bf16 %v3111_v16 }
 0x53f   : >> { %3960 = vrcp.f32 %v1824_v32  ;;  %v3951_v15 = vpop.eup %3950  ;;  %v2311_v59 = vunpack.c.l.bf16 %v3110_v29  ;;  %v2314_v32 = vunpack.c.h.bf16 %v3111_v16 }
 0x540   : >> { %3962 = vrcp.f32 %v1822_v7  ;;  %3391 = vmatprep.subr.bf16.mxu1 %v2090_v11  ;;  %3415 = vmatprep.subr.bf16.mxu0 %v2090_v11  ;;  %v2312_v7 = vunpack.c.h.bf16 %v3110_v29 }
 0x541   : >> { %3392 = vmatpush3.bf16.msra.mxu1 %v2090_v11  ;;  %3416 = vmatpush3.bf16.msra.mxu0 %v2090_v11 }
 0x542   : >> { %3393 = vmatprep.subr.bf16.mxu1 %v2091_v27  ;;  %3417 = vmatprep.subr.bf16.mxu0 %v2091_v27 }
 0x545   : >> { %v3953_v22 = vpop.eup %3952  ;;  %3394 = vmatpush3.bf16.msra.mxu1 %v2091_v27  ;;  %3418 = vmatpush3.bf16.msra.mxu0 %v2091_v27 }
 0x546   : >> { %v3955_v55 = vpop.eup %3954 }
 0x547   : >> { %v3957_v19 = vpop.eup %3956 }
 0x548   : >> { %v3959_v63 = vpop.eup %3958  ;;  %3420 = vmatmul.mubr.msk.bf16.vlgmr.msra.gmra.mrb[48].mxu0 %vm907_vm2, %v4968_v35  ;;  %v1851_v4 = vmul.f32 %v3957_v19, %v3949_v33  ;;  %v5775_v35 = vld [vmem:[#allocation69_spill] sm:$0xff] }
 0x549   : >> { %v3961_v51 = vpop.eup %3960  ;;  %3423 = vmatprep.mubr.msk.bf16.mxu0 %vm907_vm2, %v4972_v36  ;;  %v1849_v5 = vmul.f32 %v3959_v63, %v3951_v15  ;;  %v5776_v36 = vld [vmem:[#allocation70_spill] sm:$0xff] }
 0x54a   : >> { %v3963_v54 = vpop.eup %3962  ;;  %v1852_v58 = vmul.f32 %v3961_v51, %v3953_v22 }
 0x54b   : >> { %v1850_v8 = vmul.f32 %v3963_v54, %v3955_v55 }
 0x54c   : >> { %v2095_v49 = vpack.c.bf16 %v1852_v58, %v1851_v4 }
 0x54d   : >> { %v2094_v18 = vpack.c.bf16 %v1850_v8, %v1849_v5 }
 0x54f   : >> { %3395 = vmatprep.subr.bf16.mxu1 %v2094_v18 }
 0x550   : >> { %3396 = vmatpush3.bf16.msra.mxu1 %v2094_v18  ;;  %3424 = vmatmul.mubr.msk.bf16.gmra.mrb[52].mxu0 %vm907_vm2, %v4980_v37  ;;  %v5777_v37 = vld [vmem:[#allocation67_spill] sm:$0xff] }
 0x551   : >> { %3397 = vmatprep.subr.bf16.mxu1 %v2095_v49  ;;  %3427 = vmatprep.mubr.msk.bf16.mxu0 %vm907_vm2, %v4984_v38  ;;  %v3109_v38 = vld [vmem:[%s5017_s14 + $0xc8] sm:$0xff] }
 0x552   : >> { %v2310_v34 = vunpack.c.h.bf16 %v3109_v38 }
 0x554   : >> { %3398 = vmatpush3.bf16.msra.mxu1 %v2095_v49 }
 0x557   : >> { %3400 = vmatmul.mubr.msk.bf16.vlgmr.msra.gmra.mrb[32].mxu1 %vm1193_vm3, %v5053_v0 }
 0x558   : >> { %3403 = vmatprep.mubr.msk.bf16.mxu1 %vm1193_vm3, %v5057_v45  ;;  %3428 = vmatmul.mubr.msk.bf16.gmra.mrb[56].mxu0 %vm907_vm2, %v4992_v39  ;;  %v3108_v39 = vld [vmem:[%s5017_s14 + $0xc0] sm:$0xff] }
 0x559   : >> { %3431 = vmatprep.mubr.msk.bf16.mxu0 %vm907_vm2, %v4996_v40  ;;  %v2309_v40 = vunpack.c.l.bf16 %v3109_v38  ;;  %v2307_v57 = vunpack.c.l.bf16 %v3108_v39  ;;  %v2308_v42 = vunpack.c.h.bf16 %v3108_v39 }
 0x55f   : >> { %3404 = vmatmul.mubr.msk.bf16.gmra.mrb[36].mxu1 %vm1193_vm3, %v5069_v6 }
 0x560   : >> { %3407 = vmatprep.mubr.msk.bf16.mxu1 %vm1193_vm3, %v5073_v30  ;;  %3432 = vmatmul.mubr.msk.bf16.gmra.mrb[60].mxu0 %vm907_vm2, %v5004_v41 }
 0x567   : >> { %3408 = vmatmul.mubr.msk.bf16.gmra.mrb[40].mxu1 %vm1193_vm3, %v5763_v61 }
 0x568   : >> { %3411 = vmatprep.mubr.msk.bf16.mxu1 %vm1193_vm3, %v5775_v35 }
 0x56f   : >> { %3412 = vmatmul.mubr.msk.bf16.gmra.mrb[44].mxu1 %vm1193_vm3, %v5776_v36 }
 0x570   : >> { %3443 = vmatprep.mubr.msk.bf16.mxu1 %vm1193_vm3, %v5777_v37  ;;  %v5778_v37 = vld [vmem:[#allocation57_spill] sm:$0xff] }
 0x61b   : >> { %v3421_v41 = vpop.f32.mrb[48].mxu0 }
 0x61c   : >> { %v2422_v2 = vadd.f32 %v3421_v41, %v2309_v40  ;;  %v2357_v26 = vpop.f32.mrb[49].mxu0  ;;  %v5779_v41 = vld [vmem:[#allocation55_spill] sm:$0xff] }
 0x61d   : >> { %v2420_v1 = vadd.f32 %v2357_v26, %v2307_v57  ;;  %v3422_v9 = vpop.f32.mrb[50].mxu0 }
 0x61e   : >> { %v3126_v56 = vmul.f32 -1.442695, %v2422_v2  ;;  %v2423_v10 = vadd.f32 %v3422_v9, %v2310_v34  ;;  %v2360_v62 = vpop.f32.mrb[51].mxu0 }
 0x61f   : >> { %v3124_v43 = vmul.f32 -1.442695, %v2420_v1  ;;  %v2421_v31 = vadd.f32 %v2360_v62, %v2308_v42 }
 0x620   : >> { %3964 = vpow2.f32 %v3126_v56  ;;  %v3127_v53 = vmul.f32 -1.442695, %v2423_v10  ;;  %v5780_v56 = vld [vmem:[#allocation56_spill] sm:$0xff] }
 0x621   : >> { %3966 = vpow2.f32 %v3124_v43  ;;  %v3125_v3 = vmul.f32 -1.442695, %v2421_v31  ;;  %v5781_v10 = vmov %v5780_v56 }
 0x622   : >> { %3968 = vpow2.f32 %v3127_v53 }
 0x623   : >> { %3970 = vpow2.f32 %v3125_v3  ;;  %v3425_v27 = vpop.f32.mrb[52].mxu0 }
 0x624   : >> { %v2426_v11 = vadd.f32 %v3425_v27, %v2313_v28  ;;  %v2373_v33 = vpop.f32.mrb[53].mxu0  ;;  %v5782_v28 = vld [vmem:[#allocation54_spill] sm:$0xff] }
 0x625   : >> { %v2424_v15 = vadd.f32 %v2373_v33, %v2311_v59  ;;  %v3426_v22 = vpop.f32.mrb[54].mxu0  ;;  %v5783_v3 = vmov %v5782_v28 }
 0x626   : >> { %v3130_v55 = vmul.f32 -1.442695, %v2426_v11  ;;  %v2427_v19 = vadd.f32 %v3426_v22, %v2314_v32  ;;  %v2376_v63 = vpop.f32.mrb[55].mxu0  ;;  %v5402_v11 = vld [vmem:[%s5017_s14 + $0xe8] sm:$0xff] }
 0x627   : >> { %v3128_v51 = vmul.f32 -1.442695, %v2424_v15  ;;  %v2425_v54 = vadd.f32 %v2376_v63, %v2312_v7 }
 0x628   : >> { %3972 = vpow2.f32 %v3130_v55  ;;  %v3131_v4 = vmul.f32 -1.442695, %v2427_v19  ;;  %v5784_v19 = vld [vmem:[#allocation61_spill] sm:$0xff] }
 0x629   : >> { %3974 = vpow2.f32 %v3128_v51  ;;  %v3129_v58 = vmul.f32 -1.442695, %v2425_v54 }
 0x62a   : >> { %v3965_v5 = vpop.eup %3964  ;;  %3976 = vpow2.f32 %v3131_v4  ;;  %v3401_v8 = vpop.f32.mrb[32].mxu1 }
 0x62b   : >> { %v3967_v49 = vpop.eup %3966  ;;  %v2450_v18 = vadd.f32 1.0, %v3965_v5  ;;  %3978 = vpow2.f32 %v3129_v58  ;;  %v2145_v38 = vadd.f32 %v3401_v8, %v5778_v37  ;;  %v2136_v39 = vpop.f32.mrb[33].mxu1  ;;  %v5785_v5 = vld [vmem:[#allocation59_spill] sm:$0xff] }
 0x62c   : >> { %v3429_v40 = vpop.f32.mrb[56].mxu0  ;;  %v3969_v57 = vpop.eup %3968  ;;  %v2448_v34 = vadd.f32 1.0, %v3967_v49  ;;  %v2137_v42 = vadd.f32 %v2136_v39, %v5779_v41 }
 0x62d   : >> { %v3402_v2 = vpop.f32.mrb[34].mxu1  ;;  %v5393_v26 = vpop.f32.mrb[57].mxu0  ;;  %3980 = vrcp.f32 %v2450_v18  ;;  %v2451_v9 = vadd.f32 1.0, %v3969_v57  ;;  %v3096_v16 = vmul.f32 -1.442695, %v2145_v38  ;;  %v2317_v18 = vunpack.c.l.bf16 %v5402_v11 }
 0x62e   : >> { %v3971_v1 = vpop.eup %3970  ;;  %v2148_v62 = vadd.f32 %v3402_v2, %v5780_v56  ;;  %v2139_v29 = vpop.f32.mrb[35].mxu1  ;;  %3982 = vrcp.f32 %v2448_v34  ;;  %v3094_v53 = vmul.f32 -1.442695, %v2137_v42  ;;  %v5786_v42 = vld [vmem:[#allocation60_spill] sm:$0xff] }
 0x62f   : >> { %v5396_v43 = vpop.f32.mrb[58].mxu0  ;;  %v2449_v31 = vadd.f32 1.0, %v3971_v1  ;;  %v2140_v59 = vadd.f32 %v2139_v29, %v5782_v28  ;;  %3984 = vrcp.f32 %v2451_v9 }
 0x630   : >> { %v5399_v32 = vpop.f32.mrb[59].mxu0  ;;  %v3097_v27 = vmul.f32 -1.442695, %v2148_v62  ;;  %v5787_v62 = vld [vmem:[#allocation58_spill] sm:$0xff] }
 0x631   : >> { %3986 = vrcp.f32 %v2449_v31  ;;  %v3095_v7 = vmul.f32 -1.442695, %v2140_v59  ;;  %v3115_v31 = vld [vmem:[%s5017_s14 + $0xf8] sm:$0xff] }
 0x632   : >> { %3988 = vpow2.f32 %v3096_v16  ;;  %v3973_v33 = vpop.eup %3972  ;;  %v3405_v15 = vpop.f32.mrb[36].mxu1 }
 0x633   : >> { %3990 = vpow2.f32 %v3094_v53  ;;  %v3975_v22 = vpop.eup %3974  ;;  %v2474_v55 = vadd.f32 1.0, %v3973_v33  ;;  %v2161_v63 = vadd.f32 %v3405_v15, %v5784_v19  ;;  %v2152_v51 = vpop.f32.mrb[37].mxu1 }
 0x634   : >> { %3992 = vpow2.f32 %v3097_v27  ;;  %v3433_v54 = vpop.f32.mrb[60].mxu0  ;;  %v3977_v4 = vpop.eup %3976  ;;  %v2472_v58 = vadd.f32 1.0, %v3975_v22  ;;  %v2153_v8 = vadd.f32 %v2152_v51, %v5785_v5  ;;  %v3112_v27 = vld [vmem:[%s5017_s14 + $0xe0] sm:$0xff]  ;;  %v2430_v22 = vadd.f32 %v3429_v40, %v2317_v18 }
 0x635   : >> { %3994 = vpow2.f32 %v3095_v7  ;;  %v3406_v49 = vpop.f32.mrb[38].mxu1  ;;  %v5407_v38 = vpop.f32.mrb[61].mxu0  ;;  %v2475_v57 = vadd.f32 1.0, %v3977_v4  ;;  %v3100_v34 = vmul.f32 -1.442695, %v2161_v63  ;;  %v2315_v51 = vunpack.c.l.bf16 %v3112_v27 }
 0x636   : >> { %v3979_v39 = vpop.eup %3978  ;;  %3996 = vrcp.f32 %v2474_v55  ;;  %v2164_v2 = vadd.f32 %v3406_v49, %v5786_v42  ;;  %v2155_v1 = vpop.f32.mrb[39].mxu1  ;;  %v3098_v56 = vmul.f32 -1.442695, %v2153_v8  ;;  %v2321_v55 = vunpack.c.l.bf16 %v3115_v31  ;;  %v3114_v49 = vld [vmem:[%s5017_s14 + $0xf0] sm:$0xff] }
 0x637   : >> { %v3434_v9 = vpop.f32.mrb[62].mxu0  ;;  %3998 = vrcp.f32 %v2472_v58  ;;  %v2473_v16 = vadd.f32 1.0, %v3979_v39  ;;  %v2156_v29 = vadd.f32 %v2155_v1, %v5787_v62  ;;  %v5414_v28 = vpop.eup %3980  ;;  %v2318_v8 = vunpack.c.h.bf16 %v5402_v11 }
 0x638   : >> { %v5412_v53 = vpop.f32.mrb[63].mxu0  ;;  %4000 = vrcp.f32 %v2475_v57  ;;  %v3101_v59 = vmul.f32 -1.442695, %v2164_v2  ;;  %v5417_v7 = vpop.eup %3982  ;;  %v2316_v1 = vunpack.c.h.bf16 %v3112_v27  ;;  %v2428_v11 = vadd.f32 %v5393_v26, %v2315_v51 }
 0x639   : >> { %4002 = vrcp.f32 %v2473_v16  ;;  %v3099_v33 = vmul.f32 -1.442695, %v2156_v29  ;;  %v5419_v15 = vpop.eup %3984  ;;  %v2434_v16 = vadd.f32 %v3433_v54, %v2321_v55  ;;  %v2319_v62 = vunpack.c.l.bf16 %v3114_v49 }
 0x63a   : >> { %4004 = vpow2.f32 %v3100_v34  ;;  %v5423_v4 = vpop.f32.mrb[40].mxu1  ;;  %v2322_v27 = vunpack.c.h.bf16 %v3115_v31  ;;  %v2320_v55 = vunpack.c.h.bf16 %v3114_v49 }
 0x63b   : >> { %v5421_v63 = vpop.eup %3986  ;;  %4006 = vpow2.f32 %v3098_v56  ;;  %v5427_v39 = vpop.f32.mrb[41].mxu1  ;;  %v3134_v54 = vmul.f32 -1.442695, %v2434_v16 }
 0x63c   : >> { %v3989_v58 = vpop.eup %3988  ;;  %4008 = vpow2.f32 %v3101_v59  ;;  %v5429_v34 = vpop.f32.mrb[42].mxu1 }
 0x63d   : >> { %v3991_v57 = vpop.eup %3990  ;;  %v2213_v2 = vadd.f32 1.0, %v3989_v58  ;;  %4010 = vpow2.f32 %v3099_v33  ;;  %v5431_v56 = vpop.f32.mrb[43].mxu1  ;;  %v2431_v33 = vadd.f32 %v5396_v43, %v2318_v8 }
 0x63e   : >> { %v3993_v40 = vpop.eup %3992  ;;  %v2211_v18 = vadd.f32 1.0, %v3991_v57  ;;  %4012 = vtanh.f32 %v2430_v22  ;;  %v2429_v57 = vadd.f32 %v5399_v32, %v2316_v1  ;;  %v2433_v32 = vadd.f32 %v5412_v53, %v2320_v55 }
 0x63f   : >> { %v3995_v29 = vpop.eup %3994  ;;  %4014 = vrcp.f32 %v2213_v2  ;;  %v2214_v59 = vadd.f32 1.0, %v3993_v40  ;;  %v2432_v2 = vadd.f32 %v5407_v38, %v2319_v62  ;;  %v2435_v40 = vadd.f32 %v3434_v9, %v2322_v27 }
 0x640   : >> { %v3997_v42 = vpop.eup %3996  ;;  %4016 = vrcp.f32 %v2211_v18  ;;  %v2212_v5 = vadd.f32 1.0, %v3995_v29  ;;  %v3133_v53 = vmul.f32 -1.442695, %v2433_v32 }
 0x641   : >> { %v3999_v58 = vpop.eup %3998  ;;  %4018 = vrcp.f32 %v2214_v59  ;;  %v2514_v1 = vmul.f32 %v3997_v42, %v5300_v46  ;;  %v3132_v62 = vmul.f32 -1.442695, %v2432_v2  ;;  %v2177_v46 = vadd.f32 %v5423_v4, %v4818_v25 }
 0x642   : >> { %v4001_v22 = vpop.eup %4000  ;;  %4020 = vrcp.f32 %v2212_v5  ;;  %v3413_v26 = vpop.f32.mrb[44].mxu1  ;;  %v2512_v2 = vmul.f32 %v3999_v58, %v5308_v44 }
 0x643   : >> { %v4003_v19 = vpop.eup %4002  ;;  %4022 = vtanh.f32 %v2428_v11  ;;  %v2184_v18 = vpop.f32.mrb[45].mxu1  ;;  %v3135_v11 = vmul.f32 -1.442695, %v2435_v40  ;;  %v2515_v40 = vmul.f32 %v4001_v22, %v5322_v21 }
 0x644   : >> { %v4005_v51 = vpop.eup %4004  ;;  %4024 = vtanh.f32 %v2431_v33  ;;  %v3414_v31 = vpop.f32.mrb[46].mxu1 }
 0x645   : >> { %v4007_v29 = vpop.eup %4006  ;;  %v2237_v43 = vadd.f32 1.0, %v4005_v51  ;;  %4026 = vtanh.f32 %v2429_v57  ;;  %v2187_v5 = vpop.f32.mrb[47].mxu1 }
 0x646   : >> { %v4009_v8 = vpop.eup %4008  ;;  %v2235_v59 = vadd.f32 1.0, %v4007_v29  ;;  %4028 = vpow2.f32 %v3134_v54  ;;  %v2180_v29 = vadd.f32 %v5429_v34, %v4816_v24 }
 0x647   : >> { %v4011_v49 = vpop.eup %4010  ;;  %4030 = vrcp.f32 %v2237_v43  ;;  %v2238_v38 = vadd.f32 1.0, %v4009_v8  ;;  %v2513_v8 = vmul.f32 %v4003_v19, %v5328_v60 }
 0x648   : >> { %v4013_v16 = vpop.eup %4012  ;;  %4032 = vrcp.f32 %v2235_v59  ;;  %v2236_v9 = vadd.f32 1.0, %v4011_v49 }
 0x649   : >> { %v5439_v33 = vpop.eup %4014  ;;  %4034 = vrcp.f32 %v2238_v38  ;;  %v2518_v27 = vmul.f32 %v4013_v16, %v5414_v28  ;;  %v2169_v28 = vadd.f32 %v5427_v39, %v4814_v17  ;;  %v2193_v39 = vadd.f32 %v3413_v26, %v4826_v20 }
 0x64a   : >> { %v5442_v57 = vpop.eup %4016  ;;  %4036 = vrcp.f32 %v2236_v9  ;;  %v2196_v38 = vadd.f32 %v3414_v31, %v5760_v50  ;;  %v2188_v16 = vadd.f32 %v2187_v5, %v5762_v12 }
 0x64b   : >> { %v5444_v54 = vpop.eup %4018  ;;  %v5446_v55 = vadd.f32 %v2518_v27, %v2514_v1   ;;  %4038 = vpow2.f32 %v3132_v62 }
 0x64c   : >> { %v5450_v42 = vpop.eup %4020  ;;  %4040 = vpow2.f32 %v3135_v11 }
 0x64d   : >> { %v4023_v51 = vpop.eup %4022  ;;  %4042 = vtanh.f32 %v5446_v55 }
 0x64e   : >> { %v4025_v43 = vpop.eup %4024  ;;  %v2516_v4 = vmul.f32 %v4023_v51, %v5417_v7  ;;  %4044 = vpow2.f32 %v3133_v53  ;;  %v2172_v7 = vadd.f32 %v5431_v56, %v5759_v14 }
 0x64f   : >> { %v4027_v59 = vpop.eup %4026  ;;  %v2519_v44 = vmul.f32 %v4025_v43, %v5419_v15  ;;  %4046 = vtanh.f32 %v2177_v46  ;;  %v2185_v15 = vadd.f32 %v2184_v18, %v5758_v52 }
 0x650   : >> { %v4029_v58 = vpop.eup %4028  ;;  %v5463_v32 = vadd.f32 %v2516_v4, %v2512_v2   ;;  %v2517_v21 = vmul.f32 %v4027_v59, %v5421_v63  ;;  %4048 = vtanh.f32 %v2169_v28  ;;  %v3104_v63 = vmul.f32 -1.442695, %v2193_v39 }
 0x651   : >> { %v4031_v22 = vpop.eup %4030  ;;  %v5466_v49 = vadd.f32 %v2519_v44, %v2515_v40   ;;  %v2502_v34 = vadd.f32 1.0, %v4029_v58  ;;  %4050 = vtanh.f32 %v2180_v29  ;;  %v3102_v27 = vmul.f32 -1.442695, %v2185_v15 }
 0x652   : >> { %v4033_v60 = vpop.eup %4032  ;;  %4052 = vtanh.f32 %v5463_v32  ;;  %v5469_v19 = vadd.f32 %v2517_v21, %v2513_v8   ;;  %v2277_v46 = vmul.f32 %v4031_v22, %v5341_v48  ;;  %v3105_v2 = vmul.f32 -1.442695, %v2196_v38 }
 0x653   : >> { %v4035_v26 = vpop.eup %4034  ;;  %4054 = vtanh.f32 %v5466_v49  ;;  %v2275_v51 = vmul.f32 %v4033_v60, %v5343_v23  ;;  %v3103_v40 = vmul.f32 -1.442695, %v2188_v16 }
 0x654   : >> { %v4037_v1 = vpop.eup %4036  ;;  %4056 = vtanh.f32 %v5469_v19  ;;  %v2278_v5 = vmul.f32 %v4035_v26, %v5350_v47 }
 0x655   : >> { %v4039_v62 = vpop.eup %4038  ;;  %4058 = vrcp.f32 %v2502_v34 }
 0x656   : >> { %v4041_v9 = vpop.eup %4040  ;;  %v2500_v11 = vadd.f32 1.0, %v4039_v62  ;;  %4060 = vtanh.f32 %v2172_v7 }
 0x657   : >> { %v4043_v56 = vpop.eup %4042  ;;  %v2503_v53 = vadd.f32 1.0, %v4041_v9  ;;  %4062 = vpow2.f32 %v3104_v63 }
 0x658   : >> { %v4045_v18 = vpop.eup %4044  ;;  %4064 = vrcp.f32 %v2500_v11 }
 0x659   : >> { %v4047_v28 = vpop.eup %4046  ;;  %4066 = vrcp.f32 %v2503_v53  ;;  %v2501_v31 = vadd.f32 1.0, %v4045_v18 }
 0x65a   : >> { %v4049_v29 = vpop.eup %4048  ;;  %v2281_v43 = vmul.f32 %v4047_v28, %v5439_v33  ;;  %4068 = vpow2.f32 %v3102_v27  ;;  %v2276_v33 = vmul.f32 %v4037_v1, %v5353_v13 }
 0x65b   : >> { %v4051_v8 = vpop.eup %4050  ;;  %4070 = vrcp.f32 %v2501_v31  ;;  %v2279_v4 = vmul.f32 %v4049_v29, %v5442_v57 }
 0x65c   : >> { %v4053_v59 = vpop.eup %4052  ;;  %v5483_v48 = vadd.f32 %v2281_v43, %v2277_v46  ;;  %v2282_v44 = vmul.f32 %v4051_v8, %v5444_v54  ;;  %4072 = vpow2.f32 %v3105_v2 }
 0x65d   : >> { %v4055_v23 = vpop.eup %4054  ;;  %v5486_v39 = vadd.f32 %v2279_v4, %v2275_v51  ;;  %4074 = vpow2.f32 %v3103_v40 }
 0x65e   : >> { %v4057_v58 = vpop.eup %4056  ;;  %v5488_v21 = vadd.f32 %v2282_v44, %v2278_v5  ;;  %4076 = vtanh.f32 %v5483_v48 }
 0x65f   : >> { %v4059_v47 = vpop.eup %4058  ;;  %4078 = vtanh.f32 %v5486_v39 }
 0x660   : >> { %v4061_v22 = vpop.eup %4060  ;;  %v5491_v29 = vmul.f32 %v4059_v47, %v4043_v56   ;;  %4080 = vtanh.f32 %v5488_v21 }
 0x661   : >> { %v4063_v57 = vpop.eup %4062  ;;  %v2280_v34 = vmul.f32 %v4061_v22, %v5450_v42 }
 0x662   : >> { %v4065_v60 = vpop.eup %4064  ;;  %v2265_v7 = vadd.f32 1.0, %v4063_v57 }
 0x663   : >> { %v4067_v54 = vpop.eup %4066  ;;  %v5495_v15 = vadd.f32 %v2280_v34, %v2276_v33  ;;  %v5497_v31 = vmul.f32 %v4065_v60, %v4053_v59   ;;  %v5789_v60 = vld [vmem:[#allocation61_spill] sm:$0xff] }
 0x664   : >> { %v4069_v26 = vpop.eup %4068  ;;  %v5500_v63 = vmul.f32 %v4067_v54, %v4055_v23   ;;  %4082 = vrcp.f32 %v2265_v7 }
 0x665   : >> { %v4071_v13 = vpop.eup %4070  ;;  %v2263_v1 = vadd.f32 1.0, %v4069_v26  ;;  %4084 = vtanh.f32 %v5495_v15  ;;  %v5790_v26 = vld [vmem:[#allocation59_spill] sm:$0xff] }
 0x666   : >> { %v4073_v38 = vpop.eup %4072  ;;  %v5503_v42 = vmul.f32 %v4071_v13, %v4057_v58   ;;  %v2533_v16 = vpack.c.bf16 %v5500_v63, %v5491_v29 }
 0x667   : >> { %v4075_v9 = vpop.eup %4074  ;;  %v2266_v11 = vadd.f32 1.0, %v4073_v38  ;;  %4086 = vrcp.f32 %v2263_v1 }
 0x668   : >> { %v5788_v62 = vmov %v5503_v42  ;;  %v2264_v27 = vadd.f32 1.0, %v4075_v9  ;;  %v4077_v53 = vpop.eup %4076  ;;  %v5791_v42 = vld [vmem:[#allocation60_spill] sm:$0xff] }
 0x669   : >> { %v2532_v56 = vpack.c.bf16 %v5788_v62, %v5497_v31  ;;  %4088 = vrcp.f32 %v2266_v11  ;;  %v4079_v18 = vpop.eup %4078 }
 0x66a   : >> { %4090 = vrcp.f32 %v2264_v27  ;;  %v4081_v46 = vpop.eup %4080  ;;  %v5792_v27 = vld [vmem:[#allocation58_spill] sm:$0xff] }
 0x66b   : >> { %3435 = vmatprep.subr.bf16.mxu1 %v2532_v56 }
 0x66c   : >> { %3436 = vmatpush3.bf16.msra.mxu1 %v2532_v56 }
 0x66d   : >> { %3437 = vmatprep.subr.bf16.mxu1 %v2533_v16 }
 0x66e   : >> { %v4083_v2 = vpop.eup %4082 }
 0x66f   : >> { %v4085_v28 = vpop.eup %4084  ;;  %v2293_v43 = vmul.f32 %v4083_v2, %v4077_v53 }
 0x670   : >> { %3438 = vmatpush3.bf16.msra.mxu1 %v2533_v16 }
 0x671   : >> { %v4087_v51 = vpop.eup %4086 }
 0x672   : >> { %v2291_v4 = vmul.f32 %v4087_v51, %v4079_v18 }
 0x673   : >> { %v4089_v40 = vpop.eup %4088 }
 0x674   : >> { %v4091_v5 = vpop.eup %4090  ;;  %v2294_v8 = vmul.f32 %v4089_v40, %v4081_v46 }
 0x675   : >> { %v2292_v59 = vmul.f32 %v4091_v5, %v4085_v28 }
 0x676   : >> { %v2537_v44 = vpack.c.bf16 %v2294_v8, %v2293_v43 }
 0x677   : >> { %v2536_v23 = vpack.c.bf16 %v2292_v59, %v2291_v4 }
 0x679   : >> { %3439 = vmatprep.subr.bf16.mxu1 %v2536_v23 }
 0x67a   : >> { %3440 = vmatpush3.bf16.msra.mxu1 %v2536_v23 }
 0x67b   : >> { %3441 = vmatprep.subr.bf16.mxu1 %v2537_v44 }
 0x67e   : >> { %3442 = vmatpush3.bf16.msra.mxu1 %v2537_v44 }
 0x681   : >> { %3444 = vmatmul.mubr.msk.bf16.vlgmr.msra.gmra.mrb[48].mxu1 %vm1193_vm3, %v5053_v0 }
 0x682   : >> { %3447 = vmatprep.mubr.msk.bf16.mxu1 %vm1193_vm3, %v5057_v45 }
 0x689   : >> { %3448 = vmatmul.mubr.msk.bf16.gmra.mrb[52].mxu1 %vm1193_vm3, %v5069_v6 }
 0x68a   : >> { %3451 = vmatprep.mubr.msk.bf16.mxu1 %vm1193_vm3, %v5073_v30 }
 0x691   : >> { %3452 = vmatmul.mubr.msk.bf16.gmra.mrb[56].mxu1 %vm1193_vm3, %v5763_v61 }
 0x692   : >> { %3455 = vmatprep.mubr.msk.bf16.mxu1 %vm1193_vm3, %v5775_v35 }
 0x699   : >> { %3456 = vmatmul.mubr.msk.bf16.gmra.mrb[60].mxu1 %vm1193_vm3, %v5776_v36 }
 0x754   : >> { %v3445_v58 = vpop.f32.mrb[48].mxu1 }
 0x755   : >> { %v2587_v0 = vadd.f32 %v3445_v58, %v5778_v37  ;;  %v2578_v47 = vpop.f32.mrb[49].mxu1 }
 0x756   : >> { %v2579_v45 = vadd.f32 %v2578_v47, %v5779_v41  ;;  %v3446_v33 = vpop.f32.mrb[50].mxu1 }
 0x757   : >> { %v3146_v6 = vmul.f32 -1.442695, %v2587_v0  ;;  %v2590_v22 = vadd.f32 %v3446_v33, %v5781_v10  ;;  %v2581_v30 = vpop.f32.mrb[51].mxu1 }
 0x758   : >> { %v3144_v57 = vmul.f32 -1.442695, %v2579_v45  ;;  %v2582_v61 = vadd.f32 %v2581_v30, %v5783_v3 }
 0x759   : >> { %4092 = vpow2.f32 %v3146_v6  ;;  %v3147_v34 = vmul.f32 -1.442695, %v2590_v22 }
 0x75a   : >> { %4094 = vpow2.f32 %v3144_v57  ;;  %v3145_v35 = vmul.f32 -1.442695, %v2582_v61 }
 0x75b   : >> { %4096 = vpow2.f32 %v3147_v34 }
 0x75c   : >> { %4098 = vpow2.f32 %v3145_v35  ;;  %v3449_v36 = vpop.f32.mrb[52].mxu1 }
 0x75d   : >> { %v2603_v7 = vadd.f32 %v3449_v36, %v5789_v60  ;;  %v2594_v54 = vpop.f32.mrb[53].mxu1 }
 0x75e   : >> { %v2595_v13 = vadd.f32 %v2594_v54, %v5790_v26  ;;  %v3450_v1 = vpop.f32.mrb[54].mxu1 }
 0x75f   : >> { %v3150_v38 = vmul.f32 -1.442695, %v2603_v7  ;;  %v2606_v16 = vadd.f32 %v3450_v1, %v5791_v42  ;;  %v2597_v9 = vpop.f32.mrb[55].mxu1 }
 0x760   : >> { %v3148_v11 = vmul.f32 -1.442695, %v2595_v13  ;;  %v2598_v56 = vadd.f32 %v2597_v9, %v5792_v27 }
 0x761   : >> { %4100 = vpow2.f32 %v3150_v38  ;;  %v3151_v53 = vmul.f32 -1.442695, %v2606_v16 }
 0x762   : >> { %4102 = vpow2.f32 %v3148_v11  ;;  %v3149_v18 = vmul.f32 -1.442695, %v2598_v56 }
 0x763   : >> { %v4093_v46 = vpop.eup %4092  ;;  %4104 = vpow2.f32 %v3151_v53 }
 0x764   : >> { %v4095_v2 = vpop.eup %4094  ;;  %v2655_v28 = vadd.f32 1.0, %v4093_v46  ;;  %4106 = vpow2.f32 %v3149_v18  ;;  %v3453_v51 = vpop.f32.mrb[56].mxu1 }
 0x765   : >> { %v4097_v40 = vpop.eup %4096  ;;  %v2653_v5 = vadd.f32 1.0, %v4095_v2  ;;  %v2610_v43 = vpop.f32.mrb[57].mxu1  ;;  %v2619_v59 = vadd.f32 %v3453_v51, %v4818_v25 }
 0x766   : >> { %v4099_v8 = vpop.eup %4098  ;;  %4108 = vrcp.f32 %v2655_v28  ;;  %v2656_v4 = vadd.f32 1.0, %v4097_v40  ;;  %v3454_v44 = vpop.f32.mrb[58].mxu1  ;;  %v2611_v58 = vadd.f32 %v2610_v43, %v4814_v17 }
 0x767   : >> { %4110 = vrcp.f32 %v2653_v5  ;;  %v2654_v23 = vadd.f32 1.0, %v4099_v8  ;;  %v2613_v0 = vpop.f32.mrb[59].mxu1  ;;  %v2622_v47 = vadd.f32 %v3454_v44, %v4816_v24 }
 0x768   : >> { %4112 = vrcp.f32 %v2656_v4  ;;  %v2614_v45 = vadd.f32 %v2613_v0, %v5759_v14 }
 0x769   : >> { %4114 = vrcp.f32 %v2654_v23 }
 0x76a   : >> { %4116 = vtanh.f32 %v2619_v59 }
 0x76b   : >> { %v4101_v33 = vpop.eup %4100  ;;  %4118 = vtanh.f32 %v2611_v58 }
 0x76c   : >> { %v4103_v6 = vpop.eup %4102  ;;  %v2679_v22 = vadd.f32 1.0, %v4101_v33  ;;  %4120 = vtanh.f32 %v2622_v47  ;;  %v3457_v30 = vpop.f32.mrb[60].mxu1 }
 0x76d   : >> { %v4105_v57 = vpop.eup %4104  ;;  %v2677_v61 = vadd.f32 1.0, %v4103_v6  ;;  %4122 = vtanh.f32 %v2614_v45  ;;  %v2635_v34 = vadd.f32 %v3457_v30, %v4826_v20  ;;  %v2626_v35 = vpop.f32.mrb[61].mxu1 }
 0x76e   : >> { %v4107_v36 = vpop.eup %4106  ;;  %4124 = vrcp.f32 %v2679_v22  ;;  %v2680_v60 = vadd.f32 1.0, %v4105_v57  ;;  %v2627_v7 = vadd.f32 %v2626_v35, %v5758_v52  ;;  %v3458_v54 = vpop.f32.mrb[62].mxu1 }
 0x76f   : >> { %4126 = vrcp.f32 %v2677_v61  ;;  %v2678_v26 = vadd.f32 1.0, %v4107_v36  ;;  %v3154_v13 = vmul.f32 -1.442695, %v2635_v34  ;;  %v2638_v1 = vadd.f32 %v3458_v54, %v5760_v50  ;;  %v2629_v38 = vpop.f32.mrb[63].mxu1 }
 0x770   : >> { %v4109_v42 = vpop.eup %4108  ;;  %4128 = vrcp.f32 %v2680_v60  ;;  %v3152_v16 = vmul.f32 -1.442695, %v2627_v7  ;;  %v2630_v9 = vadd.f32 %v2629_v38, %v5762_v12 }
 0x771   : >> { %v4111_v11 = vpop.eup %4110  ;;  %4130 = vrcp.f32 %v2678_v26  ;;  %v3155_v27 = vmul.f32 -1.442695, %v2638_v1 }
 0x772   : >> { %v4113_v56 = vpop.eup %4112  ;;  %4132 = vpow2.f32 %v3154_v13  ;;  %v3153_v53 = vmul.f32 -1.442695, %v2630_v9 }
 0x773   : >> { %v4115_v18 = vpop.eup %4114  ;;  %4134 = vpow2.f32 %v3152_v16  ;;  %v5804_v16 = vld [vmem:[#allocation66_spill] sm:$0xff] (%p5545_p10) }
 0x774   : >> { %v4117_v46 = vpop.eup %4116  ;;  %4136 = vpow2.f32 %v3155_v27 }
 0x775   : >> { %v4119_v2 = vpop.eup %4118  ;;  %v2723_v28 = vmul.f32 %v4117_v46, %v4109_v42  ;;  %4138 = vpow2.f32 %v3153_v53 }
 0x776   : >> { %v4121_v51 = vpop.eup %4120  ;;  %v2721_v40 = vmul.f32 %v4119_v2, %v4111_v11 }
 0x777   : >> { %v4123_v5 = vpop.eup %4122  ;;  %v2724_v43 = vmul.f32 %v4121_v51, %v4113_v56  ;;  %v5799_v56 = vmov %v5469_v19  ;;  %v4325_v19 = vmov (%p5545_p10), 0.0  }
 0x778   : >> { %v4125_v8 = vpop.eup %4124  ;;  %v2722_v4 = vmul.f32 %v4123_v5, %v4115_v18  ;;  %3459 = vmatprep.subr.bf16.mxu0 (%p5545_p10), %v4325_v19  ;;  %3463 = vmatprep.mubr.msk.bf16.mxu0 (%p5545_p10), %vm4326_vm4, %v4325_v19 }
 0x779   : >> { %v4127_v59 = vpop.eup %4126  ;;  %v2719_v44 = vmul.f32 %v4125_v8, %v5483_v48 }
 0x77a   : >> { %v4129_v23 = vpop.eup %4128  ;;  %v2717_v58 = vmul.f32 %v4127_v59, %v5486_v39 }
 0x77b   : >> { %v4131_v0 = vpop.eup %4130  ;;  %v2720_v47 = vmul.f32 %v4129_v23, %v5488_v21  ;;  %v2727_v27 = vadd.f32 %v2723_v28, %v2719_v44  }
 0x77c   : >> { %v4133_v45 = vpop.eup %4132  ;;  %v2718_v33 = vmul.f32 %v4131_v0, %v5495_v15  ;;  %v2725_v44 = vadd.f32 %v2721_v40, %v2717_v58  }
 0x77d   : >> { %v4135_v6 = vpop.eup %4134  ;;  %4140 = vtanh.f32 %v2727_v27  ;;  %v2728_v28 = vadd.f32 %v2724_v43, %v2720_v47   ;;  %v2707_v22 = vadd.f32 1.0, %v4133_v45  ;;  %v5798_v47 = vmov %v5446_v55 }
 0x77e   : >> { %v4137_v30 = vpop.eup %4136  ;;  %4142 = vtanh.f32 %v2725_v44  ;;  %v2726_v43 = vadd.f32 %v2722_v4, %v2718_v33   ;;  %v2705_v57 = vadd.f32 1.0, %v4135_v6 }
 0x77f   : >> { %v4139_v48 = vpop.eup %4138  ;;  %4144 = vtanh.f32 %v2728_v28  ;;  %v2708_v61 = vadd.f32 1.0, %v4137_v30  ;;  %v5802_v30 = vmov %v5788_v62 }
 0x780   : >> { %4146 = vtanh.f32 %v2726_v43  ;;  %v2706_v39 = vadd.f32 1.0, %v4139_v48 }
 0x781   : >> { %4148 = vrcp.f32 %v2707_v22 }
 0x782   : >> { %4150 = vrcp.f32 %v2705_v57  ;;  %v5800_v57 = vmov %v5463_v32 }
 0x783   : >> { %4152 = vrcp.f32 %v2708_v61 }
 0x784   : >> { %4154 = vrcp.f32 %v2706_v39 }
 0x787   : >> { %v4141_v21 = vpop.eup %4140 }
 0x788   : >> { %v4143_v15 = vpop.eup %4142 }
 0x789   : >> { %v4145_v34 = vpop.eup %4144 }
 0x78a   : >> { %v4147_v35 = vpop.eup %4146 }
 0x78b   : >> { %v4149_v36 = vpop.eup %4148  ;;  %819 = sbr.rel (!%p5545_p10) target bundleno = 465 (0x1d1), region = 159 }
 0x78c   : >> { %v4151_v60 = vpop.eup %4150  ;;  %v2735_v7 = vmul.f32 %v4149_v36, %v4141_v21  }
 0x78d   : >> { %v4153_v54 = vpop.eup %4152  ;;  %v2733_v13 = vmul.f32 %v4151_v60, %v4143_v15  }
 0x78e   : >> { %v4155_v26 = vpop.eup %4154  ;;  %v2736_v1 = vmul.f32 %v4153_v54, %v4145_v34   ;;  %v5795_v42 = vmov %v2735_v7 }
 0x78f   : >> { %v2734_v38 = vmul.f32 %v4155_v26, %v4147_v35   ;;  %v5797_v45 = vmov %v2733_v13  ;;  %v5801_v26 = vmov %v5500_v63  ;;  %v5803_v63 = vld [vmem:[#allocation51_spill] sm:$0xff] (%p5545_p10) }
 0x790   : >> { %v5794_v46 = vmov %v2736_v1  ;;  %v2738_v32 = vpack.c.bf16 (%p5545_p10), %v2736_v1, %v2735_v7 }
 0x791   : >> { %v5796_v22 = vmov %v2734_v38  ;;  %v2737_v55 = vpack.c.bf16 (%p5545_p10), %v2734_v38, %v2733_v13 }
 0x793   : > { %3460 = vmatpush3.bf16.msra.mxu0 %v2737_v55 }
 0x794   : > { %3461 = vmatprep.subr.bf16.mxu0 %v4325_v19 }
 0x797   : > { %3462 = vmatpush3.bf16.msra.mxu0 %v2738_v32 }
 0x79a   : > { %3464 = vmatmul.mubr.msk.bf16.vlgmr.msra.gmra.mrb[0].mxu0 %vm907_vm2, %v5803_v63 }
 0x86d   : > { %v2777_v62 = vpop.f32.mrb[0].mxu0 }
 0x86e   : > { %v2778_v31 = vadd.f32 %v2777_v62, %v5804_v16  ;;  %v3465_v9 = vpop.f32.mrb[1].mxu0 }
 0x86f   : > { %v2780_v11 = vpop.f32.mrb[2].mxu0 }
 0x870   : > { %2783 = vst [vmem:[%s4517_s10] sm:$0xff] %v2778_v31  ;;  %v3466_v53 = vpop.f32.mrb[3].mxu0 }
 0x871 PF: > { %p15_p11 = scmp.ge.s32.totalorder %s4389_s9, 4   ;;  %s5805_s27 = smov %s4246_s28 }
 0x872   : > { %s5806_s28 = smov %s4398_s12  ;;  %s5807_s29 = smov %s4389_s9 }
 0x873   :  { %17 = sbr.rel (!%p15_p11) target bundleno = 2 (0x2), region = 170 }

</bundles_post_ra>
